<compile_context>
chip_gen: v7x
topology: tpu7x:2x2x1
jax: 0.10.0
libtpu: 0.0.40
codegen_flags: <defaults>
</compile_context>

<pallas_src>
import functools
import math

import jax
import jax.numpy as jnp
from jax import lax
from jax.experimental import pallas as pl
from jax.experimental.pallas import tpu as pltpu


# ----------------------------------------------------------------------------
# Fused kernel: unproject + view2ndc + encoder MLP + per-view transform/project
#               + average splat (one MXU matmul over all views) + decoder MLP
# ----------------------------------------------------------------------------

def _model3d_fused_kernel(scal_ref, uv_ref, z_ref, rgb_ref,
                          ew1_ref, eb1_ref, ew2_ref, eb2_ref,
                          dw1_ref, db1_ref, dw2_ref, db2_ref,
                          out_ref, uvzv_ref,
                          splat_s, onehot_s,
                          *, h, w, n_views, C, pcd_scale, ndc):
    # scal_ref: (bs, 8 + 16*n_views) SMEM
    #   [0:8]  = inv_fx, inv_fy, cx, cy, (far+near)/(far-near), 2*far*near/(far-near),
    #            1/tan(fov/2), 0
    #   [8+16k : 8+16k+13] = M_k row-major 3x4 (12), tan(tgt_fov_k/2)
    b = pl.program_id(0)
    p = uv_ref.shape[-1]
    hw = h * w
    N = n_views * hw

    inv_fx = scal_ref[b, 0]
    inv_fy = scal_ref[b, 1]
    cx = scal_ref[b, 2]
    cy = scal_ref[b, 3]
    ndc_a = scal_ref[b, 4]
    ndc_b = scal_ref[b, 5]
    inv_thf = scal_ref[b, 6]

    u = uv_ref[0, 0:1, :]                 # (1, p)
    v = uv_ref[0, 1:2, :]
    zz = z_ref[0, 0:1, :]
    rgb3 = rgb_ref[0]                     # (3, p)

    # unprojection (pinhole); view-space xyz stays in vregs (never touches HBM)
    x = zz * (u - cx) * inv_fx
    y = zz * (v - cy) * inv_fy

    # view -> NDC (ar = 1), scaled by pcd_scale (matches original view2ndc * pcd_scale)
    if ndc:
        inv_z = pl.reciprocal(zz, approx=True)
        x_e = x * inv_z * inv_thf * pcd_scale
        y_e = y * inv_z * inv_thf * pcd_scale
        z_e = (ndc_a - ndc_b * inv_z) * pcd_scale
    else:
        x_e, y_e, z_e = x, y, zz

    # encoder input (8, p): [xyz_ndc(3), rgb(3), zero pad(2)] -> shared pointwise MLP (MXU)
    enc_in = jnp.concatenate(
        [x_e, y_e, z_e, rgb3, jnp.zeros((2, p), jnp.float32)], axis=0)
    hdn = jnp.dot(ew1_ref[...], enc_in, preferred_element_type=jnp.float32) + eb1_ref[...]
    hdn = jnp.maximum(hdn, 0.0)
    feats = jnp.dot(ew2_ref[...], hdn, preferred_element_type=jnp.float32) + eb2_ref[...]
    feats = jnp.maximum(feats, 0.0)

    # splat operand (C+8, p): [feats(C), rgb(3), ones(1 -> valid count), pad(4)]
    # (pcd_size == p, so raw_xyz/raw_rgb == xyz/rgb: pred + tgt splats share one matmul)
    splat_s[0:C, :] = feats
    splat_s[C:C + 8, :] = jnp.concatenate(
        [rgb3, jnp.ones((1, p), jnp.float32), jnp.zeros((4, p), jnp.float32)], axis=0)

    # ---- per-view: transform (VPU FMAs) + projection (EUP recips) + one-hot build ----
    CH = 32                               # 32-sublane chunks bound live vregs per step
    n_chunks = hw // CH
    for k in range(n_views):              # n_views is small & static
        off = 8 + 16 * k
        m00 = scal_ref[b, off + 0]
        m01 = scal_ref[b, off + 1]
        m02 = scal_ref[b, off + 2]
        t0 = scal_ref[b, off + 3]
        m10 = scal_ref[b, off + 4]
        m11 = scal_ref[b, off + 5]
        m12 = scal_ref[b, off + 6]
        t1 = scal_ref[b, off + 7]
        m20 = scal_ref[b, off + 8]
        m21 = scal_ref[b, off + 9]
        m22 = scal_ref[b, off + 10]
        t2 = scal_ref[b, off + 11]
        thf_t = scal_ref[b, off + 12]

        nx = m00 * x + m01 * y + m02 * zz + t0
        ny = m10 * x + m11 * y + m12 * zz + t1
        nz = m20 * x + m21 * y + m22 * zz + t2

        zs = jnp.where(jnp.abs(nz) < 1e-8, 1e-8, nz)
        inv = pl.reciprocal(zs * thf_t, approx=True)
        u_pix = (nx * inv + 1.0) * (0.5 * (w - 1))
        v_pix = (ny * inv + 1.0) * (0.5 * (h - 1))
        valid = ((nz > 1e-6) & (u_pix >= 0.0) & (u_pix <= w - 1.0)
                 & (v_pix >= 0.0) & (v_pix <= h - 1.0))
        validf = valid.astype(jnp.float32)

        # one (4, p) store per view (no 1-sublane masked stores)
        uvzv_ref[0, k, :, :] = jnp.concatenate([u_pix, v_pix, nz, validf], axis=0)

        ui = jnp.clip(jnp.floor(u_pix + 0.5), 0.0, w - 1.0).astype(jnp.int32)
        vi = jnp.clip(jnp.floor(v_pix + 0.5), 0.0, h - 1.0).astype(jnp.int32)
        pix = vi * w + ui                                      # (1, p) pixel id in view k

        # chunked one-hot materialization into VMEM scratch: each chunk's compare is
        # consumed by its store immediately, so only ~O(CH*p/1024) vregs stay live.
        base = k * hw
        for c in range(n_chunks):
            r0 = base + c * CH
            rows = lax.broadcasted_iota(jnp.int32, (CH, p), 0) + (c * CH)
            onehot_s[r0:r0 + CH, :] = ((rows == pix) & valid).astype(jnp.float32)

    # ---- ONE splat matmul over all views: (C+8, p) x (v*hw, p)^T -> (C+8, v*hw) ----
    res = lax.dot_general(splat_s[...], onehot_s[...],
                          (((1,), (1,)), ((), ())),
                          preferred_element_type=jnp.float32)
    cnt = jnp.maximum(res[C + 3:C + 4, :], 1.0)                # (1, N) valid count
    inv_cnt = pl.reciprocal(cnt, approx=True)
    feat_img = res[0:C, :] * inv_cnt                           # (C, N)
    tgt_img = res[C:C + 3, :] * inv_cnt                        # (3, N)

    # decoder (1x1-conv MLP) over all rendered views at once
    hdn2 = jnp.dot(dw1_ref[...], feat_img, preferred_element_type=jnp.float32) + db1_ref[...]
    hdn2 = jnp.maximum(hdn2, 0.0)
    rgb_out = jnp.dot(dw2_ref[...], hdn2, preferred_element_type=jnp.float32) + db2_ref[...]

    # packed output slab: rows [0:3]=pred_rgb, [3:6]=tgt_rgb, [6:8]=pad, [8:8+C]=pred_feats
    out_ref[0, 0:8, :] = jnp.concatenate(
        [rgb_out, tgt_img, jnp.zeros((2, N), jnp.float32)], axis=0)
    out_ref[0, 8:8 + C, :] = feat_img


# ----------------------------------------------------------------------------
# Model3D forward (render_then_decode=True path, stylization=False, rgb_only=False)
# ----------------------------------------------------------------------------

def model3d_forward(params, input_dict, h=16, w=None, ndc=True, pcd_scale=1.0):
    K = input_dict['K']                      # (bs, 5): fov, fx, fy, cx, cy
    fov = K[:, 0]
    Ms = input_dict['Ms']                    # (bs, v, 3, 4)
    bs = K.shape[0]
    n_views = Ms.shape[1]
    tgt_fovs = input_dict.get('tgt_fovs', jnp.repeat(fov[:, None], n_views, axis=1))
    if w is None:
        w = h
    hw = h * w
    N = n_views * hw

    rgb = input_dict['src_rgb'].astype(jnp.float32)                       # (bs, 3, p)
    uv_cf = jnp.transpose(input_dict['src_uv'], (0, 2, 1)).astype(jnp.float32)  # (bs, 3, p)
    z_cf = jnp.transpose(input_dict['src_z'], (0, 2, 1)).astype(jnp.float32)    # (bs, 1, p)
    p = rgb.shape[-1]
    C = params['enc_w2'].shape[0]

    # pcd_size == p, so raw_xyz == xyz and raw_rgb == rgb: the tgt (raw) projection path is
    # fully shared with the pred path inside the fused kernel.

    # near/far for NDC (depth passes through unprojection unchanged -> use src_z directly).
    # TODO(synk): torch.quantile is sort-based; kept in plain JAX (same zero-fill semantics
    # as torch's (z * (z < 1e5)).quantile(0.95, 1)).
    zp = z_cf[:, 0, :]
    near = 0.99 * jnp.min(zp, axis=1)
    far = jnp.quantile(zp * (zp < 1e5), 0.95, axis=1)
    far = jnp.maximum(far, 2.0 * near)

    # merged per-batch scalar table (intrinsics + NDC constants + per-view extrinsics)
    thf = jnp.tan(0.5 * fov)
    base_tab = jnp.stack([1.0 / K[:, 1], 1.0 / K[:, 2], K[:, 3], K[:, 4],
                          (far + near) / (far - near),
                          2.0 * far * near / (far - near),
                          1.0 / thf, jnp.zeros_like(thf)], axis=-1)        # (bs, 8)
    view_tab = jnp.concatenate(
        [jnp.reshape(Ms, (bs, n_views, 12)),
         jnp.tan(0.5 * tgt_fovs)[..., None],
         jnp.zeros((bs, n_views, 3), jnp.float32)], axis=-1)               # (bs, v, 16)
    scal = jnp.concatenate([base_tab, view_tab.reshape(bs, n_views * 16)],
                           axis=-1).astype(jnp.float32)                    # (bs, 8+16v)

    weights = (params['enc_w1'], params['enc_b1'], params['enc_w2'], params['enc_b2'],
               params['dec_w1'], params['dec_b1'], params['dec_w2'], params['dec_b2'])

    flops = bs * (2 * C * 8 * p + 2 * C * C * p
                  + 2 * (C + 8) * p * N
                  + 2 * C * C * N + 2 * 3 * C * N)
    transc = bs * (p + n_views * p + N)
    bytes_accessed = 4 * (scal.size + uv_cf.size + z_cf.size + rgb.size
                          + sum(int(x.size) for x in weights)
                          + bs * (C + 8) * N + bs * n_views * 4 * p)

    out_slab, uvzv = pl.pallas_call(
        functools.partial(_model3d_fused_kernel,
                          h=h, w=w, n_views=n_views, C=C,
                          pcd_scale=float(pcd_scale), ndc=bool(ndc)),
        out_shape=(jax.ShapeDtypeStruct((bs, C + 8, N), jnp.float32),
                   jax.ShapeDtypeStruct((bs, n_views, 4, p), jnp.float32)),
        grid=(bs,),
        in_specs=[pl.BlockSpec(memory_space=pltpu.MemorySpace.SMEM),
                  pl.BlockSpec((1, 3, p), lambda b: (b, 0, 0)),
                  pl.BlockSpec((1, 1, p), lambda b: (b, 0, 0)),
                  pl.BlockSpec((1, 3, p), lambda b: (b, 0, 0)),
                  pl.BlockSpec((C, 8), lambda b: (0, 0)),
                  pl.BlockSpec((C, 1), lambda b: (0, 0)),
                  pl.BlockSpec((C, C), lambda b: (0, 0)),
                  pl.BlockSpec((C, 1), lambda b: (0, 0)),
                  pl.BlockSpec((C, C), lambda b: (0, 0)),
                  pl.BlockSpec((C, 1), lambda b: (0, 0)),
                  pl.BlockSpec((3, C), lambda b: (0, 0)),
                  pl.BlockSpec((3, 1), lambda b: (0, 0))],
        out_specs=(pl.BlockSpec((1, C + 8, N), lambda b: (b, 0, 0)),
                   pl.BlockSpec((1, n_views, 4, p), lambda b: (b, 0, 0, 0))),
        scratch_shapes=[pltpu.VMEM((C + 8, p), jnp.float32),      # splat operand
                        pltpu.VMEM((N, p), jnp.float32)],         # one-hot (all views)
        compiler_params=pltpu.CompilerParams(dimension_semantics=("parallel",)),
        cost_estimate=pl.CostEstimate(flops=int(flops),
                                      transcendentals=int(transc),
                                      bytes_accessed=int(bytes_accessed)),
    )(scal, uv_cf, z_cf, rgb, *weights)

    slab = out_slab.reshape(bs, C + 8, n_views, hw)
    output_dict = {
        'pred_rgb': jnp.transpose(slab[:, 0:3], (0, 2, 1, 3)).reshape(bs, n_views, 3, h, w),
        'tgt_rgb': jnp.transpose(slab[:, 3:6], (0, 2, 1, 3)).reshape(bs, n_views, 3, h, w),
        'pred_feats': jnp.transpose(slab[:, 8:8 + C], (0, 2, 1, 3)).reshape(bs, n_views, C, h, w),
    }
    if n_views > 1:
        output_dict['uv'] = jnp.transpose(uvzv[:, :, :2, :], (0, 1, 3, 2))   # (bs, v, p, 2)
        output_dict['viz'] = uvzv[:, :, 3, :] > 0.5                          # (bs, v, p)
    return output_dict


# ----------------------------------------------------------------------------
# Deterministic parameters + example run
# ----------------------------------------------------------------------------

if __name__ == "__main__":
    bs, p, v = 2, 256, 2
    h = w = 16
    C = 32

    key = jax.random.PRNGKey(0)
    k1, k2, k3 = jax.random.split(key, 3)
    fov_val = 60.0 * math.pi / 180.0
    fov = jnp.full((bs,), fov_val, jnp.float32)
    fx = fy = (w / 2.0) / math.tan(0.5 * fov_val)
    K = jnp.stack([fov,
                   jnp.full_like(fov, fx), jnp.full_like(fov, fy),
                   jnp.full_like(fov, w / 2.0), jnp.full_like(fov, h / 2.0)], axis=-1)
    src_uv = jax.random.uniform(k1, (bs, p, 3), jnp.float32, 0.0, float(w))
    src_z = jax.random.uniform(k2, (bs, p, 1), jnp.float32, 1.0, 5.0)
    src_rgb = jax.random.uniform(k3, (bs, 3, p), jnp.float32)

    eye = jnp.eye(3, dtype=jnp.float32)
    M0 = jnp.concatenate([eye, jnp.zeros((3, 1), jnp.float32)], axis=1)
    M1 = jnp.concatenate([eye, jnp.array([[0.1], [0.0], [0.0]], jnp.float32)], axis=1)
    Ms = jnp.broadcast_to(jnp.stack([M0, M1], axis=0)[None], (bs, v, 3, 4))

    input_dict = {'K': K, 'Ms': Ms, 'src_rgb': src_rgb, 'src_z': src_z, 'src_uv': src_uv}

    # synthetic deterministic parameters (encoder input padded to 8 channels)
    pk = jax.random.split(jax.random.PRNGKey(1), 4)
    params = {
        'enc_w1': 0.1 * jax.random.normal(pk[0], (C, 8), jnp.float32),
        'enc_b1': jnp.zeros((C, 1), jnp.float32),
        'enc_w2': 0.1 * jax.random.normal(pk[1], (C, C), jnp.float32),
        'enc_b2': jnp.zeros((C, 1), jnp.float32),
        'dec_w1': 0.1 * jax.random.normal(pk[2], (C, C), jnp.float32),
        'dec_b1': jnp.zeros((C, 1), jnp.float32),
        'dec_w2': 0.1 * jax.random.normal(pk[3], (3, C), jnp.float32),
        'dec_b2': jnp.zeros((3, 1), jnp.float32),
    }

    out = model3d_forward(params, input_dict, h=h, w=w, ndc=True, pcd_scale=1.0)
    out = jax.block_until_ready(out)

    assert out['pred_rgb'].shape == (bs, v, 3, h, w)
    assert out['tgt_rgb'].shape == (bs, v, 3, h, w)
    assert out['pred_feats'].shape == (bs, v, C, h, w)
    assert out['uv'].shape == (bs, v, p, 2)
    assert out['viz'].shape == (bs, v, p)
    assert bool(jnp.isfinite(out['pred_rgb']).all())
    assert bool(jnp.isfinite(out['tgt_rgb']).all())
    assert bool(jnp.isfinite(out['pred_feats']).all())
    print("KERNEL_OK")
</pallas_src>

<mosaic_0001>
module attributes {stable_mosaic.version = 11 : i64} {
  func.func @_model3d_fused_kernel(%arg0: i32, %arg1: memref<2x40xf32, #tpu.memory_space<smem>>, %arg2: memref<1x3x256xf32, #tpu.memory_space<vmem>>, %arg3: memref<1x1x256xf32, #tpu.memory_space<vmem>>, %arg4: memref<1x3x256xf32, #tpu.memory_space<vmem>>, %arg5: memref<32x8xf32, #tpu.memory_space<vmem>>, %arg6: memref<32x1xf32, #tpu.memory_space<vmem>>, %arg7: memref<32x32xf32, #tpu.memory_space<vmem>>, %arg8: memref<32x1xf32, #tpu.memory_space<vmem>>, %arg9: memref<32x32xf32, #tpu.memory_space<vmem>>, %arg10: memref<32x1xf32, #tpu.memory_space<vmem>>, %arg11: memref<3x32xf32, #tpu.memory_space<vmem>>, %arg12: memref<3x1xf32, #tpu.memory_space<vmem>>, %arg13: memref<1x40x512xf32, #tpu.memory_space<vmem>>, %arg14: memref<1x2x4x256xf32, #tpu.memory_space<vmem>>, %arg15: memref<40x256xf32, #tpu.memory_space<vmem>>, %arg16: memref<512x256xf32, #tpu.memory_space<vmem>>) attributes {dimension_semantics = [#tpu.dimension_semantics<parallel>], iteration_bounds = array<i64: 2>, scalar_prefetch = 0 : i64, scratch_operands = 2 : i64, tpu.core_type = #tpu.core_type<tc>, window_params = [{transform_indices = @transform_0, window_bounds = array<i64: 2, 40>}, {transform_indices = @transform_1, window_bounds = array<i64: 1, 3, 256>}, {transform_indices = @transform_2, window_bounds = array<i64: 1, 1, 256>}, {transform_indices = @transform_3, window_bounds = array<i64: 1, 3, 256>}, {pipeline_mode = #tpu.pipeline_mode<synchronous>, transform_indices = @transform_4, window_bounds = array<i64: 32, 8>}, {pipeline_mode = #tpu.pipeline_mode<synchronous>, transform_indices = @transform_5, window_bounds = array<i64: 32, 1>}, {pipeline_mode = #tpu.pipeline_mode<synchronous>, transform_indices = @transform_6, window_bounds = array<i64: 32, 32>}, {pipeline_mode = #tpu.pipeline_mode<synchronous>, transform_indices = @transform_7, window_bounds = array<i64: 32, 1>}, {pipeline_mode = #tpu.pipeline_mode<synchronous>, transform_indices = @transform_8, window_bounds = array<i64: 32, 32>}, {pipeline_mode = #tpu.pipeline_mode<synchronous>, transform_indices = @transform_9, window_bounds = array<i64: 32, 1>}, {pipeline_mode = #tpu.pipeline_mode<synchronous>, transform_indices = @transform_10, window_bounds = array<i64: 3, 32>}, {pipeline_mode = #tpu.pipeline_mode<synchronous>, transform_indices = @transform_11, window_bounds = array<i64: 3, 1>}, {transform_indices = @transform_12, window_bounds = array<i64: 1, 40, 512>}, {transform_indices = @transform_13, window_bounds = array<i64: 1, 2, 4, 256>}]} {
    %0 = arith.index_cast %arg0 : i32 to index
    %c0 = arith.constant 0 : index
    %1 = memref.load %arg1[%0, %c0] : memref<2x40xf32, #tpu.memory_space<smem>>
    %2 = arith.index_cast %arg0 : i32 to index
    %c1 = arith.constant 1 : index
    %3 = memref.load %arg1[%2, %c1] : memref<2x40xf32, #tpu.memory_space<smem>>
    %4 = arith.index_cast %arg0 : i32 to index
    %c2 = arith.constant 2 : index
    %5 = memref.load %arg1[%4, %c2] : memref<2x40xf32, #tpu.memory_space<smem>>
    %6 = arith.index_cast %arg0 : i32 to index
    %c3 = arith.constant 3 : index
    %7 = memref.load %arg1[%6, %c3] : memref<2x40xf32, #tpu.memory_space<smem>>
    %8 = arith.index_cast %arg0 : i32 to index
    %c4 = arith.constant 4 : index
    %9 = memref.load %arg1[%8, %c4] : memref<2x40xf32, #tpu.memory_space<smem>>
    %10 = arith.index_cast %arg0 : i32 to index
    %c5 = arith.constant 5 : index
    %11 = memref.load %arg1[%10, %c5] : memref<2x40xf32, #tpu.memory_space<smem>>
    %12 = arith.index_cast %arg0 : i32 to index
    %c6 = arith.constant 6 : index
    %13 = memref.load %arg1[%12, %c6] : memref<2x40xf32, #tpu.memory_space<smem>>
    %c0_0 = arith.constant 0 : index
    %c0_1 = arith.constant 0 : index
    %c0_2 = arith.constant 0 : index
    %14 = vector.load %arg2[%c0_0, %c0_1, %c0_2] : memref<1x3x256xf32, #tpu.memory_space<vmem>>, vector<1x1x256xf32>
    %15 = vector.shape_cast %14 : vector<1x1x256xf32> to vector<1x256xf32>
    %c0_3 = arith.constant 0 : index
    %c1_4 = arith.constant 1 : index
    %c0_5 = arith.constant 0 : index
    %16 = vector.load %arg2[%c0_3, %c1_4, %c0_5] : memref<1x3x256xf32, #tpu.memory_space<vmem>>, vector<1x1x256xf32>
    %17 = vector.shape_cast %16 : vector<1x1x256xf32> to vector<1x256xf32>
    %c0_6 = arith.constant 0 : index
    %c0_7 = arith.constant 0 : index
    %c0_8 = arith.constant 0 : index
    %18 = vector.load %arg3[%c0_6, %c0_7, %c0_8] : memref<1x1x256xf32, #tpu.memory_space<vmem>>, vector<1x1x256xf32>
    %19 = vector.shape_cast %18 : vector<1x1x256xf32> to vector<1x256xf32>
    %c0_9 = arith.constant 0 : index
    %c0_10 = arith.constant 0 : index
    %c0_11 = arith.constant 0 : index
    %20 = vector.load %arg4[%c0_9, %c0_10, %c0_11] : memref<1x3x256xf32, #tpu.memory_space<vmem>>, vector<1x3x256xf32>
    %21 = vector.shape_cast %20 : vector<1x3x256xf32> to vector<3x256xf32>
    %22 = vector.broadcast %5 : f32 to vector<1x256xf32>
    %23 = arith.subf %15, %22 : vector<1x256xf32>
    %24 = arith.mulf %19, %23 : vector<1x256xf32>
    %25 = vector.broadcast %1 : f32 to vector<1x256xf32>
    %26 = arith.mulf %24, %25 : vector<1x256xf32>
    %27 = vector.broadcast %7 : f32 to vector<1x256xf32>
    %28 = arith.subf %17, %27 : vector<1x256xf32>
    %29 = arith.mulf %19, %28 : vector<1x256xf32>
    %30 = vector.broadcast %3 : f32 to vector<1x256xf32>
    %31 = arith.mulf %29, %30 : vector<1x256xf32>
    %32 = tpu.reciprocal %19 {approx = true} : vector<1x256xf32> -> vector<1x256xf32>
    %33 = arith.mulf %26, %32 : vector<1x256xf32>
    %34 = vector.broadcast %13 : f32 to vector<1x256xf32>
    %35 = arith.mulf %33, %34 : vector<1x256xf32>
    %cst = arith.constant 1.000000e+00 : f32
    %36 = vector.broadcast %cst : f32 to vector<1x256xf32>
    %37 = arith.mulf %35, %36 : vector<1x256xf32>
    %38 = arith.mulf %31, %32 : vector<1x256xf32>
    %39 = vector.broadcast %13 : f32 to vector<1x256xf32>
    %40 = arith.mulf %38, %39 : vector<1x256xf32>
    %cst_12 = arith.constant 1.000000e+00 : f32
    %41 = vector.broadcast %cst_12 : f32 to vector<1x256xf32>
    %42 = arith.mulf %40, %41 : vector<1x256xf32>
    %43 = vector.broadcast %11 : f32 to vector<1x256xf32>
    %44 = arith.mulf %43, %32 : vector<1x256xf32>
    %45 = vector.broadcast %9 : f32 to vector<1x256xf32>
    %46 = arith.subf %45, %44 : vector<1x256xf32>
    %cst_13 = arith.constant 1.000000e+00 : f32
    %47 = vector.broadcast %cst_13 : f32 to vector<1x256xf32>
    %48 = arith.mulf %46, %47 : vector<1x256xf32>
    %cst_14 = arith.constant 0.000000e+00 : f32
    %49 = vector.broadcast %cst_14 : f32 to vector<2x256xf32>
    %50 = tpu.concatenate %37, %42, %48, %21, %49 in 0 : vector<1x256xf32>, vector<1x256xf32>, vector<1x256xf32>, vector<3x256xf32>, vector<2x256xf32> -> vector<8x256xf32>
    %c0_15 = arith.constant 0 : index
    %c0_16 = arith.constant 0 : index
    %51 = vector.load %arg5[%c0_15, %c0_16] : memref<32x8xf32, #tpu.memory_space<vmem>>, vector<32x8xf32>
    %cst_17 = arith.constant dense<0.000000e+00> : vector<32x256xf32>
    %52 = tpu.matmul %51, %50, %cst_17 {dimension_numbers = #tpu.dot_dimension_numbers<[1], [0], [0], [1], [0, 0, 1, 1], [], []>} : vector<32x8xf32>, vector<8x256xf32>, vector<32x256xf32> -> vector<32x256xf32>
    %c0_18 = arith.constant 0 : index
    %c0_19 = arith.constant 0 : index
    %53 = vector.load %arg6[%c0_18, %c0_19] : memref<32x1xf32, #tpu.memory_space<vmem>>, vector<32x1xf32>
    %54 = vector.broadcast %53 : vector<32x1xf32> to vector<32x256xf32>
    %55 = arith.addf %52, %54 : vector<32x256xf32>
    %cst_20 = arith.constant 0.000000e+00 : f32
    %56 = vector.broadcast %cst_20 : f32 to vector<32x256xf32>
    %57 = arith.maximumf %55, %56 : vector<32x256xf32>
    %c0_21 = arith.constant 0 : index
    %c0_22 = arith.constant 0 : index
    %58 = vector.load %arg7[%c0_21, %c0_22] : memref<32x32xf32, #tpu.memory_space<vmem>>, vector<32x32xf32>
    %cst_23 = arith.constant dense<0.000000e+00> : vector<32x256xf32>
    %59 = tpu.matmul %58, %57, %cst_23 {dimension_numbers = #tpu.dot_dimension_numbers<[1], [0], [0], [1], [0, 0, 1, 1], [], []>} : vector<32x32xf32>, vector<32x256xf32>, vector<32x256xf32> -> vector<32x256xf32>
    %c0_24 = arith.constant 0 : index
    %c0_25 = arith.constant 0 : index
    %60 = vector.load %arg8[%c0_24, %c0_25] : memref<32x1xf32, #tpu.memory_space<vmem>>, vector<32x1xf32>
    %61 = vector.broadcast %60 : vector<32x1xf32> to vector<32x256xf32>
    %62 = arith.addf %59, %61 : vector<32x256xf32>
    %cst_26 = arith.constant 0.000000e+00 : f32
    %63 = vector.broadcast %cst_26 : f32 to vector<32x256xf32>
    %64 = arith.maximumf %62, %63 : vector<32x256xf32>
    %c0_27 = arith.constant 0 : index
    %c0_28 = arith.constant 0 : index
    %65 = vector.load %arg15[%c0_27, %c0_28] : memref<40x256xf32, #tpu.memory_space<vmem>>, vector<32x256xf32>
    tpu.vector_store %arg15[%c0_27, %c0_28], %64 {strides = array<i32>} : memref<40x256xf32, #tpu.memory_space<vmem>>, vector<32x256xf32>,
    %cst_29 = arith.constant 1.000000e+00 : f32
    %66 = vector.broadcast %cst_29 : f32 to vector<1x256xf32>
    %cst_30 = arith.constant 0.000000e+00 : f32
    %67 = vector.broadcast %cst_30 : f32 to vector<4x256xf32>
    %68 = tpu.concatenate %21, %66, %67 in 0 : vector<3x256xf32>, vector<1x256xf32>, vector<4x256xf32> -> vector<8x256xf32>
    %c32 = arith.constant 32 : index
    %c0_31 = arith.constant 0 : index
    %69 = vector.load %arg15[%c32, %c0_31] : memref<40x256xf32, #tpu.memory_space<vmem>>, vector<8x256xf32>
    tpu.vector_store %arg15[%c32, %c0_31], %68 {strides = array<i32>} : memref<40x256xf32, #tpu.memory_space<vmem>>, vector<8x256xf32>,
    %70 = arith.index_cast %arg0 : i32 to index
    %c8 = arith.constant 8 : index
    %71 = memref.load %arg1[%70, %c8] : memref<2x40xf32, #tpu.memory_space<smem>>
    %72 = arith.index_cast %arg0 : i32 to index
    %c9 = arith.constant 9 : index
    %73 = memref.load %arg1[%72, %c9] : memref<2x40xf32, #tpu.memory_space<smem>>
    %74 = arith.index_cast %arg0 : i32 to index
    %c10 = arith.constant 10 : index
    %75 = memref.load %arg1[%74, %c10] : memref<2x40xf32, #tpu.memory_space<smem>>
    %76 = arith.index_cast %arg0 : i32 to index
    %c11 = arith.constant 11 : index
    %77 = memref.load %arg1[%76, %c11] : memref<2x40xf32, #tpu.memory_space<smem>>
    %78 = arith.index_cast %arg0 : i32 to index
    %c12 = arith.constant 12 : index
    %79 = memref.load %arg1[%78, %c12] : memref<2x40xf32, #tpu.memory_space<smem>>
    %80 = arith.index_cast %arg0 : i32 to index
    %c13 = arith.constant 13 : index
    %81 = memref.load %arg1[%80, %c13] : memref<2x40xf32, #tpu.memory_space<smem>>
    %82 = arith.index_cast %arg0 : i32 to index
    %c14 = arith.constant 14 : index
    %83 = memref.load %arg1[%82, %c14] : memref<2x40xf32, #tpu.memory_space<smem>>
    %84 = arith.index_cast %arg0 : i32 to index
    %c15 = arith.constant 15 : index
    %85 = memref.load %arg1[%84, %c15] : memref<2x40xf32, #tpu.memory_space<smem>>
    %86 = arith.index_cast %arg0 : i32 to index
    %c16 = arith.constant 16 : index
    %87 = memref.load %arg1[%86, %c16] : memref<2x40xf32, #tpu.memory_space<smem>>
    %88 = arith.index_cast %arg0 : i32 to index
    %c17 = arith.constant 17 : index
    %89 = memref.load %arg1[%88, %c17] : memref<2x40xf32, #tpu.memory_space<smem>>
    %90 = arith.index_cast %arg0 : i32 to index
    %c18 = arith.constant 18 : index
    %91 = memref.load %arg1[%90, %c18] : memref<2x40xf32, #tpu.memory_space<smem>>
    %92 = arith.index_cast %arg0 : i32 to index
    %c19 = arith.constant 19 : index
    %93 = memref.load %arg1[%92, %c19] : memref<2x40xf32, #tpu.memory_space<smem>>
    %94 = arith.index_cast %arg0 : i32 to index
    %c20 = arith.constant 20 : index
    %95 = memref.load %arg1[%94, %c20] : memref<2x40xf32, #tpu.memory_space<smem>>
    %96 = vector.broadcast %71 : f32 to vector<1x256xf32>
    %97 = arith.mulf %96, %26 : vector<1x256xf32>
    %98 = vector.broadcast %73 : f32 to vector<1x256xf32>
    %99 = arith.mulf %98, %31 : vector<1x256xf32>
    %100 = arith.addf %97, %99 : vector<1x256xf32>
    %101 = vector.broadcast %75 : f32 to vector<1x256xf32>
    %102 = arith.mulf %101, %19 : vector<1x256xf32>
    %103 = arith.addf %100, %102 : vector<1x256xf32>
    %104 = vector.broadcast %77 : f32 to vector<1x256xf32>
    %105 = arith.addf %103, %104 : vector<1x256xf32>
    %106 = vector.broadcast %79 : f32 to vector<1x256xf32>
    %107 = arith.mulf %106, %26 : vector<1x256xf32>
    %108 = vector.broadcast %81 : f32 to vector<1x256xf32>
    %109 = arith.mulf %108, %31 : vector<1x256xf32>
    %110 = arith.addf %107, %109 : vector<1x256xf32>
    %111 = vector.broadcast %83 : f32 to vector<1x256xf32>
    %112 = arith.mulf %111, %19 : vector<1x256xf32>
    %113 = arith.addf %110, %112 : vector<1x256xf32>
    %114 = vector.broadcast %85 : f32 to vector<1x256xf32>
    %115 = arith.addf %113, %114 : vector<1x256xf32>
    %116 = vector.broadcast %87 : f32 to vector<1x256xf32>
    %117 = arith.mulf %116, %26 : vector<1x256xf32>
    %118 = vector.broadcast %89 : f32 to vector<1x256xf32>
    %119 = arith.mulf %118, %31 : vector<1x256xf32>
    %120 = arith.addf %117, %119 : vector<1x256xf32>
    %121 = vector.broadcast %91 : f32 to vector<1x256xf32>
    %122 = arith.mulf %121, %19 : vector<1x256xf32>
    %123 = arith.addf %120, %122 : vector<1x256xf32>
    %124 = vector.broadcast %93 : f32 to vector<1x256xf32>
    %125 = arith.addf %123, %124 : vector<1x256xf32>
    %126 = math.absf %125 : vector<1x256xf32>
    %cst_32 = arith.constant 9.99999993E-9 : f32
    %127 = vector.broadcast %cst_32 : f32 to vector<1x256xf32>
    %128 = arith.cmpf olt, %126, %127 : vector<1x256xf32>
    %cst_33 = arith.constant 9.99999993E-9 : f32
    %129 = vector.broadcast %cst_33 : f32 to vector<1x256xf32>
    %130 = arith.select %128, %129, %125 : vector<1x256xi1>, vector<1x256xf32>
    %131 = vector.broadcast %95 : f32 to vector<1x256xf32>
    %132 = arith.mulf %130, %131 : vector<1x256xf32>
    %133 = tpu.reciprocal %132 {approx = true} : vector<1x256xf32> -> vector<1x256xf32>
    %134 = arith.mulf %105, %133 : vector<1x256xf32>
    %cst_34 = arith.constant 1.000000e+00 : f32
    %135 = vector.broadcast %cst_34 : f32 to vector<1x256xf32>
    %136 = arith.addf %134, %135 : vector<1x256xf32>
    %cst_35 = arith.constant 7.500000e+00 : f32
    %137 = vector.broadcast %cst_35 : f32 to vector<1x256xf32>
    %138 = arith.mulf %136, %137 : vector<1x256xf32>
    %139 = arith.mulf %115, %133 : vector<1x256xf32>
    %cst_36 = arith.constant 1.000000e+00 : f32
    %140 = vector.broadcast %cst_36 : f32 to vector<1x256xf32>
    %141 = arith.addf %139, %140 : vector<1x256xf32>
    %cst_37 = arith.constant 7.500000e+00 : f32
    %142 = vector.broadcast %cst_37 : f32 to vector<1x256xf32>
    %143 = arith.mulf %141, %142 : vector<1x256xf32>
    %cst_38 = arith.constant 9.99999997E-7 : f32
    %144 = vector.broadcast %cst_38 : f32 to vector<1x256xf32>
    %145 = arith.cmpf ogt, %125, %144 : vector<1x256xf32>
    %cst_39 = arith.constant 0.000000e+00 : f32
    %146 = vector.broadcast %cst_39 : f32 to vector<1x256xf32>
    %147 = arith.cmpf oge, %138, %146 : vector<1x256xf32>
    %148 = arith.andi %145, %147 : vector<1x256xi1>
    %cst_40 = arith.constant 1.500000e+01 : f32
    %149 = vector.broadcast %cst_40 : f32 to vector<1x256xf32>
    %150 = arith.cmpf ole, %138, %149 : vector<1x256xf32>
    %151 = arith.andi %148, %150 : vector<1x256xi1>
    %cst_41 = arith.constant 0.000000e+00 : f32
    %152 = vector.broadcast %cst_41 : f32 to vector<1x256xf32>
    %153 = arith.cmpf oge, %143, %152 : vector<1x256xf32>
    %154 = arith.andi %151, %153 : vector<1x256xi1>
    %cst_42 = arith.constant 1.500000e+01 : f32
    %155 = vector.broadcast %cst_42 : f32 to vector<1x256xf32>
    %156 = arith.cmpf ole, %143, %155 : vector<1x256xf32>
    %157 = arith.andi %154, %156 : vector<1x256xi1>
    %158 = arith.extui %157 : vector<1x256xi1> to vector<1x256xi32>
    %159 = arith.sitofp %158 : vector<1x256xi32> to vector<1x256xf32>
    %160 = tpu.concatenate %138, %143, %125, %159 in 0 : vector<1x256xf32>, vector<1x256xf32>, vector<1x256xf32>, vector<1x256xf32> -> vector<4x256xf32>
    %c0_43 = arith.constant 0 : index
    %c0_44 = arith.constant 0 : index
    %c0_45 = arith.constant 0 : index
    %c0_46 = arith.constant 0 : index
    %161 = vector.load %arg14[%c0_43, %c0_44, %c0_45, %c0_46] : memref<1x2x4x256xf32, #tpu.memory_space<vmem>>, vector<1x1x4x256xf32>
    %162 = vector.shape_cast %161 : vector<1x1x4x256xf32> to vector<4x256xf32>
    %163 = vector.shape_cast %160 : vector<4x256xf32> to vector<1x1x4x256xf32>
    tpu.vector_store %arg14[%c0_43, %c0_44, %c0_45, %c0_46], %163 {strides = array<i32>} : memref<1x2x4x256xf32, #tpu.memory_space<vmem>>, vector<1x1x4x256xf32>,
    %cst_47 = arith.constant 5.000000e-01 : f32
    %164 = vector.broadcast %cst_47 : f32 to vector<1x256xf32>
    %165 = arith.addf %138, %164 : vector<1x256xf32>
    %166 = math.floor %165 : vector<1x256xf32>
    %cst_48 = arith.constant 0.000000e+00 : f32
    %cst_49 = arith.constant 1.500000e+01 : f32
    %167 = vector.broadcast %cst_48 : f32 to vector<1x256xf32>
    %168 = arith.maximumf %167, %166 : vector<1x256xf32>
    %169 = vector.broadcast %cst_49 : f32 to vector<1x256xf32>
    %170 = arith.minimumf %169, %168 : vector<1x256xf32>
    %171 = arith.fptosi %170 : vector<1x256xf32> to vector<1x256xi32>
    %cst_50 = arith.constant 5.000000e-01 : f32
    %172 = vector.broadcast %cst_50 : f32 to vector<1x256xf32>
    %173 = arith.addf %143, %172 : vector<1x256xf32>
    %174 = math.floor %173 : vector<1x256xf32>
    %cst_51 = arith.constant 0.000000e+00 : f32
    %cst_52 = arith.constant 1.500000e+01 : f32
    %175 = vector.broadcast %cst_51 : f32 to vector<1x256xf32>
    %176 = arith.maximumf %175, %174 : vector<1x256xf32>
    %177 = vector.broadcast %cst_52 : f32 to vector<1x256xf32>
    %178 = arith.minimumf %177, %176 : vector<1x256xf32>
    %179 = arith.fptosi %178 : vector<1x256xf32> to vector<1x256xi32>
    %c16_i32 = arith.constant 16 : i32
    %180 = vector.broadcast %c16_i32 : i32 to vector<1x256xi32>
    %181 = arith.muli %179, %180 : vector<1x256xi32>
    %182 = arith.addi %181, %171 : vector<1x256xi32>
    %183 = tpu.iota {dimensions = array<i32: 0>} : vector<32x256xi32>
    %c0_i32 = arith.constant 0 : i32
    %184 = vector.broadcast %c0_i32 : i32 to vector<32x256xi32>
    %185 = arith.addi %183, %184 : vector<32x256xi32>
    %186 = vector.broadcast %182 : vector<1x256xi32> to vector<32x256xi32>
    %187 = arith.cmpi eq, %185, %186 : vector<32x256xi32>
    %188 = vector.broadcast %157 : vector<1x256xi1> to vector<32x256xi1>
    %189 = arith.andi %187, %188 : vector<32x256xi1>
    %190 = arith.extui %189 : vector<32x256xi1> to vector<32x256xi32>
    %191 = arith.sitofp %190 : vector<32x256xi32> to vector<32x256xf32>
    %c0_53 = arith.constant 0 : index
    %c0_54 = arith.constant 0 : index
    %192 = vector.load %arg16[%c0_53, %c0_54] : memref<512x256xf32, #tpu.memory_space<vmem>>, vector<32x256xf32>
    tpu.vector_store %arg16[%c0_53, %c0_54], %191 {strides = array<i32>} : memref<512x256xf32, #tpu.memory_space<vmem>>, vector<32x256xf32>,
    %193 = tpu.iota {dimensions = array<i32: 0>} : vector<32x256xi32>
    %c32_i32 = arith.constant 32 : i32
    %194 = vector.broadcast %c32_i32 : i32 to vector<32x256xi32>
    %195 = arith.addi %193, %194 : vector<32x256xi32>
    %196 = vector.broadcast %182 : vector<1x256xi32> to vector<32x256xi32>
    %197 = arith.cmpi eq, %195, %196 : vector<32x256xi32>
    %198 = vector.broadcast %157 : vector<1x256xi1> to vector<32x256xi1>
    %199 = arith.andi %197, %198 : vector<32x256xi1>
    %200 = arith.extui %199 : vector<32x256xi1> to vector<32x256xi32>
    %201 = arith.sitofp %200 : vector<32x256xi32> to vector<32x256xf32>
    %c32_55 = arith.constant 32 : index
    %c0_56 = arith.constant 0 : index
    %202 = vector.load %arg16[%c32_55, %c0_56] : memref<512x256xf32, #tpu.memory_space<vmem>>, vector<32x256xf32>
    tpu.vector_store %arg16[%c32_55, %c0_56], %201 {strides = array<i32>} : memref<512x256xf32, #tpu.memory_space<vmem>>, vector<32x256xf32>,
    %203 = tpu.iota {dimensions = array<i32: 0>} : vector<32x256xi32>
    %c64_i32 = arith.constant 64 : i32
    %204 = vector.broadcast %c64_i32 : i32 to vector<32x256xi32>
    %205 = arith.addi %203, %204 : vector<32x256xi32>
    %206 = vector.broadcast %182 : vector<1x256xi32> to vector<32x256xi32>
    %207 = arith.cmpi eq, %205, %206 : vector<32x256xi32>
    %208 = vector.broadcast %157 : vector<1x256xi1> to vector<32x256xi1>
    %209 = arith.andi %207, %208 : vector<32x256xi1>
    %210 = arith.extui %209 : vector<32x256xi1> to vector<32x256xi32>
    %211 = arith.sitofp %210 : vector<32x256xi32> to vector<32x256xf32>
    %c64 = arith.constant 64 : index
    %c0_57 = arith.constant 0 : index
    %212 = vector.load %arg16[%c64, %c0_57] : memref<512x256xf32, #tpu.memory_space<vmem>>, vector<32x256xf32>
    tpu.vector_store %arg16[%c64, %c0_57], %211 {strides = array<i32>} : memref<512x256xf32, #tpu.memory_space<vmem>>, vector<32x256xf32>,
    %213 = tpu.iota {dimensions = array<i32: 0>} : vector<32x256xi32>
    %c96_i32 = arith.constant 96 : i32
    %214 = vector.broadcast %c96_i32 : i32 to vector<32x256xi32>
    %215 = arith.addi %213, %214 : vector<32x256xi32>
    %216 = vector.broadcast %182 : vector<1x256xi32> to vector<32x256xi32>
    %217 = arith.cmpi eq, %215, %216 : vector<32x256xi32>
    %218 = vector.broadcast %157 : vector<1x256xi1> to vector<32x256xi1>
    %219 = arith.andi %217, %218 : vector<32x256xi1>
    %220 = arith.extui %219 : vector<32x256xi1> to vector<32x256xi32>
    %221 = arith.sitofp %220 : vector<32x256xi32> to vector<32x256xf32>
    %c96 = arith.constant 96 : index
    %c0_58 = arith.constant 0 : index
    %222 = vector.load %arg16[%c96, %c0_58] : memref<512x256xf32, #tpu.memory_space<vmem>>, vector<32x256xf32>
    tpu.vector_store %arg16[%c96, %c0_58], %221 {strides = array<i32>} : memref<512x256xf32, #tpu.memory_space<vmem>>, vector<32x256xf32>,
    %223 = tpu.iota {dimensions = array<i32: 0>} : vector<32x256xi32>
    %c128_i32 = arith.constant 128 : i32
    %224 = vector.broadcast %c128_i32 : i32 to vector<32x256xi32>
    %225 = arith.addi %223, %224 : vector<32x256xi32>
    %226 = vector.broadcast %182 : vector<1x256xi32> to vector<32x256xi32>
    %227 = arith.cmpi eq, %225, %226 : vector<32x256xi32>
    %228 = vector.broadcast %157 : vector<1x256xi1> to vector<32x256xi1>
    %229 = arith.andi %227, %228 : vector<32x256xi1>
    %230 = arith.extui %229 : vector<32x256xi1> to vector<32x256xi32>
    %231 = arith.sitofp %230 : vector<32x256xi32> to vector<32x256xf32>
    %c128 = arith.constant 128 : index
    %c0_59 = arith.constant 0 : index
    %232 = vector.load %arg16[%c128, %c0_59] : memref<512x256xf32, #tpu.memory_space<vmem>>, vector<32x256xf32>
    tpu.vector_store %arg16[%c128, %c0_59], %231 {strides = array<i32>} : memref<512x256xf32, #tpu.memory_space<vmem>>, vector<32x256xf32>,
    %233 = tpu.iota {dimensions = array<i32: 0>} : vector<32x256xi32>
    %c160_i32 = arith.constant 160 : i32
    %234 = vector.broadcast %c160_i32 : i32 to vector<32x256xi32>
    %235 = arith.addi %233, %234 : vector<32x256xi32>
    %236 = vector.broadcast %182 : vector<1x256xi32> to vector<32x256xi32>
    %237 = arith.cmpi eq, %235, %236 : vector<32x256xi32>
    %238 = vector.broadcast %157 : vector<1x256xi1> to vector<32x256xi1>
    %239 = arith.andi %237, %238 : vector<32x256xi1>
    %240 = arith.extui %239 : vector<32x256xi1> to vector<32x256xi32>
    %241 = arith.sitofp %240 : vector<32x256xi32> to vector<32x256xf32>
    %c160 = arith.constant 160 : index
    %c0_60 = arith.constant 0 : index
    %242 = vector.load %arg16[%c160, %c0_60] : memref<512x256xf32, #tpu.memory_space<vmem>>, vector<32x256xf32>
    tpu.vector_store %arg16[%c160, %c0_60], %241 {strides = array<i32>} : memref<512x256xf32, #tpu.memory_space<vmem>>, vector<32x256xf32>,
    %243 = tpu.iota {dimensions = array<i32: 0>} : vector<32x256xi32>
    %c192_i32 = arith.constant 192 : i32
    %244 = vector.broadcast %c192_i32 : i32 to vector<32x256xi32>
    %245 = arith.addi %243, %244 : vector<32x256xi32>
    %246 = vector.broadcast %182 : vector<1x256xi32> to vector<32x256xi32>
    %247 = arith.cmpi eq, %245, %246 : vector<32x256xi32>
    %248 = vector.broadcast %157 : vector<1x256xi1> to vector<32x256xi1>
    %249 = arith.andi %247, %248 : vector<32x256xi1>
    %250 = arith.extui %249 : vector<32x256xi1> to vector<32x256xi32>
    %251 = arith.sitofp %250 : vector<32x256xi32> to vector<32x256xf32>
    %c192 = arith.constant 192 : index
    %c0_61 = arith.constant 0 : index
    %252 = vector.load %arg16[%c192, %c0_61] : memref<512x256xf32, #tpu.memory_space<vmem>>, vector<32x256xf32>
    tpu.vector_store %arg16[%c192, %c0_61], %251 {strides = array<i32>} : memref<512x256xf32, #tpu.memory_space<vmem>>, vector<32x256xf32>,
    %253 = tpu.iota {dimensions = array<i32: 0>} : vector<32x256xi32>
    %c224_i32 = arith.constant 224 : i32
    %254 = vector.broadcast %c224_i32 : i32 to vector<32x256xi32>
    %255 = arith.addi %253, %254 : vector<32x256xi32>
    %256 = vector.broadcast %182 : vector<1x256xi32> to vector<32x256xi32>
    %257 = arith.cmpi eq, %255, %256 : vector<32x256xi32>
    %258 = vector.broadcast %157 : vector<1x256xi1> to vector<32x256xi1>
    %259 = arith.andi %257, %258 : vector<32x256xi1>
    %260 = arith.extui %259 : vector<32x256xi1> to vector<32x256xi32>
    %261 = arith.sitofp %260 : vector<32x256xi32> to vector<32x256xf32>
    %c224 = arith.constant 224 : index
    %c0_62 = arith.constant 0 : index
    %262 = vector.load %arg16[%c224, %c0_62] : memref<512x256xf32, #tpu.memory_space<vmem>>, vector<32x256xf32>
    tpu.vector_store %arg16[%c224, %c0_62], %261 {strides = array<i32>} : memref<512x256xf32, #tpu.memory_space<vmem>>, vector<32x256xf32>,
    %263 = arith.index_cast %arg0 : i32 to index
    %c24 = arith.constant 24 : index
    %264 = memref.load %arg1[%263, %c24] : memref<2x40xf32, #tpu.memory_space<smem>>
    %265 = arith.index_cast %arg0 : i32 to index
    %c25 = arith.constant 25 : index
    %266 = memref.load %arg1[%265, %c25] : memref<2x40xf32, #tpu.memory_space<smem>>
    %267 = arith.index_cast %arg0 : i32 to index
    %c26 = arith.constant 26 : index
    %268 = memref.load %arg1[%267, %c26] : memref<2x40xf32, #tpu.memory_space<smem>>
    %269 = arith.index_cast %arg0 : i32 to index
    %c27 = arith.constant 27 : index
    %270 = memref.load %arg1[%269, %c27] : memref<2x40xf32, #tpu.memory_space<smem>>
    %271 = arith.index_cast %arg0 : i32 to index
    %c28 = arith.constant 28 : index
    %272 = memref.load %arg1[%271, %c28] : memref<2x40xf32, #tpu.memory_space<smem>>
    %273 = arith.index_cast %arg0 : i32 to index
    %c29 = arith.constant 29 : index
    %274 = memref.load %arg1[%273, %c29] : memref<2x40xf32, #tpu.memory_space<smem>>
    %275 = arith.index_cast %arg0 : i32 to index
    %c30 = arith.constant 30 : index
    %276 = memref.load %arg1[%275, %c30] : memref<2x40xf32, #tpu.memory_space<smem>>
    %277 = arith.index_cast %arg0 : i32 to index
    %c31 = arith.constant 31 : index
    %278 = memref.load %arg1[%277, %c31] : memref<2x40xf32, #tpu.memory_space<smem>>
    %279 = arith.index_cast %arg0 : i32 to index
    %c32_63 = arith.constant 32 : index
    %280 = memref.load %arg1[%279, %c32_63] : memref<2x40xf32, #tpu.memory_space<smem>>
    %281 = arith.index_cast %arg0 : i32 to index
    %c33 = arith.constant 33 : index
    %282 = memref.load %arg1[%281, %c33] : memref<2x40xf32, #tpu.memory_space<smem>>
    %283 = arith.index_cast %arg0 : i32 to index
    %c34 = arith.constant 34 : index
    %284 = memref.load %arg1[%283, %c34] : memref<2x40xf32, #tpu.memory_space<smem>>
    %285 = arith.index_cast %arg0 : i32 to index
    %c35 = arith.constant 35 : index
    %286 = memref.load %arg1[%285, %c35] : memref<2x40xf32, #tpu.memory_space<smem>>
    %287 = arith.index_cast %arg0 : i32 to index
    %c36 = arith.constant 36 : index
    %288 = memref.load %arg1[%287, %c36] : memref<2x40xf32, #tpu.memory_space<smem>>
    %289 = vector.broadcast %264 : f32 to vector<1x256xf32>
    %290 = arith.mulf %289, %26 : vector<1x256xf32>
    %291 = vector.broadcast %266 : f32 to vector<1x256xf32>
    %292 = arith.mulf %291, %31 : vector<1x256xf32>
    %293 = arith.addf %290, %292 : vector<1x256xf32>
    %294 = vector.broadcast %268 : f32 to vector<1x256xf32>
    %295 = arith.mulf %294, %19 : vector<1x256xf32>
    %296 = arith.addf %293, %295 : vector<1x256xf32>
    %297 = vector.broadcast %270 : f32 to vector<1x256xf32>
    %298 = arith.addf %296, %297 : vector<1x256xf32>
    %299 = vector.broadcast %272 : f32 to vector<1x256xf32>
    %300 = arith.mulf %299, %26 : vector<1x256xf32>
    %301 = vector.broadcast %274 : f32 to vector<1x256xf32>
    %302 = arith.mulf %301, %31 : vector<1x256xf32>
    %303 = arith.addf %300, %302 : vector<1x256xf32>
    %304 = vector.broadcast %276 : f32 to vector<1x256xf32>
    %305 = arith.mulf %304, %19 : vector<1x256xf32>
    %306 = arith.addf %303, %305 : vector<1x256xf32>
    %307 = vector.broadcast %278 : f32 to vector<1x256xf32>
    %308 = arith.addf %306, %307 : vector<1x256xf32>
    %309 = vector.broadcast %280 : f32 to vector<1x256xf32>
    %310 = arith.mulf %309, %26 : vector<1x256xf32>
    %311 = vector.broadcast %282 : f32 to vector<1x256xf32>
    %312 = arith.mulf %311, %31 : vector<1x256xf32>
    %313 = arith.addf %310, %312 : vector<1x256xf32>
    %314 = vector.broadcast %284 : f32 to vector<1x256xf32>
    %315 = arith.mulf %314, %19 : vector<1x256xf32>
    %316 = arith.addf %313, %315 : vector<1x256xf32>
    %317 = vector.broadcast %286 : f32 to vector<1x256xf32>
    %318 = arith.addf %316, %317 : vector<1x256xf32>
    %319 = math.absf %318 : vector<1x256xf32>
    %cst_64 = arith.constant 9.99999993E-9 : f32
    %320 = vector.broadcast %cst_64 : f32 to vector<1x256xf32>
    %321 = arith.cmpf olt, %319, %320 : vector<1x256xf32>
    %cst_65 = arith.constant 9.99999993E-9 : f32
    %322 = vector.broadcast %cst_65 : f32 to vector<1x256xf32>
    %323 = arith.select %321, %322, %318 : vector<1x256xi1>, vector<1x256xf32>
    %324 = vector.broadcast %288 : f32 to vector<1x256xf32>
    %325 = arith.mulf %323, %324 : vector<1x256xf32>
    %326 = tpu.reciprocal %325 {approx = true} : vector<1x256xf32> -> vector<1x256xf32>
    %327 = arith.mulf %298, %326 : vector<1x256xf32>
    %cst_66 = arith.constant 1.000000e+00 : f32
    %328 = vector.broadcast %cst_66 : f32 to vector<1x256xf32>
    %329 = arith.addf %327, %328 : vector<1x256xf32>
    %cst_67 = arith.constant 7.500000e+00 : f32
    %330 = vector.broadcast %cst_67 : f32 to vector<1x256xf32>
    %331 = arith.mulf %329, %330 : vector<1x256xf32>
    %332 = arith.mulf %308, %326 : vector<1x256xf32>
    %cst_68 = arith.constant 1.000000e+00 : f32
    %333 = vector.broadcast %cst_68 : f32 to vector<1x256xf32>
    %334 = arith.addf %332, %333 : vector<1x256xf32>
    %cst_69 = arith.constant 7.500000e+00 : f32
    %335 = vector.broadcast %cst_69 : f32 to vector<1x256xf32>
    %336 = arith.mulf %334, %335 : vector<1x256xf32>
    %cst_70 = arith.constant 9.99999997E-7 : f32
    %337 = vector.broadcast %cst_70 : f32 to vector<1x256xf32>
    %338 = arith.cmpf ogt, %318, %337 : vector<1x256xf32>
    %cst_71 = arith.constant 0.000000e+00 : f32
    %339 = vector.broadcast %cst_71 : f32 to vector<1x256xf32>
    %340 = arith.cmpf oge, %331, %339 : vector<1x256xf32>
    %341 = arith.andi %338, %340 : vector<1x256xi1>
    %cst_72 = arith.constant 1.500000e+01 : f32
    %342 = vector.broadcast %cst_72 : f32 to vector<1x256xf32>
    %343 = arith.cmpf ole, %331, %342 : vector<1x256xf32>
    %344 = arith.andi %341, %343 : vector<1x256xi1>
    %cst_73 = arith.constant 0.000000e+00 : f32
    %345 = vector.broadcast %cst_73 : f32 to vector<1x256xf32>
    %346 = arith.cmpf oge, %336, %345 : vector<1x256xf32>
    %347 = arith.andi %344, %346 : vector<1x256xi1>
    %cst_74 = arith.constant 1.500000e+01 : f32
    %348 = vector.broadcast %cst_74 : f32 to vector<1x256xf32>
    %349 = arith.cmpf ole, %336, %348 : vector<1x256xf32>
    %350 = arith.andi %347, %349 : vector<1x256xi1>
    %351 = arith.extui %350 : vector<1x256xi1> to vector<1x256xi32>
    %352 = arith.sitofp %351 : vector<1x256xi32> to vector<1x256xf32>
    %353 = tpu.concatenate %331, %336, %318, %352 in 0 : vector<1x256xf32>, vector<1x256xf32>, vector<1x256xf32>, vector<1x256xf32> -> vector<4x256xf32>
    %c0_75 = arith.constant 0 : index
    %c1_76 = arith.constant 1 : index
    %c0_77 = arith.constant 0 : index
    %c0_78 = arith.constant 0 : index
    %354 = vector.load %arg14[%c0_75, %c1_76, %c0_77, %c0_78] : memref<1x2x4x256xf32, #tpu.memory_space<vmem>>, vector<1x1x4x256xf32>
    %355 = vector.shape_cast %354 : vector<1x1x4x256xf32> to vector<4x256xf32>
    %356 = vector.shape_cast %353 : vector<4x256xf32> to vector<1x1x4x256xf32>
    tpu.vector_store %arg14[%c0_75, %c1_76, %c0_77, %c0_78], %356 {strides = array<i32>} : memref<1x2x4x256xf32, #tpu.memory_space<vmem>>, vector<1x1x4x256xf32>,
    %cst_79 = arith.constant 5.000000e-01 : f32
    %357 = vector.broadcast %cst_79 : f32 to vector<1x256xf32>
    %358 = arith.addf %331, %357 : vector<1x256xf32>
    %359 = math.floor %358 : vector<1x256xf32>
    %cst_80 = arith.constant 0.000000e+00 : f32
    %cst_81 = arith.constant 1.500000e+01 : f32
    %360 = vector.broadcast %cst_80 : f32 to vector<1x256xf32>
    %361 = arith.maximumf %360, %359 : vector<1x256xf32>
    %362 = vector.broadcast %cst_81 : f32 to vector<1x256xf32>
    %363 = arith.minimumf %362, %361 : vector<1x256xf32>
    %364 = arith.fptosi %363 : vector<1x256xf32> to vector<1x256xi32>
    %cst_82 = arith.constant 5.000000e-01 : f32
    %365 = vector.broadcast %cst_82 : f32 to vector<1x256xf32>
    %366 = arith.addf %336, %365 : vector<1x256xf32>
    %367 = math.floor %366 : vector<1x256xf32>
    %cst_83 = arith.constant 0.000000e+00 : f32
    %cst_84 = arith.constant 1.500000e+01 : f32
    %368 = vector.broadcast %cst_83 : f32 to vector<1x256xf32>
    %369 = arith.maximumf %368, %367 : vector<1x256xf32>
    %370 = vector.broadcast %cst_84 : f32 to vector<1x256xf32>
    %371 = arith.minimumf %370, %369 : vector<1x256xf32>
    %372 = arith.fptosi %371 : vector<1x256xf32> to vector<1x256xi32>
    %c16_i32_85 = arith.constant 16 : i32
    %373 = vector.broadcast %c16_i32_85 : i32 to vector<1x256xi32>
    %374 = arith.muli %372, %373 : vector<1x256xi32>
    %375 = arith.addi %374, %364 : vector<1x256xi32>
    %376 = tpu.iota {dimensions = array<i32: 0>} : vector<32x256xi32>
    %c0_i32_86 = arith.constant 0 : i32
    %377 = vector.broadcast %c0_i32_86 : i32 to vector<32x256xi32>
    %378 = arith.addi %376, %377 : vector<32x256xi32>
    %379 = vector.broadcast %375 : vector<1x256xi32> to vector<32x256xi32>
    %380 = arith.cmpi eq, %378, %379 : vector<32x256xi32>
    %381 = vector.broadcast %350 : vector<1x256xi1> to vector<32x256xi1>
    %382 = arith.andi %380, %381 : vector<32x256xi1>
    %383 = arith.extui %382 : vector<32x256xi1> to vector<32x256xi32>
    %384 = arith.sitofp %383 : vector<32x256xi32> to vector<32x256xf32>
    %c256 = arith.constant 256 : index
    %c0_87 = arith.constant 0 : index
    %385 = vector.load %arg16[%c256, %c0_87] : memref<512x256xf32, #tpu.memory_space<vmem>>, vector<32x256xf32>
    tpu.vector_store %arg16[%c256, %c0_87], %384 {strides = array<i32>} : memref<512x256xf32, #tpu.memory_space<vmem>>, vector<32x256xf32>,
    %386 = tpu.iota {dimensions = array<i32: 0>} : vector<32x256xi32>
    %c32_i32_88 = arith.constant 32 : i32
    %387 = vector.broadcast %c32_i32_88 : i32 to vector<32x256xi32>
    %388 = arith.addi %386, %387 : vector<32x256xi32>
    %389 = vector.broadcast %375 : vector<1x256xi32> to vector<32x256xi32>
    %390 = arith.cmpi eq, %388, %389 : vector<32x256xi32>
    %391 = vector.broadcast %350 : vector<1x256xi1> to vector<32x256xi1>
    %392 = arith.andi %390, %391 : vector<32x256xi1>
    %393 = arith.extui %392 : vector<32x256xi1> to vector<32x256xi32>
    %394 = arith.sitofp %393 : vector<32x256xi32> to vector<32x256xf32>
    %c288 = arith.constant 288 : index
    %c0_89 = arith.constant 0 : index
    %395 = vector.load %arg16[%c288, %c0_89] : memref<512x256xf32, #tpu.memory_space<vmem>>, vector<32x256xf32>
    tpu.vector_store %arg16[%c288, %c0_89], %394 {strides = array<i32>} : memref<512x256xf32, #tpu.memory_space<vmem>>, vector<32x256xf32>,
    %396 = tpu.iota {dimensions = array<i32: 0>} : vector<32x256xi32>
    %c64_i32_90 = arith.constant 64 : i32
    %397 = vector.broadcast %c64_i32_90 : i32 to vector<32x256xi32>
    %398 = arith.addi %396, %397 : vector<32x256xi32>
    %399 = vector.broadcast %375 : vector<1x256xi32> to vector<32x256xi32>
    %400 = arith.cmpi eq, %398, %399 : vector<32x256xi32>
    %401 = vector.broadcast %350 : vector<1x256xi1> to vector<32x256xi1>
    %402 = arith.andi %400, %401 : vector<32x256xi1>
    %403 = arith.extui %402 : vector<32x256xi1> to vector<32x256xi32>
    %404 = arith.sitofp %403 : vector<32x256xi32> to vector<32x256xf32>
    %c320 = arith.constant 320 : index
    %c0_91 = arith.constant 0 : index
    %405 = vector.load %arg16[%c320, %c0_91] : memref<512x256xf32, #tpu.memory_space<vmem>>, vector<32x256xf32>
    tpu.vector_store %arg16[%c320, %c0_91], %404 {strides = array<i32>} : memref<512x256xf32, #tpu.memory_space<vmem>>, vector<32x256xf32>,
    %406 = tpu.iota {dimensions = array<i32: 0>} : vector<32x256xi32>
    %c96_i32_92 = arith.constant 96 : i32
    %407 = vector.broadcast %c96_i32_92 : i32 to vector<32x256xi32>
    %408 = arith.addi %406, %407 : vector<32x256xi32>
    %409 = vector.broadcast %375 : vector<1x256xi32> to vector<32x256xi32>
    %410 = arith.cmpi eq, %408, %409 : vector<32x256xi32>
    %411 = vector.broadcast %350 : vector<1x256xi1> to vector<32x256xi1>
    %412 = arith.andi %410, %411 : vector<32x256xi1>
    %413 = arith.extui %412 : vector<32x256xi1> to vector<32x256xi32>
    %414 = arith.sitofp %413 : vector<32x256xi32> to vector<32x256xf32>
    %c352 = arith.constant 352 : index
    %c0_93 = arith.constant 0 : index
    %415 = vector.load %arg16[%c352, %c0_93] : memref<512x256xf32, #tpu.memory_space<vmem>>, vector<32x256xf32>
    tpu.vector_store %arg16[%c352, %c0_93], %414 {strides = array<i32>} : memref<512x256xf32, #tpu.memory_space<vmem>>, vector<32x256xf32>,
    %416 = tpu.iota {dimensions = array<i32: 0>} : vector<32x256xi32>
    %c128_i32_94 = arith.constant 128 : i32
    %417 = vector.broadcast %c128_i32_94 : i32 to vector<32x256xi32>
    %418 = arith.addi %416, %417 : vector<32x256xi32>
    %419 = vector.broadcast %375 : vector<1x256xi32> to vector<32x256xi32>
    %420 = arith.cmpi eq, %418, %419 : vector<32x256xi32>
    %421 = vector.broadcast %350 : vector<1x256xi1> to vector<32x256xi1>
    %422 = arith.andi %420, %421 : vector<32x256xi1>
    %423 = arith.extui %422 : vector<32x256xi1> to vector<32x256xi32>
    %424 = arith.sitofp %423 : vector<32x256xi32> to vector<32x256xf32>
    %c384 = arith.constant 384 : index
    %c0_95 = arith.constant 0 : index
    %425 = vector.load %arg16[%c384, %c0_95] : memref<512x256xf32, #tpu.memory_space<vmem>>, vector<32x256xf32>
    tpu.vector_store %arg16[%c384, %c0_95], %424 {strides = array<i32>} : memref<512x256xf32, #tpu.memory_space<vmem>>, vector<32x256xf32>,
    %426 = tpu.iota {dimensions = array<i32: 0>} : vector<32x256xi32>
    %c160_i32_96 = arith.constant 160 : i32
    %427 = vector.broadcast %c160_i32_96 : i32 to vector<32x256xi32>
    %428 = arith.addi %426, %427 : vector<32x256xi32>
    %429 = vector.broadcast %375 : vector<1x256xi32> to vector<32x256xi32>
    %430 = arith.cmpi eq, %428, %429 : vector<32x256xi32>
    %431 = vector.broadcast %350 : vector<1x256xi1> to vector<32x256xi1>
    %432 = arith.andi %430, %431 : vector<32x256xi1>
    %433 = arith.extui %432 : vector<32x256xi1> to vector<32x256xi32>
    %434 = arith.sitofp %433 : vector<32x256xi32> to vector<32x256xf32>
    %c416 = arith.constant 416 : index
    %c0_97 = arith.constant 0 : index
    %435 = vector.load %arg16[%c416, %c0_97] : memref<512x256xf32, #tpu.memory_space<vmem>>, vector<32x256xf32>
    tpu.vector_store %arg16[%c416, %c0_97], %434 {strides = array<i32>} : memref<512x256xf32, #tpu.memory_space<vmem>>, vector<32x256xf32>,
    %436 = tpu.iota {dimensions = array<i32: 0>} : vector<32x256xi32>
    %c192_i32_98 = arith.constant 192 : i32
    %437 = vector.broadcast %c192_i32_98 : i32 to vector<32x256xi32>
    %438 = arith.addi %436, %437 : vector<32x256xi32>
    %439 = vector.broadcast %375 : vector<1x256xi32> to vector<32x256xi32>
    %440 = arith.cmpi eq, %438, %439 : vector<32x256xi32>
    %441 = vector.broadcast %350 : vector<1x256xi1> to vector<32x256xi1>
    %442 = arith.andi %440, %441 : vector<32x256xi1>
    %443 = arith.extui %442 : vector<32x256xi1> to vector<32x256xi32>
    %444 = arith.sitofp %443 : vector<32x256xi32> to vector<32x256xf32>
    %c448 = arith.constant 448 : index
    %c0_99 = arith.constant 0 : index
    %445 = vector.load %arg16[%c448, %c0_99] : memref<512x256xf32, #tpu.memory_space<vmem>>, vector<32x256xf32>
    tpu.vector_store %arg16[%c448, %c0_99], %444 {strides = array<i32>} : memref<512x256xf32, #tpu.memory_space<vmem>>, vector<32x256xf32>,
    %446 = tpu.iota {dimensions = array<i32: 0>} : vector<32x256xi32>
    %c224_i32_100 = arith.constant 224 : i32
    %447 = vector.broadcast %c224_i32_100 : i32 to vector<32x256xi32>
    %448 = arith.addi %446, %447 : vector<32x256xi32>
    %449 = vector.broadcast %375 : vector<1x256xi32> to vector<32x256xi32>
    %450 = arith.cmpi eq, %448, %449 : vector<32x256xi32>
    %451 = vector.broadcast %350 : vector<1x256xi1> to vector<32x256xi1>
    %452 = arith.andi %450, %451 : vector<32x256xi1>
    %453 = arith.extui %452 : vector<32x256xi1> to vector<32x256xi32>
    %454 = arith.sitofp %453 : vector<32x256xi32> to vector<32x256xf32>
    %c480 = arith.constant 480 : index
    %c0_101 = arith.constant 0 : index
    %455 = vector.load %arg16[%c480, %c0_101] : memref<512x256xf32, #tpu.memory_space<vmem>>, vector<32x256xf32>
    tpu.vector_store %arg16[%c480, %c0_101], %454 {strides = array<i32>} : memref<512x256xf32, #tpu.memory_space<vmem>>, vector<32x256xf32>,
    %c0_102 = arith.constant 0 : index
    %c0_103 = arith.constant 0 : index
    %456 = vector.load %arg15[%c0_102, %c0_103] : memref<40x256xf32, #tpu.memory_space<vmem>>, vector<40x256xf32>
    %c0_104 = arith.constant 0 : index
    %c0_105 = arith.constant 0 : index
    %457 = vector.load %arg16[%c0_104, %c0_105] : memref<512x256xf32, #tpu.memory_space<vmem>>, vector<512x256xf32>
    %cst_106 = arith.constant dense<0.000000e+00> : vector<40x512xf32>
    %458 = tpu.matmul %456, %457, %cst_106 {dimension_numbers = #tpu.dot_dimension_numbers<[1], [1], [0], [0], [0, 0, 1, 0], [], []>} : vector<40x256xf32>, vector<512x256xf32>, vector<40x512xf32> -> vector<40x512xf32>
    %459 = vector.extract_strided_slice %458 {offsets = [35, 0], sizes = [1, 512], strides = [1, 1]} : vector<40x512xf32> to vector<1x512xf32>
    %cst_107 = arith.constant 1.000000e+00 : f32
    %460 = vector.broadcast %cst_107 : f32 to vector<1x512xf32>
    %461 = arith.maximumf %459, %460 : vector<1x512xf32>
    %462 = tpu.reciprocal %461 {approx = true} : vector<1x512xf32> -> vector<1x512xf32>
    %463 = vector.extract_strided_slice %458 {offsets = [0, 0], sizes = [32, 512], strides = [1, 1]} : vector<40x512xf32> to vector<32x512xf32>
    %464 = vector.broadcast %462 : vector<1x512xf32> to vector<32x512xf32>
    %465 = arith.mulf %463, %464 : vector<32x512xf32>
    %466 = vector.extract_strided_slice %458 {offsets = [32, 0], sizes = [3, 512], strides = [1, 1]} : vector<40x512xf32> to vector<3x512xf32>
    %467 = vector.broadcast %462 : vector<1x512xf32> to vector<3x512xf32>
    %468 = arith.mulf %466, %467 : vector<3x512xf32>
    %c0_108 = arith.constant 0 : index
    %c0_109 = arith.constant 0 : index
    %469 = vector.load %arg9[%c0_108, %c0_109] : memref<32x32xf32, #tpu.memory_space<vmem>>, vector<32x32xf32>
    %cst_110 = arith.constant dense<0.000000e+00> : vector<32x512xf32>
    %470 = tpu.matmul %469, %465, %cst_110 {dimension_numbers = #tpu.dot_dimension_numbers<[1], [0], [0], [1], [0, 0, 1, 1], [], []>} : vector<32x32xf32>, vector<32x512xf32>, vector<32x512xf32> -> vector<32x512xf32>
    %c0_111 = arith.constant 0 : index
    %c0_112 = arith.constant 0 : index
    %471 = vector.load %arg10[%c0_111, %c0_112] : memref<32x1xf32, #tpu.memory_space<vmem>>, vector<32x1xf32>
    %472 = vector.broadcast %471 : vector<32x1xf32> to vector<32x512xf32>
    %473 = arith.addf %470, %472 : vector<32x512xf32>
    %cst_113 = arith.constant 0.000000e+00 : f32
    %474 = vector.broadcast %cst_113 : f32 to vector<32x512xf32>
    %475 = arith.maximumf %473, %474 : vector<32x512xf32>
    %c0_114 = arith.constant 0 : index
    %c0_115 = arith.constant 0 : index
    %476 = vector.load %arg11[%c0_114, %c0_115] : memref<3x32xf32, #tpu.memory_space<vmem>>, vector<3x32xf32>
    %cst_116 = arith.constant dense<0.000000e+00> : vector<3x512xf32>
    %477 = tpu.matmul %476, %475, %cst_116 {dimension_numbers = #tpu.dot_dimension_numbers<[1], [0], [0], [1], [0, 0, 1, 1], [], []>} : vector<3x32xf32>, vector<32x512xf32>, vector<3x512xf32> -> vector<3x512xf32>
    %c0_117 = arith.constant 0 : index
    %c0_118 = arith.constant 0 : index
    %478 = vector.load %arg12[%c0_117, %c0_118] : memref<3x1xf32, #tpu.memory_space<vmem>>, vector<3x1xf32>
    %479 = vector.broadcast %478 : vector<3x1xf32> to vector<3x512xf32>
    %480 = arith.addf %477, %479 : vector<3x512xf32>
    %cst_119 = arith.constant 0.000000e+00 : f32
    %481 = vector.broadcast %cst_119 : f32 to vector<2x512xf32>
    %482 = tpu.concatenate %480, %468, %481 in 0 : vector<3x512xf32>, vector<3x512xf32>, vector<2x512xf32> -> vector<8x512xf32>
    %c0_120 = arith.constant 0 : index
    %c0_121 = arith.constant 0 : index
    %c0_122 = arith.constant 0 : index
    %483 = vector.load %arg13[%c0_120, %c0_121, %c0_122] : memref<1x40x512xf32, #tpu.memory_space<vmem>>, vector<1x8x512xf32>
    %484 = vector.shape_cast %483 : vector<1x8x512xf32> to vector<8x512xf32>
    %485 = vector.shape_cast %482 : vector<8x512xf32> to vector<1x8x512xf32>
    tpu.vector_store %arg13[%c0_120, %c0_121, %c0_122], %485 {strides = array<i32>} : memref<1x40x512xf32, #tpu.memory_space<vmem>>, vector<1x8x512xf32>,
    %c0_123 = arith.constant 0 : index
    %c8_124 = arith.constant 8 : index
    %c0_125 = arith.constant 0 : index
    %486 = vector.load %arg13[%c0_123, %c8_124, %c0_125] : memref<1x40x512xf32, #tpu.memory_space<vmem>>, vector<1x32x512xf32>
    %487 = vector.shape_cast %486 : vector<1x32x512xf32> to vector<32x512xf32>
    %488 = vector.shape_cast %465 : vector<32x512xf32> to vector<1x32x512xf32>
    tpu.vector_store %arg13[%c0_123, %c8_124, %c0_125], %488 {strides = array<i32>} : memref<1x40x512xf32, #tpu.memory_space<vmem>>, vector<1x32x512xf32>,
    return
  }
  func.func @transform_0(%arg0: i32) -> (i32, i32) {
    %c0_i32 = arith.constant 0 : i32
    %c0_i32_0 = arith.constant 0 : i32
    %c0_i32_1 = arith.constant 0 : i32
    return %c0_i32, %c0_i32_0 : i32, i32
  }
  func.func @transform_1(%arg0: i32) -> (i32, i32, i32) {
    %c0_i32 = arith.constant 0 : i32
    %c0_i32_0 = arith.constant 0 : i32
    %c0_i32_1 = arith.constant 0 : i32
    return %arg0, %c0_i32, %c0_i32_0 : i32, i32, i32
  }
  func.func @transform_2(%arg0: i32) -> (i32, i32, i32) {
    %c0_i32 = arith.constant 0 : i32
    %c0_i32_0 = arith.constant 0 : i32
    %c0_i32_1 = arith.constant 0 : i32
    return %arg0, %c0_i32, %c0_i32_0 : i32, i32, i32
  }
  func.func @transform_3(%arg0: i32) -> (i32, i32, i32) {
    %c0_i32 = arith.constant 0 : i32
    %c0_i32_0 = arith.constant 0 : i32
    %c0_i32_1 = arith.constant 0 : i32
    return %arg0, %c0_i32, %c0_i32_0 : i32, i32, i32
  }
  func.func @transform_4(%arg0: i32) -> (i32, i32) {
    %c0_i32 = arith.constant 0 : i32
    %c0_i32_0 = arith.constant 0 : i32
    %c0_i32_1 = arith.constant 0 : i32
    return %c0_i32, %c0_i32_0 : i32, i32
  }
  func.func @transform_5(%arg0: i32) -> (i32, i32) {
    %c0_i32 = arith.constant 0 : i32
    %c0_i32_0 = arith.constant 0 : i32
    %c0_i32_1 = arith.constant 0 : i32
    return %c0_i32, %c0_i32_0 : i32, i32
  }
  func.func @transform_6(%arg0: i32) -> (i32, i32) {
    %c0_i32 = arith.constant 0 : i32
    %c0_i32_0 = arith.constant 0 : i32
    %c0_i32_1 = arith.constant 0 : i32
    return %c0_i32, %c0_i32_0 : i32, i32
  }
  func.func @transform_7(%arg0: i32) -> (i32, i32) {
    %c0_i32 = arith.constant 0 : i32
    %c0_i32_0 = arith.constant 0 : i32
    %c0_i32_1 = arith.constant 0 : i32
    return %c0_i32, %c0_i32_0 : i32, i32
  }
  func.func @transform_8(%arg0: i32) -> (i32, i32) {
    %c0_i32 = arith.constant 0 : i32
    %c0_i32_0 = arith.constant 0 : i32
    %c0_i32_1 = arith.constant 0 : i32
    return %c0_i32, %c0_i32_0 : i32, i32
  }
  func.func @transform_9(%arg0: i32) -> (i32, i32) {
    %c0_i32 = arith.constant 0 : i32
    %c0_i32_0 = arith.constant 0 : i32
    %c0_i32_1 = arith.constant 0 : i32
    return %c0_i32, %c0_i32_0 : i32, i32
  }
  func.func @transform_10(%arg0: i32) -> (i32, i32) {
    %c0_i32 = arith.constant 0 : i32
    %c0_i32_0 = arith.constant 0 : i32
    %c0_i32_1 = arith.constant 0 : i32
    return %c0_i32, %c0_i32_0 : i32, i32
  }
  func.func @transform_11(%arg0: i32) -> (i32, i32) {
    %c0_i32 = arith.constant 0 : i32
    %c0_i32_0 = arith.constant 0 : i32
    %c0_i32_1 = arith.constant 0 : i32
    return %c0_i32, %c0_i32_0 : i32, i32
  }
  func.func @transform_12(%arg0: i32) -> (i32, i32, i32) {
    %c0_i32 = arith.constant 0 : i32
    %c0_i32_0 = arith.constant 0 : i32
    %c0_i32_1 = arith.constant 0 : i32
    return %arg0, %c0_i32, %c0_i32_0 : i32, i32, i32
  }
  func.func @transform_13(%arg0: i32) -> (i32, i32, i32, i32) {
    %c0_i32 = arith.constant 0 : i32
    %c0_i32_0 = arith.constant 0 : i32
    %c0_i32_1 = arith.constant 0 : i32
    %c0_i32_2 = arith.constant 0 : i32
    return %arg0, %c0_i32, %c0_i32_0, %c0_i32_1 : i32, i32, i32, i32
  }
}

</mosaic_0001>

<bundles_post_ra>
// kernel: tpu_custom_call.1
= control target key start
LH: loop header
LB: loop body
LE: loop exit
PB: predicated region body
PF: predicated region fallthrough
CT: control target
= control target key end

     0   :  { %s5291_s0 = inlined_call_operand.vmem [shape: f32[2,40], index: 0, kind: input, shape index: {}]   ;;  %s5292_s1 = inlined_call_operand.vmem [shape: f32[2,3,256], index: 1, kind: input, shape index: {}]   ;;  %s5293_s2 = inlined_call_operand.vmem [shape: f32[2,1,256], index: 2, kind: input, shape index: {}]   ;;  %s5294_s3 = inlined_call_operand.vmem [shape: f32[2,3,256], index: 3, kind: input, shape index: {}]   ;;  %s5295_s4 = inlined_call_operand.vmem [shape: f32[32,8], index: 4, kind: input, shape index: {}]   ;;  %s5296_s5 = inlined_call_operand.vmem [shape: f32[32,1], index: 5, kind: input, shape index: {}]   ;;  %s5297_s6 = inlined_call_operand.vmem [shape: f32[32,32], index: 6, kind: input, shape index: {}]   ;;  %s5298_s7 = inlined_call_operand.vmem [shape: f32[32,1], index: 7, kind: input, shape index: {}]   ;;  %s5299_s8 = inlined_call_operand.vmem [shape: f32[32,32], index: 8, kind: input, shape index: {}]   ;;  %s5300_s9 = inlined_call_operand.vmem [shape: f32[32,1], index: 9, kind: input, shape index: {}]   ;;  %s5301_s10 = inlined_call_operand.vmem [shape: f32[3,32], index: 10, kind: input, shape index: {}]   ;;  %s5302_s11 = inlined_call_operand.vmem [shape: f32[3,1], index: 11, kind: input, shape index: {}]   ;;  %s5303_s12 = inlined_call_operand.hbm [shape: f32[2,40,512], index: 12, kind: output, shape index: {0}]   ;;  %s5304_s13 = inlined_call_operand.hbm [shape: f32[2,2,4,256], index: 13, kind: output, shape index: {1}]  }
   0x1   :  { %5399 = sst [smem:[#allocation27_spill]] %s5291_s0 }
   0x2   :  { %5400 = sst [smem:[#allocation28_spill]] %s5292_s1 }
   0x3   :  { %5401 = sst [smem:[#allocation29_spill]] %s5303_s12 }
   0x4   :  { %5402 = sst [smem:[#allocation30_spill]] %s5304_s13 }
   0x5   :  { %19 = vsyncpa [#allocation6], 0 }
   0x6   :  { %20 = vsyncpa [#allocation5], 0 }
   0x7   :  { %22 = vsyncpa [#allocation5 + $0x1], 0 }
   0x8   :  { %23 = vsyncpa [#allocation9], 0 }
   0x9   :  { %25 = vsyncpa [#allocation9 + $0x1], 0  ;;  %s3607_s25 = smov 0   ;;  %s3609_s26 = smov 0  }
   0xa   :  { %s3611_s27 = smov 0   ;;  %s3613_s28 = smov 0  }
   0xb LB: > { %5403 = sst [smem:[#allocation13_spill]] %s3513_s25  ;;  %s3628_s29 = sadd.s32 4294967295, %s3525_s28   ;;  %s3525_s28 = sphi %s3613_s28, %s5690_s28   ;;  %s3521_s27 = sphi %s3611_s27, %s5692_s27   ;;  %s3517_s26 = sphi %s3609_s26, %s5694_s26   ;;  %s3513_s25 = sphi %s3607_s25, %s5693_s25  }
   0xc   : > { %5404 = sst [smem:[#allocation14_spill]] %s3521_s27  ;;  %s2848_s30 = sadd.s32 4294967294, %s3525_s28  }
   0xd   : > { %5405 = sst [smem:[#allocation15_spill]] %s3525_s28  ;;  %s3632_s14 = sadd.s32 1, %s3525_s28  }
   0xe   : > { %5406 = sst [smem:[#allocation16_spill]] %s3628_s29  ;;  %s305_s15 = sadd.s32 1, %s3521_s27 }
   0xf   : > { %5407 = sst [smem:[#allocation17_spill]] %s3632_s14  ;;  %s302_s16 = ssub.s32 %s3525_s28, %s3632_s14 }
  0x10   : > { %p315_p0 = scmp.ne.s32.totalorder %s3521_s27, %s3517_s26  ;;  %p303_p1 = scmp.eq.s32.totalorder %s302_s16, 0 }
  0x11   : > { %p316_p2 = scmp.eq.s32.totalorder %s3628_s29, 1  ;;  %p321_p3 = scmp.ne.s32.totalorder %s3517_s26, %s3513_s25 }
  0x12   : > { %p322_p4 = scmp.eq.s32.totalorder %s2848_s30, 1  ;;  %p2849_p7 = scmp.ge.s32.totalorder %s3525_s28, 1 }
  0x13   : > { %s3643_s17 = scalar_select %p303_p1, %s3521_s27, %s305_s15  }
  0x14   : > { %p3645_p5 = por %p316_p2, %p315_p0  ;;  %p3649_p6 = por %p322_p4, %p321_p3 }
  0x15   : > { %5408 = sst [smem:[#allocation18_spill]] %s3643_s17  ;;  %p355_p8 = scmp.lt.s32.totalorder %s3525_s28, 3 }
  0x16   : > { %s5409_s18 = scalar_select %p3645_p5, 1, 0 }
  0x17   : > { %s5411_s19 = scalar_select %p3649_p6, 1, 0 }
  0x18   : > { %5410 = sst [smem:[#allocation19_spill]] %s5409_s18  ;;  %p3351_p9 = scmp.eq.s32.totalorder %s3628_s29, 0 }
  0x19   : > { %5412 = sst [smem:[#allocation20_spill]] %s5411_s19  ;;  %p3656_p10 = pnand %p2849_p7, %p355_p8 }
  0x1a   : > { %s5414_s0 = sld [smem:[#allocation27_spill]] }
  0x1b   : > { %p3340_p11 = pneg %p3656_p10 }
  0x1d   : > { %p3341_p12 = pnand %p3351_p9, %p3340_p11 }
  0x1f   : > { %p3414_p0 = pneg %p3341_p12 }
  0x20   : > { %s368_s23 = sshll.u32 %s5414_s0, 4  ;;  %s369_s23 = int_to_ptr.vmem [resolvable:$true] %s368_s23 }
  0x21   : > { %s3412_s24 = scalar_lea.vmem %s369_s23, 32  ;;  %p3420_p3 = scmp.lt.s32.totalorder %s369_s23, %s369_s23 }
  0x22   : > { %p3413_p13 = scmp.ne.s32.totalorder %s369_s23, %s3412_s24  ;;  %p3421_p4 = scmp.lt.s32.totalorder %s3412_s24, %s3412_s24 }
  0x24   : > { %p3415_p1 = pnand %p3414_p0, %p3413_p13  ;;  %p3422_p7 = por %p3421_p4, %p3420_p3 }
  0x26   : > { %p3416_p2 = pneg %p3415_p1 }
  0x28   : > { %p3423_p8 = pnand %p3422_p7, %p3416_p2 }
  0x2a   : > { %3426 = shalt.err (!%p3423_p8)
}
  0x2b   : > { %s3527_s30 = smov [#allocation4]   ;;  %428 = sbr.rel (%p3656_p10) target bundleno = 1263 (0x4ef), region = 68 }
  0x2c   : > { %3343 = dma.vmem_to_smem (!%p3341_p12), %s369_s23, 32, %s3527_s30, [#allocation6]  }
  0x32   : > { %3500 = dma.done.wait (%p3351_p9), [#allocation6], 32  }
  0x33   : > { %3502 = vsyncadd (%p3351_p9), [#allocation6], 4294967264 }
  0x34   : > { %434 = sfence }
  0x35   : > { %p487_p11 = scmp.lt.s32.totalorder %s3628_s29, 1  ;;  %s3675_s15 = sshll.u32 %s3628_s29, 7  ;;  %v5344_v0 = vmov 0.0   ;;  %v595_v1 = vld [vmem:[%s5296_s5] sm:$0xff]  ;;  %v3529_v2 = vmov 0   ;;  %v597_v3 = vld [vmem:[%s5296_s5 + $0x10] sm:$0xff]  ;;  %v541_v7 = vlaneseq }
  0x36   : > { %s3678_s16 = sld [smem:[#allocation4 + %s3675_s15]]  ;;  %s503_s20 = sadd.s32 1, %s3675_s15  ;;  %696 = vmatprep.mubr.f32.mxu0 %v5344_v0  ;;  %834 = vmatprep.mubr.f32.mxu1 %v5344_v0  ;;  %v596_v4 = vld [vmem:[%s5296_s5 + $0x8] sm:$0xff]  ;;  %v598_v5 = vld [vmem:[%s5296_s5 + $0x18] sm:$0xff]  ;;  %v733_v8 = vld [vmem:[%s5298_s7] sm:$0xff]  ;;  %vm5319_vm0 = vcmask 1040384  }
  0x37   : > { %s488_s21 = scalar_select %p487_p11, %s3628_s29, 1  ;;  %3394 = vset.pattern.permute.xlu0 %v3529_v2  ;;  %3395 = vset.pattern.permute.xlu1 %v3529_v2  ;;  %v734_v9 = vld [vmem:[%s5298_s7 + $0x8] sm:$0xff]  ;;  %v3735_v13 = vshrl.u32 %v541_v7, 7  ;;  %v735_v16 = vld [vmem:[%s5298_s7 + $0x10] sm:$0xff]  ;;  %v736_v17 = vld [vmem:[%s5298_s7 + $0x18] sm:$0xff]  ;;  %vm5318_vm1 = vcmask 1041408  }
  0x38   : > { %s3687_s24 = sld [smem:[#allocation4 + %s503_s20]]  ;;  %s505_s30 = sadd.s32 2, %s3675_s15  ;;  %601 = vperm.xlu0 %3394, %v595_v1   ;;  %611 = vperm.xlu1 %3395, %v597_v3   ;;  %v2261_v30 = vld [vmem:[%s5300_s9] sm:$0xff]  ;;  %v2262_v31 = vld [vmem:[%s5300_s9 + $0x8] sm:$0xff]  ;;  %vm5320_vm2 = vcmask 1042432   ;;  %vm5317_vm3 = vcmask 1045504  }
  0x39   : > { %s3019_s27 = sshll.u32 %s488_s21, 3  ;;  %s2857_s14 = sshll.u32 %s488_s21, 1  ;;  %v3776_v29 = vsub.s32 1, %v3735_v13  ;;  %v3797_v38 = vsub.s32 0, %v3735_v13  ;;  %v2263_v48 = vld [vmem:[%s5300_s9 + $0x10] sm:$0xff]  ;;  %v2264_v49 = vld [vmem:[%s5300_s9 + $0x18] sm:$0xff] }
  0x3a   : > { %s5415_s1 = sld [smem:[#allocation28_spill]]  ;;  %s495_s28 = scalar_lea.vmem %s5293_s2, %s2857_s14  ;;  %vm619_vm4 = vcmask 64512  }
  0x3b   : > { %s3710_s29 = scalar_lea.vmem %s5294_s3, %s3019_s27  ;;  %s506_s22 = sld [smem:[#allocation4 + %s505_s30]]  ;;  %v3712_v6 = vld [vmem:[%s495_s28] sm:$0x3] }
  0x3c   : > { %s507_s25 = sadd.s32 3, %s3675_s15  ;;  %s509_s14 = sadd.s32 4, %s3675_s15  ;;  %3397 = vrcp.f32 %v3712_v6  ;;  %606 = vperm.xlu0 %3394, %v596_v4   ;;  %616 = vperm.xlu1 %3395, %v598_v5   ;;  %v3742_v14 = vld [vmem:[%s3710_s29] sm:$0x77]  ;;  %v523_v18 = vstv %s3678_s16 }
  0x3d   : > { %s3717_s12 = sld [smem:[#allocation4 + %s507_s25]]  ;;  %s511_s19 = sadd.s32 5, %s3675_s15  ;;  %v3765_v24 = vcombine.high %v3742_v14, %v3742_v14  ;;  %v575_v42 = vrot.slane %v3742_v14, 5  ;;  %v2492_v4 = vld [vmem:[%s5302_s11] sm:$0x7] }
  0x3e   : > { %s3719_s13 = sld [smem:[#allocation4 + %s509_s14]]  ;;  %s883_s21 = sadd.s32 8, %s3675_s15  ;;  %v528_v22 = vstv %s3687_s24 }
  0x3f   : > { %s3729_s0 = sld [smem:[#allocation4 + %s511_s19]]  ;;  %s885_s25 = sadd.s32 9, %s3675_s15  ;;  %v576_v41 = vrot.slane %v3765_v24, 5 }
  0x40   : > { %s491_s20 = scalar_lea.vmem %s5415_s1, %s3019_s27  ;;  %s513_s27 = sadd.s32 6, %s3675_s15  ;;  %739 = vperm.xlu0 %3394, %v733_v8   ;;  %744 = vperm.xlu1 %3395, %v734_v9  }
  0x41   : > { %s3731_s17 = sld [smem:[#allocation4 + %s513_s27]]  ;;  %v515_v10 = vld [vmem:[%s491_s20] ss:$4 sm:$0x3]  ;;  %v520_v12 = vstv %s506_s22  ;;  %s887_s19 = sadd.s32 10, %s3675_s15 }
  0x42   : > { %v2861_v11 = vld [vmem:[%s491_s20 + $0x1] ss:$4 sm:$0x3]  ;;  %s3737_s14 = sld [smem:[#allocation4 + %s883_s21]]  ;;  %v521_v15 = vsub.f32 %v515_v10, %v520_v12  ;;  %s889_s27 = sadd.s32 11, %s3675_s15 }
  0x43   : > { %s3739_s18 = sld [smem:[#allocation4 + %s885_s25]]  ;;  %v525_v19 = vstv %s3717_s12  ;;  %s891_s25 = sadd.s32 12, %s3675_s15 }
  0x44   : > { %s3754_s23 = sld [smem:[#allocation4 + %s887_s19]]  ;;  %v522_v20 = vmul.f32 %v521_v15, %v3712_v6  ;;  %v526_v21 = vsub.f32 %v2861_v11, %v525_v19  ;;  %s893_s1 = sadd.s32 13, %s3675_s15  ;;  %749 = vperm.xlu0 %3394, %v735_v16   ;;  %754 = vperm.xlu1 %3395, %v736_v17   ;;  %v538_v28 = vstv %s3719_s13 }
  0x45   : > { %s3756_s21 = sld [smem:[#allocation4 + %s889_s27]]  ;;  %v536_v23 = vstv %s3729_s0  ;;  %s895_s24 = sadd.s32 14, %s3675_s15 }
  0x46   : > { %s3767_s16 = sld [smem:[#allocation4 + %s891_s25]]  ;;  %v3398_v25 = vpop.eup %3397  ;;  %v3771_v26 = vmul.f32 %v523_v18, %v522_v20  ;;  %v527_v27 = vmul.f32 %v526_v21, %v3712_v6  ;;  %s897_s0 = sadd.s32 15, %s3675_s15  ;;  %v591_v21 = vld [vmem:[%s5295_s4] sm:$0xff] }
  0x47   : > { %s3769_s12 = sld [smem:[#allocation4 + %s893_s1]]  ;;  %v532_v32 = vstv %s3731_s17  ;;  %v537_v33 = vmul.f32 %v3398_v25, %v536_v23  ;;  %s899_s17 = sadd.s32 16, %s3675_s15 }
  0x48   : > { %s3787_s13 = sld [smem:[#allocation4 + %s895_s24]]  ;;  %v909_v34 = vstv %s3737_s14  ;;  %v3793_v36 = vmul.f32 %v528_v22, %v527_v27  ;;  %v531_v37 = vmul.f32 %v3398_v25, %v3771_v26  ;;  %s901_s22 = sadd.s32 17, %s3675_s15  ;;  %2267 = vperm.xlu0 %3394, %v2261_v30   ;;  %2272 = vperm.xlu1 %3395, %v2262_v31  }
  0x49   : > { %s3789_s20 = sld [smem:[#allocation4 + %s897_s0]]  ;;  %v911_v35 = vstv %s3739_s18  ;;  %v910_v39 = vmul.f32 %v909_v34, %v3771_v26  ;;  %v539_v40 = vsub.f32 %v538_v28, %v537_v33  ;;  %s903_s28 = sadd.s32 18, %s3675_s15 }
  0x4a   : > { %s3804_s14 = sld [smem:[#allocation4 + %s899_s17]]  ;;  %v914_v43 = vstv %s3754_s23  ;;  %v533_v44 = vmul.f32 %v532_v32, %v531_v37  ;;  %v534_v45 = vmul.f32 %v3398_v25, %v3793_v36  ;;  %s905_s25 = sadd.s32 19, %s3675_s15  ;;  %v912_v46 = vmul.f32 %v911_v35, %v3793_v36  ;;  %v592_v35 = vld [vmem:[%s5295_s4 + $0x8] sm:$0xff] }
  0x4b   : > { %s3806_s18 = sld [smem:[#allocation4 + %s901_s22]]  ;;  %v915_v47 = vmul.f32 %v914_v43, %v3712_v6  ;;  %v570_v50 = vrot.slane %v539_v40, %v3776_v29  ;;  %v917_v51 = vstv %s3756_s21  ;;  %s907_s30 = sadd.s32 20, %s3675_s15  ;;  %v566_v58 = vrot.slane %v539_v40, %v3797_v38 }
  0x4c   : > { %s3821_s19 = sld [smem:[#allocation4 + %s903_s28]]  ;;  %v919_v52 = vstv %s3767_s16  ;;  %v535_v54 = vmul.f32 %v534_v45, %v532_v32  ;;  %v548_v55 = vrot.slane %v533_v44, %v3776_v29  ;;  %v544_v56 = vrot.slane %v533_v44, %v3797_v38  ;;  %s1400_s17 = sadd.s32 24, %s3675_s15  ;;  %2277 = vperm.xlu0 %3394, %v2263_v48   ;;  %2282 = vperm.xlu1 %3395, %v2264_v49   ;;  %v593_v48 = vld [vmem:[%s5295_s4 + $0x10] sm:$0xff] }
  0x4d   : > { %s3823_s27 = sld [smem:[#allocation4 + %s905_s25]]  ;;  %v921_v53 = vstv %s3769_s12  ;;  %v913_v57 = vadd.f32 %v912_v46, %v910_v39  ;;  %v920_v59 = vmul.f32 %v919_v52, %v3771_v26  ;;  %s1402_s16 = sadd.s32 25, %s3675_s15 }
  0x4e   : > { %s3833_s22 = sld [smem:[#allocation4 + %s907_s30]]  ;;  %v922_v60 = vmul.f32 %v921_v53, %v3793_v36  ;;  %v924_v61 = vstv %s3787_s13  ;;  %v559_v62 = vrot.slane %v535_v54, %v3776_v29  ;;  %v555_v63 = vrot.slane %v535_v54, %v3797_v38  ;;  %s1404_s12 = sadd.s32 26, %s3675_s15 }
  0x4f   : > { %s3838_s21 = sld [smem:[#allocation4 + %s1400_s17]]  ;;  %v916_v1 = vadd.f32 %v915_v47, %v913_v57  ;;  %v925_v3 = vmul.f32 %v924_v61, %v3712_v6  ;;  %v927_v7 = vstv %s3789_s20  ;;  %s1406_s0 = sadd.s32 27, %s3675_s15 }
  0x50   : > { %v923_v5 = vadd.f32 %v922_v60, %v920_v59  ;;  %v929_v8 = vstv %s3804_s14  ;;  %s3851_s13 = sld [smem:[#allocation4 + %s1402_s16]]  ;;  %v581_v10 = vsel %vm5319_vm0, %v548_v55, %v559_v62  ;;  %v580_v11 = vsel %vm5319_vm0, %v544_v56, %v555_v63  ;;  %s1408_s1 = sadd.s32 28, %s3675_s15  ;;  %2495 = vperm.xlu0 %3394, %v2492_v4   ;;  %v594_v62 = vld [vmem:[%s5295_s4 + $0x18] sm:$0xff] }
  0x51   : > { %v931_v9 = vstv %s3806_s18  ;;  %s3853_s24 = sld [smem:[#allocation4 + %s1404_s12]]  ;;  %v3857_v12 = vadd.f32 %v917_v51, %v916_v1  ;;  %v930_v14 = vmul.f32 %v929_v8, %v3771_v26  ;;  %v584_v15 = vsel %vm5318_vm1, %v581_v10, %v570_v50  ;;  %s1410_s30 = sadd.s32 29, %s3675_s15 }
  0x52   : > { %v583_v16 = vsel %vm5318_vm1, %v580_v11, %v566_v58  ;;  %v926_v17 = vadd.f32 %v925_v3, %v923_v5  ;;  %v932_v18 = vmul.f32 %v931_v9, %v3793_v36  ;;  %s3865_s20 = sld [smem:[#allocation4 + %s1406_s0]]  ;;  %v587_v19 = vsel %vm5320_vm2, %v584_v15, %v576_v41  ;;  %s1412_s17 = sadd.s32 30, %s3675_s15 }
  0x53   : > { %s3867_s14 = sld [smem:[#allocation4 + %s1408_s1]]  ;;  %v586_v20 = vsel %vm5320_vm2, %v583_v16, %v575_v42  ;;  %v934_v22 = vstv %s3821_s19  ;;  %2862 = vmatprep.subr.msk.mxu0 %vm5317_vm3, %v587_v19  ;;  %v937_v28 = vstv %s3823_s27  ;;  %s1414_s19 = sadd.s32 31, %s3675_s15 }
  0x54   : > { %v3878_v23 = vadd.f32 %v927_v7, %v926_v17  ;;  %v933_v25 = vadd.f32 %v932_v18, %v930_v14  ;;  %v935_v27 = vmul.f32 %v934_v22, %v3712_v6  ;;  %s3881_s16 = sld [smem:[#allocation4 + %s1410_s30]]  ;;  %2863 = vmatpush1.msk.msra.mxu0 %vm5317_vm3, %v586_v20  ;;  %s1416_s28 = sadd.s32 32, %s3675_s15  ;;  %v942_v49 = vstv %s3833_s22 }
  0x55   : > { %s3883_s12 = sld [smem:[#allocation4 + %s1412_s17]]  ;;  %v1426_v30 = vstv %s3838_s21  ;;  %2864 = vmatmul.mubr.msk.f32.vlgmr.msra.gmra.mrb[0].mxu0 %vm619_vm4, %v591_v21  ;;  %s1418_s21 = sadd.s32 33, %s3675_s15 }
  0x56   : > { %v936_v31 = vadd.f32 %v935_v27, %v933_v25  ;;  %s3891_s25 = sld [smem:[#allocation4 + %s1414_s19]]  ;;  %v1427_v32 = vmul.f32 %v1426_v30, %v3771_v26  ;;  %v1428_v33 = vstv %s3851_s13  ;;  %702 = vmatprep.mubr.f32.mxu0 %v5344_v0  ;;  %s1420_s18 = sadd.s32 34, %s3675_s15 }
  0x57   : > { %s3893_s0 = sld [smem:[#allocation4 + %s1416_s28]]  ;;  %v1431_v34 = vstv %s3853_s24  ;;  %v1429_v37 = vmul.f32 %v1428_v33, %v3793_v36  ;;  %s1422_s23 = sadd.s32 35, %s3675_s15 }
  0x58   : > { %v1432_v39 = vmul.f32 %v1431_v34, %v3712_v6  ;;  %v3906_v40 = vadd.f32 %v937_v28, %v936_v31  ;;  %s3908_s13 = sld [smem:[#allocation4 + %s1418_s21]]  ;;  %v1434_v45 = vstv %s3865_s20  ;;  %s1424_s20 = sadd.s32 36, %s3675_s15 }
  0x59   : > { %s3910_s24 = sld [smem:[#allocation4 + %s1420_s18]]  ;;  %v1436_v41 = vstv %s3867_s14  ;;  %v1430_v42 = vadd.f32 %v1429_v37, %v1427_v32  ;;  %2865 = vmatmul.mubr.msk.f32.gmra.mrb[2].mxu0 %vm619_vm4, %v592_v35  ;;  %s3531_s14 = smov [#allocation8]  }
  0x5a   : > { %5416 = vst [vmem:[#allocation21_spill] sm:$0xff] %v3906_v40  ;;  %v1437_v43 = vmul.f32 %v1436_v41, %v3771_v26  ;;  %v939_v44 = vand.u32 2147483647, %v3906_v40  ;;  %s3917_s30 = sld [smem:[#allocation4 + %s1422_s23]]  ;;  %v1438_v46 = vstv %s3881_s16  ;;  %708 = vmatprep.mubr.f32.mxu0 %v5344_v0  ;;  %vm951_vm7 = vcmp.gt.f32.partialorder %v3906_v40, 1e-06 }
  0x5b   : > { %v1441_v47 = vstv %s3883_s12  ;;  %v1433_v50 = vadd.f32 %v1432_v39, %v1430_v42  ;;  %v1439_v51 = vmul.f32 %v1438_v46, %v3793_v36  ;;  %s1425_s15 = sld [smem:[#allocation4 + %s1424_s20]]  ;;  %v5421_v42 = vmov 0  ;;  %s3431_s20 = sshll.u32 %s3531_s14, 4  ;;  %s3432_s20 = int_to_ptr.vmem [resolvable:$false] %s3431_s20 }
  0x5c   : > { %v1442_v52 = vmul.f32 %v1441_v47, %v3712_v6  ;;  %vm940_vm5 = vcmp.lt.f32.partialorder %v939_v44, 1e-08  ;;  %v1444_v59 = vstv %s3891_s25  ;;  %s5664_s19 = sld [smem:[#allocation16_spill]]  ;;  %s3433_s22 = scalar_lea.vmem %s3432_s20, 512 }
  0x5d   : > { %v1446_v53 = vstv %s3893_s0  ;;  %v941_v54 = vsel %vm940_vm5, 1e-08, %v3906_v40  ;;  %v1435_v55 = vadd.f32 %v1434_v45, %v1433_v50  ;;  %v1440_v56 = vadd.f32 %v1439_v51, %v1437_v43  ;;  %2866 = vmatmul.mubr.msk.f32.gmra.mrb[4].mxu0 %vm619_vm4, %v593_v48 }
  0x5e   : > { %v1447_v57 = vmul.f32 %v1446_v53, %v3771_v26  ;;  %v943_v58 = vmul.f32 %v942_v49, %v941_v54  ;;  %v1448_v60 = vstv %s3908_s13  ;;  %714 = vmatprep.mubr.f32.mxu0 %v5344_v0  ;;  %v5542_v0 = vmov 0 }
  0x5f   : > { %v1451_v61 = vstv %s3910_s24  ;;  %v1443_v63 = vadd.f32 %v1442_v52, %v1440_v56  ;;  %v1449_v1 = vmul.f32 %v1448_v60, %v3793_v36 }
  0x60   : > { %v1452_v3 = vmul.f32 %v1451_v61, %v3712_v6  ;;  %3399 = vrcp.f32 %v943_v58  ;;  %v1454_v5 = vstv %s3917_s30  ;;  %v3990_v58 = vadd.s32 8, %v3735_v13 }
  0x61   : > { %v1445_v26 = vadd.f32 %v1444_v59, %v1443_v63  ;;  %v1450_v4 = vadd.f32 %v1449_v1, %v1447_v57  ;;  %2867 = vmatmul.mubr.msk.f32.gmra.mrb[6].mxu0 %vm619_vm4, %v594_v62  ;;  %v1459_v10 = vstv %s1425_s15  ;;  %v5426_v61 = vmov 0 }
  0x62   : > { %v5347_v62 = vmov 1.0|1.0   ;;  %v4011_v63 = vadd.s32 16, %v3735_v13  ;;  %s3021_s0 = sshll.u32 %s5664_s19, 8 }
  0x63   : > { %v1453_v7 = vadd.f32 %v1452_v3, %v1450_v4 }
  0x65   : > { %v3945_v8 = vadd.f32 %v1454_v5, %v1453_v7 }
  0x67   : > { %5417 = vst [vmem:[#allocation22_spill] sm:$0xff] %v3945_v8  ;;  %v1456_v9 = vand.u32 2147483647, %v3945_v8  ;;  %vm1468_vm5 = vcmp.gt.f32.partialorder %v3945_v8, 1e-06 }
  0x69   : > { %vm1457_vm6 = vcmp.lt.f32.partialorder %v1456_v9, 1e-08 }
  0x6a   : > { %v3400_v11 = vpop.eup %3399  ;;  %v1458_v14 = vsel %vm1457_vm6, 1e-08, %v3945_v8  ;;  %v1226_v8 = vadd.s32 128, %v4011_v63 }
  0x6b   : > { %v945_v36 = vmul.f32 %v3400_v11, %v3857_v12  ;;  %v948_v6 = vmul.f32 %v3400_v11, %v3878_v23  ;;  %v1460_v15 = vmul.f32 %v1459_v10, %v1458_v14  ;;  %v5428_v10 = vmov 0 }
  0x6c   : > { %v1092_v11 = vadd.s32 32, %v3735_v13 }
  0x6d   : > { %3401 = vrcp.f32 %v1460_v15  ;;  %v949_v19 = vadd.f32 1.0, %v948_v6  ;;  %v946_v20 = vadd.f32 1.0, %v945_v36  ;;  %v1093_v36 = vadd.s32 32, %v3990_v58 }
  0x6f   : > { %v3951_v21 = vmul.f32 7.5, %v949_v19  ;;  %v3953_v22 = vmul.f32 7.5, %v946_v20  ;;  %v5434_v20 = vmov 0 }
  0x71   : > { %5418 = vst [vmem:[#allocation23_spill] sm:$0xff] %v3951_v21  ;;  %5419 = vst [vmem:[#allocation24_spill] sm:$0xff] %v3953_v22  ;;  %v1022_v25 = vadd.f32 0.5, %v3951_v21  ;;  %v1017_v27 = vadd.f32 0.5, %v3953_v22  ;;  %vm952_vm8 = vcmp.ge.f32.partialorder %v3953_v22, 0.0  ;;  %vm954_vm10 = vcmp.le.f32.partialorder %v3953_v22, 15.0 }
  0x72   : > { %vm953_vm9 = vmand %vm951_vm7, %vm952_vm8  ;;  %vm956_vm12 = vcmp.ge.f32.partialorder %v3951_v21, 0.0  ;;  %vm958_vm14 = vcmp.le.f32.partialorder %v3951_v21, 15.0 }
  0x73   : > { %v1023_v28 = vfloor.f32 %v1022_v25  ;;  %v1018_v30 = vfloor.f32 %v1017_v27  ;;  %vm955_vm11 = vmand %vm953_vm9, %vm954_vm10  ;;  %v1094_v25 = vadd.s32 32, %v4011_v63 }
  0x74   : > { %vm957_vm13 = vmand %vm955_vm11, %vm956_vm12 }
  0x75   : > { %v1024_v12 = vmax.f32 %v1023_v28, 0.0  ;;  %v1019_v23 = vmax.f32 %v1018_v30, 0.0  ;;  %vm3964_vm15 = vmand %vm957_vm13, %vm958_vm14  ;;  %v5436_v28 = vmov 0  ;;  %v5438_v30 = vmov 0 }
  0x76   : > { %v5422_v42 = vsel %vm3964_vm15, 4294967295, %v5421_v42  ;;  %v960_v45 = vsel %vm3964_vm15, 1, %v3529_v2 }
  0x77   : > { %v3402_v16 = vpop.eup %3401  ;;  %v1025_v31 = vmin.f32 %v1024_v12, 15.0  ;;  %v1020_v32 = vmin.f32 %v1019_v23, 15.0  ;;  %v1057_v49 = vrot.slane %v960_v45, %v3776_v29  ;;  %v1053_v57 = vrot.slane %v960_v45, %v3797_v38 }
  0x78   : > { %v1462_v17 = vmul.f32 %v3402_v16, %v1435_v55  ;;  %v1465_v18 = vmul.f32 %v3402_v16, %v1445_v26  ;;  %v4016_v26 = vadd.s32 24, %v3735_v13  ;;  %v5440_v12 = vmov 0 }
  0x79   : > { %v3325_v33 = vtrunc.f32 %v1025_v31  ;;  %v3323_v35 = vtrunc.f32 %v1020_v32  ;;  %vm3979_vm4 = vcmp.eq.s32.totalorder %v1057_v49, 1  ;;  %vm4001_vm13 = vcmp.eq.s32.totalorder %v1053_v57, 1 }
  0x7a   : > { %v1466_v34 = vadd.f32 1.0, %v1465_v18  ;;  %v1463_v39 = vadd.f32 1.0, %v1462_v17  ;;  %v5427_v61 = vsel %vm4001_vm13, 4294967295, %v5426_v61  ;;  %v5432_v17 = vmov 0 }
  0x7b   : > { %v3326_v37 = vcvt.f32.s32 %v3325_v33  ;;  %v3324_v43 = vcvt.f32.s32 %v3323_v35  ;;  %v1095_v27 = vadd.s32 32, %v4016_v26  ;;  %v5442_v23 = vmov 0 }
  0x7c   : > { %v3962_v41 = vmul.f32 7.5, %v1466_v34  ;;  %v3971_v46 = vmul.f32 7.5, %v1463_v39  ;;  %v5444_v31 = vmov 0  ;;  %v1136_v32 = vadd.s32 64, %v3735_v13 }
  0x7d   : > { %v1027_v44 = vmul.u32 16, %v3326_v37  ;;  %v1137_v33 = vadd.s32 64, %v3990_v58  ;;  %v5446_v34 = vmov 0  ;;  %v5448_v35 = vmov 0 }
  0x7e   : > { %5420 = vst [vmem:[#allocation25_spill] sm:$0xff] %v3962_v41  ;;  %5423 = vst [vmem:[#allocation26_spill] sm:$0xff] %v3971_v46  ;;  %v1540_v47 = vadd.f32 0.5, %v3962_v41  ;;  %v1535_v50 = vadd.f32 0.5, %v3971_v46  ;;  %vm1469_vm6 = vcmp.ge.f32.partialorder %v3971_v46, 0.0  ;;  %vm1471_vm11 = vcmp.le.f32.partialorder %v3971_v46, 15.0 }
  0x7f   : > { %v1028_v48 = vadd.s32 %v3324_v43, %v1027_v44  ;;  %vm1470_vm9 = vmand %vm1468_vm5, %vm1469_vm6  ;;  %vm1475_vm1 = vcmp.le.f32.partialorder %v3962_v41, 15.0  ;;  %v5450_v37 = vmov 0  ;;  %v5452_v39 = vmov 0 }
  0x80   : > { %v1541_v51 = vfloor.f32 %v1540_v47  ;;  %v1536_v54 = vfloor.f32 %v1535_v50  ;;  %vm1472_vm6 = vmand %vm1470_vm9, %vm1471_vm11  ;;  %v1138_v43 = vadd.s32 64, %v4011_v63  ;;  %v1139_v44 = vadd.s32 64, %v4016_v26 }
  0x81   : > { %v3977_v52 = vrot.slane %v1028_v48, %v3776_v29  ;;  %v3986_v56 = vrot.slane %v1028_v48, %v3797_v38  ;;  %v5454_v45 = vmov 0  ;;  %v5456_v47 = vmov 0 }
  0x82   : > { %v1542_v55 = vmax.f32 %v1541_v51, 0.0  ;;  %v1537_v59 = vmax.f32 %v1536_v54, 0.0  ;;  %v5458_v48 = vmov 0  ;;  %v5460_v49 = vmov 0 }
  0x83   : > { %vm1043_vm7 = vcmp.eq.s32.totalorder %v3735_v13, %v3977_v52  ;;  %vm1045_vm10 = vcmp.eq.s32.totalorder %v3990_v58, %v3977_v52  ;;  %vm1042_vm3 = vcmp.eq.s32.totalorder %v3735_v13, %v3986_v56  ;;  %vm1044_vm5 = vcmp.eq.s32.totalorder %v3990_v58, %v3986_v56 }
  0x84   : > { %vm1061_vm8 = vmand %vm1043_vm7, %vm3979_vm4  ;;  %v1543_v60 = vmin.f32 %v1542_v55, 15.0  ;;  %v1538_v1 = vmin.f32 %v1537_v59, 15.0  ;;  %vm1047_vm9 = vcmp.eq.s32.totalorder %v4011_v63, %v3977_v52  ;;  %vm1049_vm11 = vcmp.eq.s32.totalorder %v4016_v26, %v3977_v52 }
  0x85   : > { %vm1063_vm12 = vmand %vm1045_vm10, %vm3979_vm4  ;;  %vm1473_vm10 = vcmp.ge.f32.partialorder %v3962_v41, 0.0  ;;  %v1180_v50 = vadd.s32 96, %v3735_v13  ;;  %v1181_v51 = vadd.s32 96, %v3990_v58  ;;  %v5462_v54 = vmov 0 }
  0x86   : > { %vm3162_vm14 = vmpackc.low %vm1063_vm12, %vm1061_vm8  ;;  %v3329_v3 = vtrunc.f32 %v1543_v60  ;;  %v3327_v4 = vtrunc.f32 %v1538_v1  ;;  %v5464_v55 = vmov 0  ;;  %v5466_v57 = vmov 0 }
  0x87   : > { %3163 = vmatprep.subr.msk.bf16.mxu0 %vm3162_vm14, %v5347_v62  ;;  %vm1060_vm7 = vmand %vm1042_vm3, %vm4001_vm13  ;;  %v5468_v59 = vmov 0  ;;  %v1182_v60 = vadd.s32 96, %v4011_v63  ;;  %v1183_v1 = vadd.s32 96, %v4016_v26  ;;  %v5512_v46 = vmov 0 }
  0x88   : > { %vm1062_vm8 = vmand %vm1044_vm5, %vm4001_vm13  ;;  %v3330_v5 = vcvt.f32.s32 %v3329_v3  ;;  %v3328_v7 = vcvt.f32.s32 %v3327_v4  ;;  %v5470_v3 = vmov 0  ;;  %v5472_v4 = vmov 0 }
  0x89   : > { %vm3164_vm12 = vmpackc.low %vm1062_vm8, %vm1060_vm7  ;;  %vm1046_vm8 = vcmp.eq.s32.totalorder %v4011_v63, %v3986_v56 }
  0x8a   : > { %3165 = vmatpush1.bf16.xpose.msk.msra.mxu0 %vm3164_vm12, %v5347_v62  ;;  %vm1474_vm3 = vmand %vm1472_vm6, %vm1473_vm10  ;;  %v1545_v9 = vmul.u32 16, %v3330_v5  ;;  %vm1048_vm6 = vcmp.eq.s32.totalorder %v4016_v26, %v3986_v56  ;;  %v5474_v5 = vmov 0 }
  0x8b   : > { %vm1065_vm14 = vmand %vm1047_vm9, %vm3979_vm4 }
  0x8c   : > { %vm1067_vm5 = vmand %vm1049_vm11, %vm3979_vm4  ;;  %v1546_v14 = vadd.s32 %v3328_v7, %v1545_v9  ;;  %vm1097_vm11 = vcmp.eq.s32.totalorder %v1092_v11, %v3977_v52  ;;  %v5476_v7 = vmov 0 }
  0x8d   : > { %vm3166_vm7 = vmpackc.low %vm1067_vm5, %vm1065_vm14 }
  0x8e   : > { %3167 = vmatprep.subr.msk.bf16.mxu0 %vm3166_vm7, %v5347_v62  ;;  %vm4034_vm12 = vmand %vm1474_vm3, %vm1475_vm1  ;;  %v4052_v15 = vrot.slane %v1546_v14, %v3776_v29  ;;  %vm1099_vm3 = vcmp.eq.s32.totalorder %v1093_v36, %v3977_v52  ;;  %v4075_v18 = vrot.slane %v1546_v14, %v3797_v38  ;;  %v4364_v14 = vadd.s32 128, %v3990_v58 }
  0x8f   : > { %v5429_v10 = vsel %vm4034_vm12, 4294967295, %v5428_v10  ;;  %vm1064_vm10 = vmand %vm1046_vm8, %vm4001_vm13  ;;  %v1477_v6 = vsel %vm4034_vm12, 1, %v3529_v2  ;;  %v5430_v2 = vmov 0  ;;  %vm1103_vm12 = vcmp.eq.s32.totalorder %v1095_v27, %v3977_v52 }
  0x90   : > { %vm1066_vm1 = vmand %vm1048_vm6, %vm4001_vm13  ;;  %v1570_v16 = vrot.slane %v1477_v6, %v3776_v29  ;;  %vm1606_vm5 = vcmp.eq.s32.totalorder %v1092_v11, %v4052_v15  ;;  %vm1608_vm8 = vcmp.eq.s32.totalorder %v1093_v36, %v4052_v15  ;;  %v1566_v19 = vrot.slane %v1477_v6, %v3797_v38 }
  0x91   : > { %vm3168_vm9 = vmpackc.low %vm1066_vm1, %vm1064_vm10  ;;  %v5478_v6 = vmov 0 }
  0x92   : > { %3169 = vmatpush1.bf16.xpose.msk.msra.mxu0 %vm3168_vm9, %v5347_v62  ;;  %vm1105_vm14 = vmand %vm1097_vm11, %vm3979_vm4  ;;  %vm4062_vm6 = vcmp.eq.s32.totalorder %v1570_v16, 1  ;;  %vm1096_vm9 = vcmp.eq.s32.totalorder %v1092_v11, %v3986_v56  ;;  %vm4097_vm0 = vcmp.eq.s32.totalorder %v1566_v19, 1  ;;  %v730_v16 = vld [vmem:[%s5297_s6 + $0x8] sm:$0xff] }
  0x93   : > { %vm1107_vm7 = vmand %vm1099_vm3, %vm3979_vm4  ;;  %v5431_v2 = vsel %vm4062_vm6, 4294967295, %v5430_v2  ;;  %vm1098_vm3 = vcmp.eq.s32.totalorder %v1093_v36, %v3986_v56  ;;  %v5437_v28 = vsel %vm4097_vm0, 4294967295, %v5436_v28 }
  0x94   : > { %vm3170_vm10 = vmpackc.low %vm1107_vm7, %vm1105_vm14  ;;  %vm1605_vm7 = vcmp.eq.s32.totalorder %v1092_v11, %v4075_v18  ;;  %v4358_v11 = vadd.s32 128, %v3735_v13 }
  0x95   : > { %3171 = vmatprep.subr.msk.bf16.mxu0 %vm3170_vm10, %v5347_v62  ;;  %vm4069_vm1 = vmand %vm1606_vm5, %vm4062_vm6  ;;  %vm1607_vm10 = vcmp.eq.s32.totalorder %v1093_v36, %v4075_v18 }
  0x96   : > { %v5433_v17 = vsel %vm4069_vm1, 4294967295, %v5432_v17  ;;  %vm4080_vm11 = vmand %vm1608_vm8, %vm4062_vm6 }
  0x97   : > { %v5435_v20 = vsel %vm4080_vm11, 4294967295, %v5434_v20  ;;  %vm1104_vm5 = vmand %vm1096_vm9, %vm4001_vm13  ;;  %vm1101_vm9 = vcmp.eq.s32.totalorder %v1094_v25, %v3977_v52 }
  0x98   : > { %vm1106_vm8 = vmand %vm1098_vm3, %vm4001_vm13 }
  0x99   : > { %vm3172_vm2 = vmpackc.low %vm1106_vm8, %vm1104_vm5 }
  0x9a   : > { %3173 = vmatpush1.bf16.xpose.msk.msra.mxu0 %vm3172_vm2, %v5347_v62  ;;  %vm4104_vm14 = vmand %vm1605_vm7, %vm4097_vm0  ;;  %vm1610_vm7 = vcmp.eq.s32.totalorder %v1094_v25, %v4052_v15  ;;  %vm1100_vm2 = vcmp.eq.s32.totalorder %v1094_v25, %v3986_v56 }
  0x9b   : > { %v5439_v30 = vsel %vm4104_vm14, 4294967295, %v5438_v30  ;;  %vm4111_vm3 = vmand %vm1607_vm10, %vm4097_vm0  ;;  %vm1612_vm10 = vcmp.eq.s32.totalorder %v1095_v27, %v4052_v15 }
  0x9c   : > { %v5441_v12 = vsel %vm4111_vm3, 4294967295, %v5440_v12  ;;  %vm1109_vm5 = vmand %vm1101_vm9, %vm3979_vm4 }
  0x9d   : > { %vm1111_vm8 = vmand %vm1103_vm12, %vm3979_vm4  ;;  %vm1102_vm12 = vcmp.eq.s32.totalorder %v1095_v27, %v3986_v56 }
  0x9e   : > { %vm3174_vm15 = vmpackc.low %vm1111_vm8, %vm1109_vm5 }
  0x9f   : > { %3175 = vmatprep.subr.msk.bf16.mxu0 %vm3174_vm15, %v5347_v62  ;;  %vm4129_vm1 = vmand %vm1610_vm7, %vm4062_vm6  ;;  %vm1609_vm7 = vcmp.eq.s32.totalorder %v1094_v25, %v4075_v18  ;;  %v5482_v25 = vmov 0 }
  0xa0   : > { %v5443_v23 = vsel %vm4129_vm1, 4294967295, %v5442_v23  ;;  %vm4136_vm9 = vmand %vm1612_vm10, %vm4062_vm6  ;;  %vm1611_vm10 = vcmp.eq.s32.totalorder %v1095_v27, %v4075_v18 }
  0xa1   : > { %v5445_v31 = vsel %vm4136_vm9, 4294967295, %v5444_v31  ;;  %vm1108_vm5 = vmand %vm1100_vm2, %vm4001_vm13  ;;  %vm1141_vm2 = vcmp.eq.s32.totalorder %v1136_v32, %v3977_v52 }
  0xa2   : > { %vm1110_vm8 = vmand %vm1102_vm12, %vm4001_vm13  ;;  %vm1143_vm12 = vcmp.eq.s32.totalorder %v1137_v33, %v3977_v52 }
  0xa3   : > { %vm3176_vm14 = vmpackc.low %vm1110_vm8, %vm1108_vm5 }
  0xa4   : > { %3177 = vmatpush1.bf16.xpose.msk.msra.mxu0 %vm3176_vm14, %v5347_v62  ;;  %vm4156_vm15 = vmand %vm1609_vm7, %vm4097_vm0  ;;  %vm1646_vm7 = vcmp.eq.s32.totalorder %v1136_v32, %v4052_v15  ;;  %vm1140_vm14 = vcmp.eq.s32.totalorder %v1136_v32, %v3986_v56 }
  0xa5   : > { %v5447_v34 = vsel %vm4156_vm15, 4294967295, %v5446_v34  ;;  %vm4163_vm1 = vmand %vm1611_vm10, %vm4097_vm0  ;;  %vm1648_vm10 = vcmp.eq.s32.totalorder %v1137_v33, %v4052_v15 }
  0xa6   : > { %v5449_v35 = vsel %vm4163_vm1, 4294967295, %v5448_v35  ;;  %vm1149_vm5 = vmand %vm1141_vm2, %vm3979_vm4 }
  0xa7   : > { %vm1151_vm8 = vmand %vm1143_vm12, %vm3979_vm4  ;;  %vm1142_vm12 = vcmp.eq.s32.totalorder %v1137_v33, %v3986_v56 }
  0xa8   : > { %vm3178_vm9 = vmpackc.low %vm1151_vm8, %vm1149_vm5 }
  0xa9   : > { %3179 = vmatprep.subr.msk.bf16.mxu0 %vm3178_vm9, %v5347_v62  ;;  %vm4181_vm3 = vmand %vm1646_vm7, %vm4062_vm6  ;;  %vm1645_vm7 = vcmp.eq.s32.totalorder %v1136_v32, %v4075_v18  ;;  %v5484_v32 = vmov 0 }
  0xaa   : > { %v5451_v37 = vsel %vm4181_vm3, 4294967295, %v5450_v37  ;;  %vm4188_vm2 = vmand %vm1648_vm10, %vm4062_vm6  ;;  %vm1647_vm10 = vcmp.eq.s32.totalorder %v1137_v33, %v4075_v18 }
  0xab   : > { %v5453_v39 = vsel %vm4188_vm2, 4294967295, %v5452_v39  ;;  %vm1148_vm5 = vmand %vm1140_vm14, %vm4001_vm13  ;;  %vm1145_vm14 = vcmp.eq.s32.totalorder %v1138_v43, %v3977_v52 }
  0xac   : > { %vm1150_vm8 = vmand %vm1142_vm12, %vm4001_vm13  ;;  %vm1147_vm12 = vcmp.eq.s32.totalorder %v1139_v44, %v3977_v52 }
  0xad   : > { %vm3180_vm15 = vmpackc.low %vm1150_vm8, %vm1148_vm5 }
  0xae   : > { %3181 = vmatpush1.bf16.xpose.msk.msra.mxu0 %vm3180_vm15, %v5347_v62  ;;  %vm4208_vm9 = vmand %vm1645_vm7, %vm4097_vm0  ;;  %vm1650_vm7 = vcmp.eq.s32.totalorder %v1138_v43, %v4052_v15  ;;  %vm1144_vm15 = vcmp.eq.s32.totalorder %v1138_v43, %v3986_v56 }
  0xaf   : > { %v5455_v45 = vsel %vm4208_vm9, 4294967295, %v5454_v45  ;;  %vm4215_vm3 = vmand %vm1647_vm10, %vm4097_vm0  ;;  %vm1652_vm10 = vcmp.eq.s32.totalorder %v1139_v44, %v4052_v15 }
  0xb0   : > { %v5457_v47 = vsel %vm4215_vm3, 4294967295, %v5456_v47  ;;  %vm1153_vm5 = vmand %vm1145_vm14, %vm3979_vm4 }
  0xb1   : > { %vm1155_vm8 = vmand %vm1147_vm12, %vm3979_vm4  ;;  %vm1146_vm12 = vcmp.eq.s32.totalorder %v1139_v44, %v3986_v56 }
  0xb2   : > { %vm3182_vm2 = vmpackc.low %vm1155_vm8, %vm1153_vm5 }
  0xb3   : > { %3183 = vmatprep.subr.msk.bf16.mxu0 %vm3182_vm2, %v5347_v62  ;;  %vm4233_vm1 = vmand %vm1650_vm7, %vm4062_vm6  ;;  %vm1649_vm7 = vcmp.eq.s32.totalorder %v1138_v43, %v4075_v18 }
  0xb4   : > { %v5459_v48 = vsel %vm4233_vm1, 4294967295, %v5458_v48  ;;  %vm4240_vm14 = vmand %vm1652_vm10, %vm4062_vm6  ;;  %vm1651_vm10 = vcmp.eq.s32.totalorder %v1139_v44, %v4075_v18 }
  0xb5   : > { %v5461_v49 = vsel %vm4240_vm14, 4294967295, %v5460_v49  ;;  %vm1152_vm5 = vmand %vm1144_vm15, %vm4001_vm13  ;;  %vm1185_vm15 = vcmp.eq.s32.totalorder %v1180_v50, %v3977_v52 }
  0xb6   : > { %vm1154_vm8 = vmand %vm1146_vm12, %vm4001_vm13  ;;  %vm1187_vm12 = vcmp.eq.s32.totalorder %v1181_v51, %v3977_v52 }
  0xb7   : > { %vm3184_vm9 = vmpackc.low %vm1154_vm8, %vm1152_vm5  ;;  %v602_v9 = vpop.permute.xlu0 %601 }
  0xb8   : > { %3185 = vmatpush1.bf16.xpose.msk.msra.mxu0 %vm3184_vm9, %v5347_v62  ;;  %vm4260_vm2 = vmand %vm1649_vm7, %vm4097_vm0  ;;  %vm1686_vm7 = vcmp.eq.s32.totalorder %v1180_v50, %v4052_v15  ;;  %vm1184_vm9 = vcmp.eq.s32.totalorder %v1180_v50, %v3986_v56 }
  0xb9   : > { %v5463_v54 = vsel %vm4260_vm2, 4294967295, %v5462_v54  ;;  %vm4267_vm1 = vmand %vm1651_vm10, %vm4097_vm0  ;;  %vm1688_vm10 = vcmp.eq.s32.totalorder %v1181_v51, %v4052_v15 }
  0xba   : > { %v5465_v55 = vsel %vm4267_vm1, 4294967295, %v5464_v55  ;;  %vm1193_vm5 = vmand %vm1185_vm15, %vm3979_vm4 }
  0xbb   : > { %vm1195_vm8 = vmand %vm1187_vm12, %vm3979_vm4  ;;  %vm1186_vm12 = vcmp.eq.s32.totalorder %v1181_v51, %v3986_v56  ;;  %v607_v33 = vpop.permute.xlu0 %606 }
  0xbc   : > { %vm3186_vm14 = vmpackc.low %vm1195_vm8, %vm1193_vm5 }
  0xbd   : > { %3187 = vmatprep.subr.msk.bf16.mxu0 %vm3186_vm14, %v5347_v62  ;;  %vm4285_vm3 = vmand %vm1686_vm7, %vm4062_vm6  ;;  %vm1685_vm7 = vcmp.eq.s32.totalorder %v1180_v50, %v4075_v18 }
  0xbe   : > { %v5467_v57 = vsel %vm4285_vm3, 4294967295, %v5466_v57  ;;  %vm4292_vm15 = vmand %vm1688_vm10, %vm4062_vm6  ;;  %vm1687_vm10 = vcmp.eq.s32.totalorder %v1181_v51, %v4075_v18 }
  0xbf   : > { %v5469_v59 = vsel %vm4292_vm15, 4294967295, %v5468_v59  ;;  %vm1192_vm5 = vmand %vm1184_vm9, %vm4001_vm13  ;;  %vm1189_vm9 = vcmp.eq.s32.totalorder %v1182_v60, %v3977_v52 }
  0xc0   : > { %vm1194_vm8 = vmand %vm1186_vm12, %vm4001_vm13  ;;  %vm1191_vm12 = vcmp.eq.s32.totalorder %v1183_v1, %v3977_v52 }
  0xc1   : > { %vm3188_vm2 = vmpackc.low %vm1194_vm8, %vm1192_vm5 }
  0xc2   : > { %3189 = vmatpush1.bf16.xpose.msk.msra.mxu0 %vm3188_vm2, %v5347_v62  ;;  %vm4312_vm14 = vmand %vm1685_vm7, %vm4097_vm0  ;;  %vm1690_vm7 = vcmp.eq.s32.totalorder %v1182_v60, %v4052_v15  ;;  %vm1188_vm2 = vcmp.eq.s32.totalorder %v1182_v60, %v3986_v56 }
  0xc3   : > { %v5471_v3 = vsel %vm4312_vm14, 4294967295, %v5470_v3  ;;  %vm4319_vm3 = vmand %vm1687_vm10, %vm4097_vm0  ;;  %vm1692_vm10 = vcmp.eq.s32.totalorder %v1183_v1, %v4052_v15  ;;  %vm1558_vm14 = vcmp.eq.s32.totalorder %v3990_v58, %v4052_v15 }
  0xc4   : > { %v5473_v4 = vsel %vm4319_vm3, 4294967295, %v5472_v4  ;;  %vm1197_vm5 = vmand %vm1189_vm9, %vm3979_vm4  ;;  %vm1556_vm9 = vcmp.eq.s32.totalorder %v3735_v13, %v4052_v15 }
  0xc5   : > { %vm1199_vm8 = vmand %vm1191_vm12, %vm3979_vm4 }
  0xc6   : > { %vm3190_vm15 = vmpackc.low %vm1199_vm8, %vm1197_vm5  ;;  %vm1689_vm8 = vcmp.eq.s32.totalorder %v1182_v60, %v4075_v18 }
  0xc7   : > { %3191 = vmatprep.subr.msk.bf16.mxu0 %vm3190_vm15, %v5347_v62  ;;  %vm4337_vm1 = vmand %vm1690_vm7, %vm4062_vm6  ;;  %vm1190_vm15 = vcmp.eq.s32.totalorder %v1183_v1, %v3986_v56 }
  0xc8   : > { %v5475_v5 = vsel %vm4337_vm1, 4294967295, %v5474_v5  ;;  %vm4348_vm12 = vmand %vm1692_vm10, %vm4062_vm6  ;;  %vm1691_vm1 = vcmp.eq.s32.totalorder %v1183_v1, %v4075_v18  ;;  %v612_v1 = vpop.permute.xlu1 %611 }
  0xc9   : > { %v5477_v7 = vsel %vm4348_vm12, 4294967295, %v5476_v7  ;;  %vm1196_vm7 = vmand %vm1188_vm2, %vm4001_vm13 }
  0xca   : > { %vm4368_vm10 = vmand %vm1556_vm9, %vm4062_vm6 }
  0xcb   : > { %v5479_v6 = vsel %vm4368_vm10, 4294967295, %v5478_v6  ;;  %vm4374_vm5 = vmand %vm1558_vm14, %vm4062_vm6  ;;  %vm1229_vm14 = vcmp.eq.s32.totalorder %v4358_v11, %v3977_v52 }
  0xcc   : > { %vm1198_vm2 = vmand %vm1190_vm15, %vm4001_vm13  ;;  %vm1231_vm15 = vcmp.eq.s32.totalorder %v4364_v14, %v3977_v52 }
  0xcd   : > { %vm3192_vm12 = vmpackc.low %vm1198_vm2, %vm1196_vm7  ;;  %vm5488_vm7 = vcmp.eq.s32.totalorder %v3735_v13, %v4075_v18 }
  0xce   : > { %3193 = vmatpush1.bf16.xpose.msk.msra.mxu0 %vm3192_vm12, %v5347_v62  ;;  %vm4384_vm9 = vmand %vm1689_vm8, %vm4097_vm0 }
  0xcf   : > { %v5483_v25 = vsel %vm4384_vm9, 4294967295, %v5482_v25  ;;  %vm4392_vm3 = vmand %vm1691_vm1, %vm4097_vm0 }
  0xd0   : > { %v5485_v32 = vsel %vm4392_vm3, 4294967295, %v5484_v32  ;;  %vm4408_vm8 = vmand %vm1229_vm14, %vm3979_vm4  ;;  %vm5503_vm3 = vcmp.eq.s32.totalorder %v4364_v14, %v4052_v15 }
  0xd1   : > { %vm1239_vm14 = vmand %vm1231_vm15, %vm3979_vm4  ;;  %vm5491_vm15 = vcmp.eq.s32.totalorder %v3990_v58, %v4075_v18 }
  0xd2   : > { %vm3194_vm2 = vmpackc.low %vm1239_vm14, %vm4408_vm8  ;;  %vm5494_vm8 = vcmp.eq.s32.totalorder %v4358_v11, %v4052_v15  ;;  %vm1228_vm14 = vcmp.eq.s32.totalorder %v4358_v11, %v3986_v56 }
  0xd3   : > { %vm4432_vm12 = vmand %vm5488_vm7, %vm4097_vm0  ;;  %3195 = vmatprep.subr.msk.bf16.mxu0 %vm3194_vm2, %v5347_v62  ;;  %v5501_v62 = vmov 0 }
  0xd4   : > { %vm4441_vm1 = vmand %vm5491_vm15, %vm4097_vm0  ;;  %vm5497_vm15 = vcmp.eq.s32.totalorder %v4011_v63, %v4052_v15 }
  0xd5   : > { %vm4451_vm7 = vmand %vm5494_vm8, %vm4062_vm6  ;;  %vm5500_vm8 = vcmp.eq.s32.totalorder %v4016_v26, %v4052_v15 }
  0xd6   : > { %vm4462_vm2 = vmand %vm5497_vm15, %vm4062_vm6  ;;  %vm1230_vm15 = vcmp.eq.s32.totalorder %v4364_v14, %v3986_v56 }
  0xd7   : > { %vm4471_vm9 = vmand %vm5500_vm8, %vm4062_vm6 }
  0xd8   : > { %v5502_v62 = vsel %vm4471_vm9, 4294967295, %v5501_v62  ;;  %vm4480_vm11 = vmand %vm5503_vm3, %vm4062_vm6  ;;  %vm1727_vm3 = vcmp.eq.s32.totalorder %v4364_v14, %v4075_v18  ;;  %vm1561_vm9 = vcmp.eq.s32.totalorder %v4016_v26, %v4075_v18 }
  0xd9   : > { %vm4497_vm6 = vmand %vm1228_vm14, %vm4001_vm13  ;;  %vm1559_vm14 = vcmp.eq.s32.totalorder %v4011_v63, %v4075_v18 }
  0xda   : > { %vm1238_vm8 = vmand %vm1230_vm15, %vm4001_vm13  ;;  %vm5509_vm15 = vcmp.eq.s32.totalorder %v4358_v11, %v4075_v18  ;;  %vm1233_vm13 = vcmp.eq.s32.totalorder %v1226_v8, %v3977_v52  ;;  %v5514_v11 = vmov 0 }
  0xdb   : > { %vm4527_vm10 = vmand %vm1727_vm3, %vm4097_vm0  ;;  %vm5518_vm3 = vnez %v5502_v62  ;;  %v732_v62 = vld [vmem:[%s5297_s6 + $0x18] sm:$0xff] }
  0xdc   : > { %v5513_v46 = vsel %vm4527_vm10, 4294967295, %v5512_v46 }
 0x128   : > { %v698_v36 = vpop.f32.mrb[0].mxu0 }
 0x129   : > { %v700_v19 = vpop.f32.mrb[1].mxu0  ;;  %v699_v27 = vadd.f32 %v698_v36, %v602_v9 }
 0x12a   : > { %v701_v43 = vadd.f32 %v700_v19, %v602_v9 }
 0x12b   : > { %v721_v36 = vmax.f32 %v699_v27, 0.0  ;;  %v5544_v27 = vmov 0 }
 0x12c   : > { %v704_v44 = vpop.f32.mrb[2].mxu0 }
 0x12d   : > { %v705_v50 = vadd.f32 %v704_v44, %v607_v33  ;;  %v706_v51 = vpop.f32.mrb[3].mxu0 }
 0x12e   : > { %v707_v9 = vadd.f32 %v706_v51, %v607_v33  ;;  %v722_v33 = vmax.f32 %v701_v43, 0.0  ;;  %v5495_v43 = vmov 0 }
 0x12f   : > { %v723_v19 = vmax.f32 %v705_v50, 0.0  ;;  %v5496_v43 = vsel %vm4451_vm7, 4294967295, %v5495_v43  ;;  %vm3196_vm7 = vmpackc.low %vm1238_vm8, %vm4497_vm6 }
 0x130   : > { %v724_v44 = vmax.f32 %v707_v9, 0.0  ;;  %v710_v51 = vpop.f32.mrb[4].mxu0  ;;  %v5498_v9 = vmov 0  ;;  %vm4540_vm8 = vmand %vm1561_vm9, %vm4097_vm0 }
 0x131   : > { %v712_v50 = vpop.f32.mrb[5].mxu0  ;;  %v3156_v60 = vpack.c.bf16 %v723_v19, %v721_v36  ;;  %v5499_v9 = vsel %vm4462_vm2, 4294967295, %v5498_v9  ;;  %v5504_v36 = vmov 0  ;;  %v711_v41 = vadd.f32 %v710_v51, %v612_v1 }
 0x132   : > { %v5505_v36 = vsel %vm4480_vm11, 4294967295, %v5504_v36  ;;  %v3154_v19 = vpack.c.bf16 %v724_v44, %v722_v33  ;;  %v1227_v33 = vadd.s32 128, %v4016_v26  ;;  %v617_v44 = vpop.permute.xlu1 %616  ;;  %v713_v40 = vadd.f32 %v712_v50, %v612_v1  ;;  %vm4520_vm11 = vmand %vm5509_vm15, %vm4097_vm0 }
 0x133   : > { %v5508_v50 = vmov 1.0|1.0   ;;  %v725_v14 = vmax.f32 %v711_v41, 0.0  ;;  %v5516_v41 = vmov 0  ;;  %vm1241_vm15 = vmand %vm1233_vm13, %vm3979_vm4  ;;  %vm5527_vm2 = vcmask 261120  }
 0x134   : > { %v716_v21 = vpop.f32.mrb[6].mxu0  ;;  %3155 = vmatprep.subr.bf16.mxu1 %v3154_v19  ;;  %3197 = vmatpush1.bf16.xpose.msk.msra.mxu0 %vm3196_vm7, %v5508_v50  ;;  %vm1235_vm6 = vcmp.eq.s32.totalorder %v1227_v33, %v3977_v52  ;;  %vm4534_vm7 = vmand %vm1559_vm14, %vm4097_vm0  ;;  %v5517_v41 = vsel %vm4540_vm8, 4294967295, %v5516_v41  ;;  %vm1730_vm14 = vcmp.eq.s32.totalorder %v1226_v8, %v4052_v15  ;;  %vm1732_vm9 = vcmp.eq.s32.totalorder %v1227_v33, %v4052_v15 }
 0x135   : > { %v717_v51 = vadd.f32 %v716_v21, %v617_v44  ;;  %v718_v22 = vpop.f32.mrb[7].mxu0  ;;  %3157 = vmatpush1.bf16.msra.mxu1 %v3156_v60  ;;  %v5510_v21 = vmov 0  ;;  %v5515_v11 = vsel %vm4534_vm7, 4294967295, %v5514_v11  ;;  %vm1243_vm7 = vmand %vm1235_vm6, %vm3979_vm4  ;;  %vm1232_vm6 = vcmp.eq.s32.totalorder %v1226_v8, %v3986_v56 }
 0x136   : > { %v719_v1 = vadd.f32 %v718_v22, %v617_v44  ;;  %v5511_v21 = vsel %vm4520_vm11, 4294967295, %v5510_v21  ;;  %v726_v22 = vmax.f32 %v713_v40, 0.0  ;;  %vm3198_vm0 = vmpackc.low %vm1243_vm7, %vm1241_vm15  ;;  %vm5519_vm11 = vnez %v5431_v2 }
 0x137   : > { %v727_v60 = vmax.f32 %v717_v51, 0.0  ;;  %3199 = vmatprep.subr.msk.bf16.mxu0 %vm3198_vm0, %v5508_v50  ;;  %vm4565_vm10 = vmand %vm1730_vm14, %vm5519_vm11  ;;  %v5520_v51 = vmov 0  ;;  %vm1234_vm0 = vcmp.eq.s32.totalorder %v1227_v33, %v3986_v56  ;;  %vm5524_vm14 = vnez %v5479_v6 }
 0x138   : > { %v728_v19 = vmax.f32 %v719_v1, 0.0  ;;  %v5521_v51 = vsel %vm4565_vm10, 4294967295, %v5520_v51  ;;  %v729_v1 = vld [vmem:[%s5297_s6] sm:$0xff]  ;;  %vm4575_vm15 = vmand %vm1732_vm9, %vm5519_vm11  ;;  %vm5526_vm9 = vnez %v5427_v61  ;;  %vm1729_vm11 = vcmp.eq.s32.totalorder %v1226_v8, %v4075_v18 }
 0x139   : > { %v3160_v44 = vpack.c.bf16 %v727_v60, %v725_v14  ;;  %v5522_v14 = vmov 0  ;;  %vm5525_vm13 = vmpackc.low %vm4374_vm5, %vm5524_vm14  ;;  %v1268_v60 = vadd.s32 160, %v3735_v13  ;;  %v5528_v6 = vmov 0.0  }
 0x13a   : > { %v3158_v40 = vpack.c.bf16 %v728_v19, %v726_v22  ;;  %v5523_v14 = vsel %vm4575_vm15, 4294967295, %v5522_v14  ;;  %vm1240_vm7 = vmand %vm1232_vm6, %vm5526_vm9  ;;  %v1269_v22 = vadd.s32 160, %v3990_v58  ;;  %vm5529_vm6 = vnez %v5437_v28  ;;  %v731_v19 = vld [vmem:[%s5297_s6 + $0x10] sm:$0xff] }
 0x13b   : > { %vm1242_vm5 = vmand %vm1234_vm0, %vm5526_vm9  ;;  %v5530_v8 = vmov 0  ;;  %vm5532_vm0 = vnez %v5515_v11  ;;  %vm5533_vm10 = vnez %v5517_v41  ;;  %v5555_v11 = vmov 0 }
 0x13c   : > { %3159 = vmatprep.subr.bf16.mxu1 %v3158_v40  ;;  %vm3200_vm14 = vmpackc.low %vm1242_vm5, %vm1240_vm7  ;;  %vm1275_vm7 = vcmp.eq.s32.totalorder %v1269_v22, %v3977_v52  ;;  %vm5536_vm5 = vcmask 261120   ;;  %vm1768_vm15 = vcmp.eq.s32.totalorder %v1269_v22, %v4052_v15  ;;  %v5550_v40 = vmov 0 }
 0x13d   : > { %3161 = vmatpush1.bf16.msra.mxu1 %v3160_v44  ;;  %3201 = vmatpush1.bf16.xpose.msk.msra.mxu0 %vm3200_vm14, %v5508_v50  ;;  %vm4606_vm8 = vmand %vm1729_vm11, %vm5529_vm6  ;;  %vm1766_vm14 = vcmp.eq.s32.totalorder %v1268_v60, %v4052_v15  ;;  %v1271_v44 = vadd.s32 160, %v4016_v26  ;;  %v1312_v41 = vadd.s32 192, %v3735_v13 }
 0x13e   : > { %3227 = vmatprep.subr.msk.bf16.mxu1 %vm5525_vm13, %v5508_v50  ;;  %vm1731_vm13 = vcmp.eq.s32.totalorder %v1227_v33, %v4075_v18  ;;  %v5531_v8 = vsel %vm4606_vm8, 4294967295, %v5530_v8  ;;  %v5534_v33 = vmov 0  ;;  %vm1283_vm11 = vmand %vm1275_vm7, %vm3979_vm4  ;;  %vm5538_vm8 = vnez %v5499_v9 }
 0x13f   : > { %vm4617_vm9 = vmand %vm1731_vm13, %vm5529_vm6  ;;  %vm5540_vm6 = vcmask 261120   ;;  %vm1272_vm7 = vcmp.eq.s32.totalorder %v1268_v60, %v3986_v56  ;;  %v1270_v9 = vadd.s32 160, %v4011_v63 }
 0x140   : > { %2868 = vmatmul.mubr.msk.f32.vlgmr.msra.gmra.mrb[0].mxu1 %vm5527_vm2, %v729_v1  ;;  %vm1273_vm2 = vcmp.eq.s32.totalorder %v1268_v60, %v3977_v52  ;;  %v5535_v33 = vsel %vm4617_vm9, 4294967295, %v5534_v33 }
 0x141   : > { %840 = vmatprep.mubr.f32.mxu1 %v5528_v6  ;;  %vm1281_vm13 = vmand %vm1273_vm2, %vm3979_vm4 }
 0x142   : > { %vm5539_vm2 = vmpackc.low %vm5518_vm3, %vm5538_vm8  ;;  %vm1274_vm3 = vcmp.eq.s32.totalorder %v1269_v22, %v3986_v56 }
 0x143   : > { %vm3202_vm9 = vmpackc.low %vm1283_vm11, %vm1281_vm13  ;;  %vm1765_vm13 = vcmp.eq.s32.totalorder %v1268_v60, %v4075_v18 }
 0x144   : > { %2869 = vmatmul.mubr.msk.f32.gmra.mrb[2].mxu1 %vm5536_vm5, %v730_v16  ;;  %vm5537_vm5 = vmpackc.low %vm4441_vm1, %vm4432_vm12  ;;  %3203 = vmatprep.subr.msk.bf16.mxu0 %vm3202_vm9, %v5508_v50  ;;  %vm5541_vm12 = vnez %v5431_v2 }
 0x145   : > { %846 = vmatprep.mubr.f32.mxu1 %v5528_v6  ;;  %vm4653_vm1 = vmand %vm1766_vm14, %vm5541_vm12 }
 0x146   : > { %3229 = vmatpush1.bf16.xpose.msk.msra.mxu1 %vm5537_vm5, %v5508_v50  ;;  %v5543_v0 = vsel %vm4653_vm1, 4294967295, %v5542_v0  ;;  %vm4664_vm8 = vmand %vm1768_vm15, %vm5541_vm12  ;;  %vm5547_vm15 = vcmask 261120   ;;  %vm1767_vm5 = vcmp.eq.s32.totalorder %v1269_v22, %v4075_v18 }
 0x147   : > { %3231 = vmatprep.subr.msk.bf16.mxu1 %vm5539_vm2, %v5508_v50  ;;  %v5545_v27 = vsel %vm4664_vm8, 4294967295, %v5544_v27  ;;  %vm5548_vm9 = vmpackc.low %vm5533_vm10, %vm5532_vm0  ;;  %vm1279_vm0 = vcmp.eq.s32.totalorder %v1271_v44, %v3977_v52 }
 0x148   : > { %2870 = vmatmul.mubr.msk.f32.gmra.mrb[4].mxu1 %vm5540_vm6, %v731_v19  ;;  %vm5546_vm6 = vnez %v5427_v61 }
 0x149   : > { %852 = vmatprep.mubr.f32.mxu1 %v5528_v6  ;;  %vm1280_vm11 = vmand %vm1272_vm7, %vm5546_vm6  ;;  %vm5549_vm7 = vnez %v5437_v28 }
 0x14a   : > { %vm1282_vm14 = vmand %vm1274_vm3, %vm5546_vm6  ;;  %vm1277_vm3 = vcmp.eq.s32.totalorder %v1270_v9, %v3977_v52 }
 0x14b   : > { %vm3204_vm2 = vmpackc.low %vm1282_vm14, %vm1280_vm11  ;;  %vm5552_vm11 = vnez %v5435_v20  ;;  %v5559_v20 = vmov 0 }
 0x14c   : > { %2871 = vmatmul.mubr.msk.f32.gmra.mrb[6].mxu1 %vm5547_vm15, %v732_v62  ;;  %3205 = vmatpush1.bf16.xpose.msk.msra.mxu0 %vm3204_vm2, %v5508_v50  ;;  %vm4691_vm1 = vmand %vm1765_vm13, %vm5549_vm7  ;;  %vm5553_vm15 = vnez %v5433_v17  ;;  %vm1770_vm2 = vcmp.eq.s32.totalorder %v1270_v9, %v4052_v15  ;;  %v5557_v17 = vmov 0 }
 0x14d   : > { %v5551_v40 = vsel %vm4691_vm1, 4294967295, %v5550_v40  ;;  %vm5554_vm14 = vmpackc.low %vm5552_vm11, %vm5553_vm15  ;;  %vm5565_vm1 = vnez %v5443_v23  ;;  %v5569_v23 = vmov 0 }
 0x14e   : > { %3233 = vmatpush1.bf16.xpose.msk.msra.mxu1 %vm5548_vm9, %v5508_v50  ;;  %vm4704_vm10 = vmand %vm1767_vm5, %vm5549_vm7  ;;  %vm1772_vm5 = vcmp.eq.s32.totalorder %v1271_v44, %v4052_v15  ;;  %vm1276_vm9 = vcmp.eq.s32.totalorder %v1270_v9, %v3986_v56 }
 0x14f   : > { %3235 = vmatprep.subr.msk.bf16.mxu1 %vm5554_vm14, %v5508_v50  ;;  %v5556_v11 = vsel %vm4704_vm10, 4294967295, %v5555_v11  ;;  %vm1285_vm13 = vmand %vm1277_vm3, %vm3979_vm4 }
 0x150   : > { %vm1287_vm11 = vmand %vm1279_vm0, %vm3979_vm4  ;;  %vm1278_vm0 = vcmp.eq.s32.totalorder %v1271_v44, %v3986_v56 }
 0x151   : > { %vm3206_vm15 = vmpackc.low %vm1287_vm11, %vm1285_vm13  ;;  %vm5561_vm13 = vnez %v5441_v12  ;;  %vm5562_vm11 = vnez %v5439_v30  ;;  %v1313_v30 = vadd.s32 192, %v3990_v58  ;;  %v5567_v12 = vmov 0 }
 0x152   : > { %3207 = vmatprep.subr.msk.bf16.mxu0 %vm3206_vm15, %v5508_v50  ;;  %vm4722_vm14 = vmand %vm1770_vm2, %vm5541_vm12 }
 0x153   : > { %v5558_v17 = vsel %vm4722_vm14, 4294967295, %v5557_v17  ;;  %vm4729_vm3 = vmand %vm1772_vm5, %vm5541_vm12  ;;  %vm5564_vm5 = vnez %v5445_v31  ;;  %v5577_v31 = vmov 0 }
 0x154   : > { %v5560_v20 = vsel %vm4729_vm3, 4294967295, %v5559_v20  ;;  %vm5563_vm15 = vmpackc.low %vm5561_vm13, %vm5562_vm11  ;;  %vm1769_vm13 = vcmp.eq.s32.totalorder %v1270_v9, %v4075_v18  ;;  %vm1808_vm3 = vcmp.eq.s32.totalorder %v1313_v30, %v4052_v15 }
 0x155   : > { %vm5566_vm10 = vmpackc.low %vm5564_vm5, %vm5565_vm1  ;;  %vm1317_vm1 = vcmp.eq.s32.totalorder %v1312_v41, %v3977_v52  ;;  %vm5571_vm5 = vnez %v5449_v35  ;;  %v4815_v35 = vadd.s32 192, %v4011_v63 }
 0x156   : > { %3237 = vmatpush1.bf16.xpose.msk.msra.mxu1 %vm5563_vm15, %v5508_v50  ;;  %vm1284_vm8 = vmand %vm1276_vm9, %vm5546_vm6  ;;  %vm1771_vm15 = vcmp.eq.s32.totalorder %v1271_v44, %v4075_v18  ;;  %vm1319_vm9 = vcmp.eq.s32.totalorder %v1313_v30, %v3977_v52 }
 0x157   : > { %3239 = vmatprep.subr.msk.bf16.mxu1 %vm5566_vm10, %v5508_v50  ;;  %vm1286_vm11 = vmand %vm1278_vm0, %vm5546_vm6 }
 0x158   : > { %vm3208_vm2 = vmpackc.low %vm1286_vm11, %vm1284_vm8  ;;  %vm5574_vm8 = vnez %v5453_v39  ;;  %v5585_v39 = vmov 0 }
 0x159   : > { %3209 = vmatpush1.bf16.xpose.msk.msra.mxu0 %vm3208_vm2, %v5508_v50  ;;  %vm4761_vm14 = vmand %vm1769_vm13, %vm5549_vm7  ;;  %vm1806_vm2 = vcmp.eq.s32.totalorder %v1312_v41, %v4052_v15  ;;  %vm5572_vm13 = vnez %v5447_v34 }
 0x15a   : > { %v5568_v12 = vsel %vm4761_vm14, 4294967295, %v5567_v12  ;;  %vm4768_vm10 = vmand %vm1771_vm15, %vm5549_vm7  ;;  %vm5575_vm14 = vnez %v5451_v37  ;;  %v4821_v37 = vadd.s32 192, %v4016_v26 }
 0x15b   : > { %v5570_v23 = vsel %vm4768_vm10, 4294967295, %v5569_v23  ;;  %vm1325_vm0 = vmand %vm1317_vm1, %vm3979_vm4 }
 0x15c   : > { %vm5573_vm11 = vmpackc.low %vm5571_vm5, %vm5572_vm13 }
 0x15d   : > { %vm1327_vm15 = vmand %vm1319_vm9, %vm3979_vm4  ;;  %vm1316_vm9 = vcmp.eq.s32.totalorder %v1312_v41, %v3986_v56 }
 0x15e   : > { %3241 = vmatpush1.bf16.xpose.msk.msra.mxu1 %vm5573_vm11, %v5508_v50  ;;  %vm5576_vm1 = vmpackc.low %vm5574_vm8, %vm5575_vm14  ;;  %vm1318_vm14 = vcmp.eq.s32.totalorder %v1313_v30, %v3986_v56  ;;  %vm5581_vm11 = vnez %v5457_v47  ;;  %v4875_v47 = vadd.s32 224, %v3735_v13 }
 0x15f   : > { %3243 = vmatprep.subr.msk.bf16.mxu1 %vm5576_vm1, %v5508_v50  ;;  %vm3210_vm10 = vmpackc.low %vm1327_vm15, %vm1325_vm0  ;;  %vm1805_vm0 = vcmp.eq.s32.totalorder %v1312_v41, %v4075_v18  ;;  %vm5582_vm15 = vnez %v5455_v45  ;;  %v5590_v45 = vmov 0 }
 0x160   : > { %3211 = vmatprep.subr.msk.bf16.mxu0 %vm3210_vm10, %v5508_v50  ;;  %vm4798_vm7 = vmand %vm1806_vm2, %vm5541_vm12  ;;  %vm1807_vm2 = vcmp.eq.s32.totalorder %v1313_v30, %v4075_v18 }
 0x161   : > { %v5578_v31 = vsel %vm4798_vm7, 4294967295, %v5577_v31  ;;  %vm4805_vm5 = vmand %vm1808_vm3, %vm5541_vm12 }
 0x162   : > { %vm1324_vm8 = vmand %vm1316_vm9, %vm5546_vm6  ;;  %vm5584_vm9 = vnez %v5437_v28 }
 0x163   : > { %vm1326_vm3 = vmand %vm1318_vm14, %vm5546_vm6  ;;  %vm1321_vm14 = vcmp.eq.s32.totalorder %v4815_v35, %v3977_v52 }
 0x164   : > { %vm3212_vm13 = vmpackc.low %vm1326_vm3, %vm1324_vm8  ;;  %vm5587_vm8 = vnez %v5461_v49  ;;  %vm5588_vm3 = vnez %v5459_v48  ;;  %v4888_v48 = vadd.s32 224, %v3990_v58  ;;  %v2223_v58 = vsub.s32 3, %v3735_v13 }
 0x165   : > { %vm5583_vm1 = vmpackc.low %vm5581_vm11, %vm5582_vm15  ;;  %3213 = vmatpush1.bf16.xpose.msk.msra.mxu0 %vm3212_vm13, %v5508_v50  ;;  %vm5593_vm13 = vnez %v5463_v54  ;;  %v1358_v54 = vadd.s32 224, %v4011_v63 }
 0x166   : > { %3245 = vmatpush1.bf16.xpose.msk.msra.mxu1 %vm5583_vm1, %v5508_v50  ;;  %vm4835_vm10 = vmand %vm1805_vm0, %vm5584_vm9  ;;  %vm1323_vm0 = vcmp.eq.s32.totalorder %v4821_v37, %v3977_v52 }
 0x167   : > { %v5586_v39 = vsel %vm4835_vm10, 4294967295, %v5585_v39  ;;  %vm5589_vm12 = vmpackc.low %vm5587_vm8, %vm5588_vm3  ;;  %vm1322_vm8 = vcmp.eq.s32.totalorder %v4821_v37, %v3986_v56  ;;  %vm5592_vm3 = vnez %v5465_v55  ;;  %v1359_v55 = vadd.s32 224, %v4016_v26  ;;  %v745_v26 = vpop.permute.xlu1 %744 }
 0x168   : > { %3247 = vmatprep.subr.msk.bf16.mxu1 %vm5589_vm12, %v5508_v50  ;;  %vm4849_vm11 = vmand %vm1807_vm2, %vm5584_vm9  ;;  %vm1320_vm2 = vcmp.eq.s32.totalorder %v4815_v35, %v3986_v56 }
 0x169   : > { %v5591_v45 = vsel %vm4849_vm11, 4294967295, %v5590_v45  ;;  %vm1329_vm15 = vmand %vm1321_vm14, %vm3979_vm4  ;;  %vm5595_vm14 = vnez %v5469_v59  ;;  %vm5606_vm11 = vnez %v5475_v5 }
 0x16a   : > { %vm1331_vm12 = vmand %vm1323_vm0, %vm3979_vm4  ;;  %vm5596_vm0 = vnez %v5467_v57 }
 0x16b   : > { %vm3214_vm1 = vmpackc.low %vm1331_vm12, %vm1329_vm15 }
 0x16c   : > { %3215 = vmatprep.subr.msk.bf16.mxu0 %vm3214_vm1, %v5508_v50  ;;  %vm5594_vm10 = vmpackc.low %vm5592_vm3, %vm5593_vm13  ;;  %vm1809_vm1 = vcmp.eq.s32.totalorder %v4815_v35, %v4075_v18  ;;  %vm1811_vm13 = vcmp.eq.s32.totalorder %v4821_v37, %v4075_v18 }
 0x16d   : > { %vm5597_vm15 = vmpackc.low %vm5595_vm14, %vm5596_vm0 }
 0x16e   : > { %3249 = vmatpush1.bf16.xpose.msk.msra.mxu1 %vm5594_vm10, %v5508_v50  ;;  %vm1328_vm12 = vmand %vm1320_vm2, %vm5546_vm6  ;;  %vm1361_vm2 = vcmp.eq.s32.totalorder %v4875_v47, %v3977_v52 }
 0x16f   : > { %3251 = vmatprep.subr.msk.bf16.mxu1 %vm5597_vm15, %v5508_v50  ;;  %vm1330_vm10 = vmand %vm1322_vm8, %vm5546_vm6  ;;  %vm1363_vm8 = vcmp.eq.s32.totalorder %v4888_v48, %v3977_v52 }
 0x170   : > { %vm3216_vm3 = vmpackc.low %vm1330_vm10, %vm1328_vm12  ;;  %vm5603_vm10 = vnez %v5471_v3 }
 0x171   : > { %3217 = vmatpush1.bf16.xpose.msk.msra.mxu0 %vm3216_vm3, %v5508_v50  ;;  %vm4897_vm14 = vmand %vm1809_vm1, %vm5584_vm9  ;;  %vm5602_vm1 = vnez %v5473_v4 }
 0x172   : > { %vm4905_vm0 = vmand %vm1811_vm13, %vm5584_vm9  ;;  %vm5605_vm9 = vnez %v5477_v7 }
 0x173   : > { %vm1369_vm12 = vmand %vm1361_vm2, %vm3979_vm4  ;;  %vm1360_vm2 = vcmp.eq.s32.totalorder %v4875_v47, %v3986_v56 }
 0x174   : > { %vm5604_vm13 = vmpackc.low %vm5602_vm1, %vm5603_vm10  ;;  %vm1362_vm1 = vcmp.eq.s32.totalorder %v4888_v48, %v3986_v56  ;;  %vm1365_vm10 = vcmp.eq.s32.totalorder %v1358_v54, %v3977_v52 }
 0x175   : > { %vm1371_vm3 = vmand %vm1363_vm8, %vm3979_vm4 }
 0x176   : > { %3253 = vmatpush1.bf16.xpose.msk.msra.mxu1 %vm5604_vm13, %v5508_v50  ;;  %vm5607_vm7 = vmpackc.low %vm5605_vm9, %vm5606_vm11  ;;  %vm5608_vm11 = vnez %v5485_v32  ;;  %vm5611_vm13 = vnez %v5505_v36  ;;  %v755_v36 = vpop.permute.xlu1 %754 }
 0x177   : > { %3255 = vmatprep.subr.msk.bf16.mxu1 %vm5607_vm7, %v5508_v50  ;;  %vm3218_vm15 = vmpackc.low %vm1371_vm3, %vm1369_vm12  ;;  %vm5612_vm3 = vnez %v5496_v43 }
 0x178   : > { %3219 = vmatprep.subr.msk.bf16.mxu0 %vm3218_vm15, %v5508_v50  ;;  %vm1368_vm8 = vmand %vm1360_vm2, %vm5546_vm6  ;;  %vm5609_vm15 = vnez %v5483_v25 }
 0x179   : > { %vm1370_vm9 = vmand %vm1362_vm1, %vm5546_vm6  ;;  %vm1367_vm1 = vcmp.eq.s32.totalorder %v1359_v55, %v3977_v52  ;;  %v740_v52 = vpop.permute.xlu0 %739 }
 0x17a   : > { %vm3220_vm7 = vmpackc.low %vm1370_vm9, %vm1368_vm8 }
 0x17b   : > { %vm5610_vm12 = vmpackc.low %vm5608_vm11, %vm5609_vm15  ;;  %3221 = vmatpush1.bf16.xpose.msk.msra.mxu0 %vm3220_vm7, %v5508_v50  ;;  %vm5614_vm7 = vnez %v5513_v46  ;;  %vm5615_vm15 = vnez %v5511_v21 }
 0x17c   : > { %vm5613_vm2 = vmpackc.low %vm5611_vm13, %vm5612_vm3  ;;  %vm5617_vm13 = vnez %v5523_v14  ;;  %vm5618_vm3 = vnez %v5521_v51 }
 0x17d   : > { %vm1373_vm8 = vmand %vm1365_vm10, %vm3979_vm4  ;;  %vm5621_vm10 = vnez %v5531_v8  ;;  %v3411_v8 = vld [vmem:[%s3710_s29] sm:$0x77]  ;;  %s5081_s29 = sand.u32 1, %s3517_s26  }
 0x17e   : > { %3257 = vmatpush1.bf16.xpose.msk.msra.mxu1 %vm5610_vm12, %v5508_v50  ;;  %vm1375_vm9 = vmand %vm1367_vm1, %vm3979_vm4  ;;  %vm5620_vm4 = vnez %v5535_v33  ;;  %s3322_s18 = smul.u32 160, %s5081_s29  ;;  %s2854_s28 = sshll.u32 %s5081_s29, 4 }
 0x17f   : > { %3259 = vmatprep.subr.msk.bf16.mxu1 %vm5613_vm2, %v5508_v50  ;;  %vm3222_vm11 = vmpackc.low %vm1375_vm9, %vm1373_vm8  ;;  %vm5623_vm8 = vnez %v5545_v27  ;;  %vm5624_vm9 = vnez %v5543_v0  ;;  %s486_s1 = scalar_lea.vmem [#allocation8], %s2854_s28  ;;  %s2689_s30 = scalar_lea.sflag [#allocation9], %s5081_s29 }
 0x180   : > { %3223 = vmatprep.subr.msk.bf16.mxu0 %vm3222_vm11, %v5508_v50  ;;  %vm5616_vm12 = vmpackc.low %vm5614_vm7, %vm5615_vm15  ;;  %vm1364_vm7 = vcmp.eq.s32.totalorder %v1358_v54, %v3986_v56  ;;  %vm1366_vm15 = vcmp.eq.s32.totalorder %v1359_v55, %v3986_v56  ;;  %s5091_s13 = scalar_lea.vmem [#allocation7], %s3322_s18  ;;  %s5677_s18 = sld [smem:[#allocation30_spill]] }
 0x181   : > { %vm5619_vm2 = vmpackc.low %vm5617_vm13, %vm5618_vm3  ;;  %s2718_s23 = sshll.u32 %s486_s1, 4  ;;  %s5199_s23 = int_to_ptr.vmem [resolvable:$true] %s2718_s23 }
 0x182   : > { %vm5622_vm1 = vmpackc.low %vm5620_vm4, %vm5621_vm10  ;;  %vm5627_vm4 = vnez %v5551_v40  ;;  %s3427_s17 = scalar_lea.vmem %s5199_s23, 256  ;;  %p3434_p13 = scmp.lt.s32.totalorder %s5199_s23, %s3432_s20 }
 0x183   : > { %vm5625_vm11 = vmpackc.low %vm5623_vm8, %vm5624_vm9  ;;  %vm5630_vm8 = vnez %v5558_v17  ;;  %p3428_p9 = scmp.ne.s32.totalorder %s5199_s23, %s3427_s17  ;;  %p3435_p0 = scmp.lt.s32.totalorder %s3433_s22, %s3427_s17 }
 0x184   : > { %vm1374_vm13 = vmand %vm1366_vm15, %vm5546_vm6 }
 0x185   : > { %p3429_p10 = pnand %p3428_p9, %p3645_p5  ;;  %p3436_p1 = por %p3435_p0, %p3434_p13 }
 0x186   : > { %3261 = vmatpush1.bf16.xpose.msk.msra.mxu1 %vm5616_vm12, %v5508_v50  ;;  %vm1372_vm12 = vmand %vm1364_vm7, %vm5546_vm6  ;;  %vm1810_vm6 = vcmp.eq.s32.totalorder %v4815_v35, %v4052_v15  ;;  %vm5633_vm7 = vnez %v5568_v12  ;;  %s5197_s24 = scalar_lea.hbm %s5677_s18, %s3021_s0 }
 0x187   : > { %3263 = vmatprep.subr.msk.bf16.mxu1 %vm5619_vm2, %v5508_v50  ;;  %vm3224_vm3 = vmpackc.low %vm1374_vm13, %vm1372_vm12  ;;  %vm5626_vm2 = vnez %v5556_v11  ;;  %vm1812_vm12 = vcmp.eq.s32.totalorder %v4821_v37, %v4052_v15  ;;  %vm5635_vm13 = vnez %v5578_v31  ;;  %p3430_p12 = pneg %p3429_p10 }
 0x188   : > { %3225 = vmatpush1.bf16.xpose.msk.msra.mxu0 %vm3224_vm3, %v5508_v50  ;;  %vm5628_vm10 = vmpackc.low %vm5626_vm2, %vm5627_vm4  ;;  %vm5637_vm2 = vnez %v5431_v2 }
 0x189   : > { %vm5636_vm3 = vmpackc.low %vm4805_vm5, %vm5635_vm13  ;;  %vm1848_vm5 = vcmp.eq.s32.totalorder %v4888_v48, %v4052_v15  ;;  %p3437_p2 = pnand %p3436_p1, %p3430_p12 }
 0x18a   : > { %vm1818_vm4 = vmand %vm1810_vm6, %vm5637_vm2 }
 0x18e   : > { %3265 = vmatpush1.bf16.xpose.msk.msra.mxu1 %vm5622_vm1, %v5508_v50  ;;  %vm5629_vm1 = vnez %v5560_v20 }
 0x18f   : > { %3267 = vmatprep.subr.msk.bf16.mxu1 %vm5625_vm11, %v5508_v50  ;;  %vm5631_vm9 = vmpackc.low %vm5629_vm1, %vm5630_vm8  ;;  %vm5632_vm11 = vnez %v5570_v23  ;;  %vm1846_vm8 = vcmp.eq.s32.totalorder %v4875_v47, %v4052_v15 }
 0x190   : > { %vm5634_vm15 = vmpackc.low %vm5632_vm11, %vm5633_vm7  ;;  %vm5639_vm11 = vnez %v5586_v39 }
 0x191   : > { %vm1854_vm6 = vmand %vm1846_vm8, %vm5637_vm2 }
 0x196   : > { %3269 = vmatpush1.bf16.xpose.msk.msra.mxu1 %vm5628_vm10, %v5508_v50  ;;  %vm1820_vm10 = vmand %vm1812_vm12, %vm5637_vm2  ;;  %vm1845_vm12 = vcmp.eq.s32.totalorder %v4875_v47, %v4075_v18 }
 0x197   : > { %3271 = vmatprep.subr.msk.bf16.mxu1 %vm5631_vm9, %v5508_v50  ;;  %vm3278_vm1 = vmpackc.low %vm1820_vm10, %vm1818_vm4  ;;  %vm5638_vm9 = vnez %v5591_v45  ;;  %vm1850_vm4 = vcmp.eq.s32.totalorder %v1358_v54, %v4052_v15 }
 0x198   : > { %vm5640_vm7 = vmpackc.low %vm5638_vm9, %vm5639_vm11  ;;  %vm1852_vm9 = vcmp.eq.s32.totalorder %v1359_v55, %v4052_v15 }
 0x199   : > { %vm5641_vm10 = vmpackc.low %vm4905_vm0, %vm4897_vm14  ;;  %vm1849_vm14 = vcmp.eq.s32.totalorder %v1358_v54, %v4075_v18  ;;  %vm1851_vm0 = vcmp.eq.s32.totalorder %v1359_v55, %v4075_v18 }
 0x19e   : > { %3273 = vmatpush1.bf16.xpose.msk.msra.mxu1 %vm5634_vm15, %v5508_v50  ;;  %vm1856_vm15 = vmand %vm1848_vm5, %vm5637_vm2 }
 0x19f   : > { %3275 = vmatprep.subr.msk.bf16.mxu1 %vm5636_vm3, %v5508_v50  ;;  %vm3282_vm13 = vmpackc.low %vm1856_vm15, %vm1854_vm6  ;;  %vm1847_vm3 = vcmp.eq.s32.totalorder %v4888_v48, %v4075_v18 }
 0x1a0   : > { %vm1860_vm5 = vmand %vm1852_vm9, %vm5637_vm2 }
 0x1a6   : > { %3277 = vmatpush1.bf16.xpose.msk.msra.mxu1 %vm5640_vm7, %v5508_v50  ;;  %vm1858_vm7 = vmand %vm1850_vm4, %vm5637_vm2  ;;  %vm5643_vm2 = vcmask 1042432   ;;  %vm878_vm4 = vcmask 1043456  }
 0x1a7   : > { %3279 = vmatprep.subr.msk.bf16.mxu1 %vm3278_vm1, %v5508_v50  ;;  %vm5642_vm1 = vnez %v5437_v28  ;;  %vm3286_vm15 = vmpackc.low %vm1860_vm5, %vm1858_vm7  ;;  %v750_v28 = vpop.permute.xlu0 %749  ;;  %v877_v16 = vsel %vm5643_vm2, %v3765_v24, 1.0 }
 0x1a8   : > { %vm1853_vm8 = vmand %vm1845_vm12, %vm5642_vm1 }
 0x1a9   : > { %vm1855_vm11 = vmand %vm1847_vm3, %vm5642_vm1 }
 0x1aa   : > { %vm3284_vm6 = vmpackc.low %vm1855_vm11, %vm1853_vm8 }
 0x1ab   : > { %vm1857_vm12 = vmand %vm1849_vm14, %vm5642_vm1 }
 0x1ae   : > { %3281 = vmatpush1.bf16.xpose.msk.msra.mxu1 %vm5641_vm10, %v5508_v50  ;;  %vm5644_vm10 = vmmov %vm5643_vm2 }
 0x1af   : > { %3283 = vmatprep.subr.msk.bf16.mxu1 %vm3282_vm13, %v5508_v50  ;;  %vm1859_vm13 = vmand %vm1851_vm0, %vm5642_vm1  ;;  %v876_v33 = vsel %vm5644_vm10, %v3411_v8, 1.0  ;;  %vm5645_vm1 = vcmask 261120  }
 0x1b0   : > { %vm3288_vm3 = vmpackc.low %vm1859_vm13, %vm1857_vm12  ;;  %vm5655_vm12 = vnez %v5422_v42  ;;  %vm5656_vm13 = vnez %v5429_v10  ;;  %v5658_v42 = vld [vmem:[#allocation23_spill] sm:$0xff] }
 0x1b1   : > { %vm5646_vm8 = vmmov %vm5645_vm1  ;;  %v981_v10 = vrot.slane %v5658_v42, %v3776_v29 }
 0x1b2   : > { %vm5647_vm9 = vmmov %vm5645_vm1 }
 0x1b3   : > { %vm5648_vm11 = vmmov %vm5645_vm1 }
 0x1b4   : > { %vm5649_vm7 = vmmov %vm5645_vm1 }
 0x1b5   : > { %vm5650_vm5 = vmmov %vm5645_vm1 }
 0x1b6   : > { %3285 = vmatpush1.bf16.xpose.msk.msra.mxu1 %vm3284_vm6, %v5508_v50  ;;  %vm5651_vm6 = vmmov %vm5645_vm1 }
 0x1b7   : > { %3287 = vmatprep.subr.msk.bf16.mxu1 %vm3286_vm15, %v5508_v50  ;;  %vm5652_vm15 = vmmov %vm5645_vm1 }
 0x1b8   : > { %vm5653_vm14 = vmmov %vm5645_vm1 }
 0x1b9   : > { %vm5654_vm0 = vmmov %vm5645_vm1 }
 0x1be   : > { %3289 = vmatpush1.bf16.xpose.msk.msra.mxu1 %vm3288_vm3, %v5508_v50  ;;  %vm5661_vm3 = vcmask 1040384  }
 0x1bf   : > { %vm5662_vm2 = vmmov %vm5661_vm3 }
 0x213   : > { %v836_v53 = vpop.f32.mrb[0].mxu1 }
 0x214   : > { %v837_v56 = vadd.f32 %v836_v53, %v740_v52  ;;  %v838_v61 = vpop.f32.mrb[1].mxu1 }
 0x215   : > { %v839_v63 = vadd.f32 %v838_v61, %v740_v52 }
 0x216   : > { %v859_v18 = vmax.f32 %v837_v56, 0.0 }
 0x217   : > { %v860_v15 = vmax.f32 %v839_v63, 0.0  ;;  %v842_v2 = vpop.f32.mrb[2].mxu1 }
 0x218   : > { %v843_v57 = vadd.f32 %v842_v2, %v745_v26  ;;  %v844_v59 = vpop.f32.mrb[3].mxu1 }
 0x219   : > { %v845_v3 = vadd.f32 %v844_v59, %v745_v26  ;;  %2087 = vmatprep.mubr.f32.mxu0 %v860_v15  ;;  %2182 = vmatprep.mubr.f32.mxu1 %v860_v15 }
 0x21a   : > { %2088 = vmatmul.mubr.f32.vlgmr.msra.gmra.mrb[8].mxu0 %v859_v18  ;;  %2183 = vmatmul.mubr.f32.vlgmr.msra.gmra.mrb[8].mxu1 %v859_v18  ;;  %v861_v7 = vmax.f32 %v843_v57, 0.0 }
 0x21b   : > { %v862_v4 = vmax.f32 %v845_v3, 0.0  ;;  %v848_v5 = vpop.f32.mrb[4].mxu1 }
 0x21c   : > { %v849_v25 = vadd.f32 %v848_v5, %v750_v28  ;;  %v850_v32 = vpop.f32.mrb[5].mxu1 }
 0x21d   : > { %v851_v43 = vadd.f32 %v850_v32, %v750_v28  ;;  %2093 = vmatprep.mubr.f32.mxu0 %v862_v4  ;;  %2188 = vmatprep.mubr.f32.mxu1 %v862_v4 }
 0x21e   : > { %2094 = vmatmul.mubr.f32.gmra.mrb[10].mxu0 %v861_v7  ;;  %2189 = vmatmul.mubr.f32.gmra.mrb[10].mxu1 %v861_v7  ;;  %v863_v46 = vmax.f32 %v849_v25, 0.0 }
 0x21f   : > { %v864_v50 = vmax.f32 %v851_v43, 0.0  ;;  %v854_v21 = vpop.f32.mrb[6].mxu1 }
 0x220   : > { %v855_v51 = vadd.f32 %v854_v21, %v755_v36  ;;  %v856_v1 = vpop.f32.mrb[7].mxu1 }
 0x221   : > { %v857_v14 = vadd.f32 %v856_v1, %v755_v36  ;;  %2099 = vmatprep.mubr.f32.mxu0 %v864_v50  ;;  %2194 = vmatprep.mubr.f32.mxu1 %v864_v50 }
 0x222   : > { %2100 = vmatmul.mubr.f32.gmra.mrb[12].mxu0 %v863_v46  ;;  %2195 = vmatmul.mubr.f32.gmra.mrb[12].mxu1 %v863_v46  ;;  %v865_v22 = vmax.f32 %v855_v51, 0.0 }
 0x223   : > { %v866_v60 = vmax.f32 %v857_v14, 0.0 }
 0x225   : > { %2105 = vmatprep.mubr.f32.mxu0 %v866_v60  ;;  %2200 = vmatprep.mubr.f32.mxu1 %v866_v60 }
 0x226   : > { %2106 = vmatmul.mubr.f32.gmra.mrb[14].mxu0 %v865_v22  ;;  %2201 = vmatmul.mubr.f32.gmra.mrb[14].mxu1 %v865_v22 }
 0x227   : > { %3086 = vmatprep.mubr.msk.f32.mxu0 %vm878_vm4, %v877_v16  ;;  %3152 = vmatprep.mubr.msk.f32.mxu1 %vm878_vm4, %v877_v16 }
 0x22a   : > { %3087 = vmatmul.mubr.msk.f32.gmra.mrb[16].mxu0 %vm878_vm4, %v876_v33  ;;  %3153 = vmatmul.mubr.msk.f32.gmra.mrb[16].mxu1 %vm878_vm4, %v876_v33  ;;  %vm5665_vm4 = vcmask 1041408  }
 0x22b   : > { %2361 = vmatprep.mubr.f32.mxu0 %v5528_v6  ;;  %2450 = vmatprep.mubr.f32.mxu1 %v5528_v6  ;;  %vm5666_vm10 = vmmov %vm5665_vm4 }
 0x2ed   : > { %v2089_v19 = vpop.f32.mrb[8].mxu0  ;;  %v2184_v0 = vpop.f32.mrb[8].mxu1 }
 0x2ee   : > { %v2091_v62 = vpop.f32.mrb[9].mxu0  ;;  %v2186_v24 = vpop.f32.mrb[9].mxu1 }
 0x2f1   : > { %v2095_v27 = vpop.f32.mrb[10].mxu0  ;;  %v2190_v9 = vpop.f32.mrb[10].mxu1 }
 0x2f2   : > { %v2097_v44 = vpop.f32.mrb[11].mxu0  ;;  %v2192_v40 = vpop.f32.mrb[11].mxu1 }
 0x2f5   : > { %v2101_v11 = vpop.f32.mrb[12].mxu0  ;;  %v5076_v17 = vpop.f32.mrb[12].mxu1 }
 0x2f6   : > { %v2103_v20 = vpop.f32.mrb[13].mxu0  ;;  %v2198_v41 = vpop.f32.mrb[13].mxu1 }
 0x2f9   : > { %v2107_v30 = vpop.f32.mrb[14].mxu0  ;;  %v5078_v12 = vpop.f32.mrb[14].mxu1 }
 0x2fa   : > { %v2109_v23 = vpop.f32.mrb[15].mxu0  ;;  %v2204_v31 = vpop.f32.mrb[15].mxu1 }
 0x2fd   : > { %v2113_v34 = vpop.f32.mrb[16].mxu0  ;;  %v2208_v35 = vpop.f32.mrb[16].mxu1 }
 0x2fe   : > { %v2213_v37 = vmax.f32 %v2113_v34, 1.0  ;;  %v2215_v39 = vmax.f32 %v2208_v35, 1.0  ;;  %v2115_v45 = vpop.f32.mrb[17].mxu0  ;;  %v2210_v47 = vpop.f32.mrb[17].mxu1 }
 0x2ff   : > { %v2214_v48 = vmax.f32 %v2115_v45, 1.0  ;;  %v2216_v49 = vmax.f32 %v2210_v47, 1.0 }
 0x300   : > { %3403 = vrcp.f32 %v2213_v37 }
 0x301   : > { %3405 = vrcp.f32 %v2215_v39 }
 0x302   : > { %3407 = vrcp.f32 %v2214_v48 }
 0x303   : > { %3409 = vrcp.f32 %v2216_v49 }
 0x30a   : > { %v3404_v54 = vpop.eup %3403 }
 0x30b   : > { %v3406_v55 = vpop.eup %3405  ;;  %v2224_v52 = vrot.slane %v3404_v54, %v2223_v58 }
 0x30c   : > { %v3408_v53 = vpop.eup %3407  ;;  %v2232_v56 = vrot.slane %v3406_v55, %v2223_v58 }
 0x30d   : > { %v3410_v61 = vpop.eup %3409  ;;  %v5085_v63 = vmul.f32 %v2224_v52, %v2113_v34  ;;  %v2228_v26 = vrot.slane %v3408_v53, %v2223_v58  ;;  %v2237_v15 = vmul.f32 %v2224_v52, %v2089_v19  ;;  %v2241_v2 = vmul.f32 %v2224_v52, %v2095_v27  ;;  %v2259_v27 = vld [vmem:[%s5299_s8 + $0x10] sm:$0xff] }
 0x30e   : > { %v5087_v18 = vmul.f32 %v2232_v56, %v2208_v35  ;;  %v2236_v57 = vrot.slane %v3410_v61, %v2223_v58  ;;  %v2239_v59 = vmul.f32 %v2232_v56, %v2184_v0  ;;  %v2243_v3 = vmul.f32 %v2232_v56, %v2190_v9  ;;  %v2260_v9 = vld [vmem:[%s5299_s8 + $0x18] sm:$0xff] }
 0x30f   : > { %v5089_v28 = vmul.f32 %v2228_v26, %v2115_v45  ;;  %v2238_v13 = vmul.f32 %v2228_v26, %v2091_v62  ;;  %v2242_v4 = vmul.f32 %v2228_v26, %v2097_v44  ;;  %2667 = vst [vmem:[%s5091_s13 + $0x20] sm:$0xff] %v2237_v15  ;;  %2671 = vst [vmem:[%s5091_s13 + $0x40] sm:$0xff] %v2241_v2  ;;  %v2257_v62 = vld [vmem:[%s5299_s8] sm:$0xff] }
 0x310   : > { %v5095_v5 = vmul.f32 %v2236_v57, %v2210_v47  ;;  %v2240_v7 = vmul.f32 %v2236_v57, %v2186_v24  ;;  %v2244_v25 = vmul.f32 %v2236_v57, %v2192_v40  ;;  %2669 = vst [vmem:[%s5091_s13 + $0x30] sm:$0xff] %v2239_v59  ;;  %2673 = vst [vmem:[%s5091_s13 + $0x50] sm:$0xff] %v2243_v3  ;;  %v2258_v24 = vld [vmem:[%s5299_s8 + $0x8] sm:$0xff] }
 0x311   : > { %v3290_v32 = vpack.c.bf16 %v2242_v4, %v2238_v13  ;;  %2668 = vst [vmem:[%s5091_s13 + $0x28] sm:$0xff] %v2238_v13  ;;  %2672 = vst [vmem:[%s5091_s13 + $0x48] sm:$0xff] %v2242_v4  ;;  %v3292_v43 = vpack.c.bf16 %v2241_v2, %v2237_v15  ;;  %v3300_v36 = vpack.c.bf16 %v2243_v3, %v2239_v59 }
 0x312   : > { %v3298_v50 = vpack.c.bf16 %v2244_v25, %v2240_v7  ;;  %2670 = vst [vmem:[%s5091_s13 + $0x38] sm:$0xff] %v2240_v7  ;;  %2674 = vst [vmem:[%s5091_s13 + $0x58] sm:$0xff] %v2244_v25  ;;  %v2246_v21 = vmul.f32 %v2228_v26, %v2103_v20  ;;  %v2250_v46 = vmul.f32 %v2228_v26, %v2109_v23 }
 0x313   : > { %3291 = vmatprep.subr.bf16.mxu0 %v3290_v32  ;;  %v2248_v51 = vmul.f32 %v2236_v57, %v2198_v41  ;;  %v2252_v1 = vmul.f32 %v2236_v57, %v2204_v31  ;;  %v2245_v14 = vmul.f32 %v2224_v52, %v2101_v11  ;;  %v2249_v60 = vmul.f32 %v2224_v52, %v2107_v30  ;;  %v2273_v30 = vpop.permute.xlu1 %2272 }
 0x314   : > { %3299 = vmatprep.subr.bf16.mxu1 %v3298_v50  ;;  %3293 = vmatpush1.bf16.msra.mxu0 %v3292_v43  ;;  %v3294_v22 = vpack.c.bf16 %v2250_v46, %v2246_v21  ;;  %2676 = vst [vmem:[%s5091_s13 + $0x68] sm:$0xff] %v2246_v21  ;;  %2680 = vst [vmem:[%s5091_s13 + $0x88] sm:$0xff] %v2250_v46  ;;  %v2247_v16 = vmul.f32 %v2232_v56, %v5076_v17  ;;  %v2268_v17 = vpop.permute.xlu0 %2267 }
 0x315   : > { %v2251_v8 = vmul.f32 %v2232_v56, %v5078_v12  ;;  %3301 = vmatpush1.bf16.msra.mxu1 %v3300_v36  ;;  %v3302_v33 = vpack.c.bf16 %v2252_v1, %v2248_v51  ;;  %2678 = vst [vmem:[%s5091_s13 + $0x78] sm:$0xff] %v2248_v51  ;;  %2682 = vst [vmem:[%s5091_s13 + $0x98] sm:$0xff] %v2252_v1  ;;  %v3296_v19 = vpack.c.bf16 %v2249_v60, %v2245_v14 }
 0x316   : > { %2675 = vst [vmem:[%s5091_s13 + $0x60] sm:$0xff] %v2245_v14  ;;  %2679 = vst [vmem:[%s5091_s13 + $0x80] sm:$0xff] %v2249_v60  ;;  %3295 = vmatprep.subr.bf16.mxu0 %v3294_v22 }
 0x317   : > { %v3304_v0 = vpack.c.bf16 %v2251_v8, %v2247_v16  ;;  %2677 = vst [vmem:[%s5091_s13 + $0x70] sm:$0xff] %v2247_v16  ;;  %2681 = vst [vmem:[%s5091_s13 + $0x90] sm:$0xff] %v2251_v8  ;;  %3303 = vmatprep.subr.bf16.mxu1 %v3302_v33  ;;  %v2283_v43 = vpop.permute.xlu1 %2282 }
 0x318   : > { %3297 = vmatpush1.bf16.msra.mxu0 %v3296_v19  ;;  %v2278_v3 = vpop.permute.xlu0 %2277 }
 0x319   : > { %3305 = vmatpush1.bf16.msra.mxu1 %v3304_v0 }
 0x31b   : > { %3003 = vmatmul.mubr.msk.f32.vlgmr.msra.gmra.mrb[18].mxu0 %vm5645_vm1, %v2257_v62  ;;  %vm5668_vm1 = vcmask 1042432  }
 0x31c   : > { %3007 = vmatmul.mubr.msk.f32.vlgmr.msra.gmra.mrb[18].mxu1 %vm5646_vm8, %v2257_v62  ;;  %2367 = vmatprep.mubr.f32.mxu0 %v5528_v6  ;;  %vm5669_vm8 = vmmov %vm5668_vm1 }
 0x31d   : > { %2456 = vmatprep.mubr.f32.mxu1 %v5528_v6 }
 0x31f   : > { %3004 = vmatmul.mubr.msk.f32.gmra.mrb[20].mxu0 %vm5647_vm9, %v2258_v24  ;;  %vm5670_vm9 = vmmov %vm5662_vm2 }
 0x320   : > { %3008 = vmatmul.mubr.msk.f32.gmra.mrb[20].mxu1 %vm5648_vm11, %v2258_v24  ;;  %2373 = vmatprep.mubr.f32.mxu0 %v5528_v6  ;;  %vm5671_vm11 = vmmov %vm5662_vm2 }
 0x321   : > { %2462 = vmatprep.mubr.f32.mxu1 %v5528_v6 }
 0x323   : > { %3005 = vmatmul.mubr.msk.f32.gmra.mrb[22].mxu0 %vm5649_vm7, %v2259_v27  ;;  %vm5672_vm7 = vmmov %vm5665_vm4 }
 0x324   : > { %3009 = vmatmul.mubr.msk.f32.gmra.mrb[22].mxu1 %vm5650_vm5, %v2259_v27  ;;  %2379 = vmatprep.mubr.f32.mxu0 %v5528_v6  ;;  %vm5674_vm5 = vmmov %vm5665_vm4 }
 0x325   : > { %2468 = vmatprep.mubr.f32.mxu1 %v5528_v6 }
 0x327   : > { %3006 = vmatmul.mubr.msk.f32.gmra.mrb[24].mxu0 %vm5651_vm6, %v2260_v9  ;;  %vm5675_vm6 = vmmov %vm5668_vm1 }
 0x328   : > { %3010 = vmatmul.mubr.msk.f32.gmra.mrb[24].mxu1 %vm5652_vm15, %v2260_v9  ;;  %2565 = vmatprep.mubr.f32.mxu0 %v5528_v6  ;;  %vm5676_vm15 = vmmov %vm5668_vm1 }
 0x329   : > { %2636 = vmatprep.mubr.f32.mxu1 %v5528_v6 }
 0x3ee   : > { %v2363_v44 = vpop.f32.mrb[18].mxu0 }
 0x3ef   : > { %v2452_v40 = vpop.f32.mrb[18].mxu1  ;;  %v2365_v11 = vpop.f32.mrb[19].mxu0  ;;  %v2364_v41 = vadd.f32 %v2363_v44, %v2268_v17 }
 0x3f0   : > { %v2454_v20 = vpop.f32.mrb[19].mxu1  ;;  %v2453_v12 = vadd.f32 %v2452_v40, %v2268_v17  ;;  %v2366_v23 = vadd.f32 %v2365_v11, %v2268_v17 }
 0x3f1   : > { %v2455_v34 = vadd.f32 %v2454_v20, %v2268_v17  ;;  %v2475_v49 = vmax.f32 %v2364_v41, 0.0  ;;  %v2491_v41 = vld [vmem:[%s5301_s10] sm:$0x7] }
 0x3f2   : > { %v2369_v31 = vpop.f32.mrb[20].mxu0  ;;  %v2477_v55 = vmax.f32 %v2453_v12, 0.0  ;;  %v2476_v52 = vmax.f32 %v2366_v23, 0.0  ;;  %v2937_v12 = vsel %vm5656_vm13, 1.0, %v5528_v6 }
 0x3f3   : > { %v2370_v35 = vadd.f32 %v2369_v31, %v2273_v30  ;;  %v2458_v37 = vpop.f32.mrb[20].mxu1  ;;  %v2371_v39 = vpop.f32.mrb[21].mxu0  ;;  %v2478_v26 = vmax.f32 %v2455_v34, 0.0  ;;  %v1516_v34 = vrot.slane %v2937_v12, %v3797_v38 }
 0x3f4   : > { %v2459_v45 = vadd.f32 %v2458_v37, %v2273_v30  ;;  %v2372_v47 = vadd.f32 %v2371_v39, %v2273_v30  ;;  %v2460_v48 = vpop.f32.mrb[21].mxu1  ;;  %v5657_v37 = vld [vmem:[#allocation24_spill] sm:$0xff] }
 0x3f5   : > { %v2479_v58 = vmax.f32 %v2370_v35, 0.0  ;;  %v2461_v54 = vadd.f32 %v2460_v48, %v2273_v30  ;;  %v2872_v30 = vsel %vm5655_vm12, 1.0, %v5528_v6  ;;  %v1520_v35 = vrot.slane %v2937_v12, %v3776_v29  ;;  %v5659_v6 = vld [vmem:[#allocation21_spill] sm:$0xff] }
 0x3f6   : > { %v2481_v53 = vmax.f32 %v2459_v45, 0.0  ;;  %v2480_v56 = vmax.f32 %v2372_v47, 0.0  ;;  %v2375_v61 = vpop.f32.mrb[22].mxu0  ;;  %v999_v23 = vrot.slane %v2872_v30, %v3797_v38  ;;  %v1003_v31 = vrot.slane %v2872_v30, %v3776_v29 }
 0x3f7   : > { %v3308_v15 = vpack.c.bf16 %v2479_v58, %v2475_v49  ;;  %v2482_v2 = vmax.f32 %v2461_v54, 0.0  ;;  %v2464_v57 = vpop.f32.mrb[22].mxu1  ;;  %v2377_v59 = vpop.f32.mrb[23].mxu0  ;;  %v2376_v32 = vadd.f32 %v2375_v61, %v2278_v3  ;;  %v966_v39 = vrot.slane %v5657_v37, %v3797_v38  ;;  %v5660_v58 = vld [vmem:[#allocation26_spill] sm:$0xff] }
 0x3f8   : > { %v3316_v13 = vpack.c.bf16 %v2481_v53, %v2477_v55  ;;  %v3306_v4 = vpack.c.bf16 %v2480_v56, %v2476_v52  ;;  %v2466_v7 = vpop.f32.mrb[23].mxu1  ;;  %v2465_v36 = vadd.f32 %v2464_v57, %v2278_v3  ;;  %v2378_v50 = vadd.f32 %v2377_v59, %v2278_v3  ;;  %v5663_v56 = vld [vmem:[#allocation25_spill] sm:$0xff]  ;;  %v5667_v57 = vld [vmem:[#allocation22_spill] sm:$0xff] }
 0x3f9   : > { %v3314_v25 = vpack.c.bf16 %v2482_v2, %v2478_v26  ;;  %v2467_v46 = vadd.f32 %v2466_v7, %v2278_v3  ;;  %v2483_v8 = vmax.f32 %v2376_v32, 0.0  ;;  %v970_v45 = vrot.slane %v5657_v37, %v3776_v29 }
 0x3fa   : > { %v2381_v21 = vpop.f32.mrb[24].mxu0  ;;  %3307 = vmatprep.subr.bf16.mxu0 %v3306_v4  ;;  %v2485_v0 = vmax.f32 %v2465_v36, 0.0  ;;  %v2484_v62 = vmax.f32 %v2378_v50, 0.0  ;;  %v977_v47 = vrot.slane %v5658_v42, %v3797_v38  ;;  %v988_v48 = vrot.slane %v5659_v6, %v3797_v38 }
 0x3fb   : > { %v2382_v51 = vadd.f32 %v2381_v21, %v2283_v43  ;;  %v2470_v1 = vpop.f32.mrb[24].mxu1  ;;  %3315 = vmatprep.subr.bf16.mxu1 %v3314_v25  ;;  %v2383_v14 = vpop.f32.mrb[25].mxu0  ;;  %3309 = vmatpush1.bf16.msra.mxu0 %v3308_v15  ;;  %v2486_v9 = vmax.f32 %v2467_v46, 0.0  ;;  %v992_v49 = vrot.slane %v5659_v6, %v3776_v29  ;;  %v1483_v54 = vrot.slane %v5660_v58, %v3797_v38 }
 0x3fc   : > { %v2471_v60 = vadd.f32 %v2470_v1, %v2283_v43  ;;  %v2384_v22 = vadd.f32 %v2383_v14, %v2283_v43  ;;  %v2472_v16 = vpop.f32.mrb[25].mxu1  ;;  %3317 = vmatpush1.bf16.msra.mxu1 %v3316_v13  ;;  %v1487_v55 = vrot.slane %v5660_v58, %v3776_v29  ;;  %v1006_v52 = vsel %vm5661_vm3, %v966_v39, %v977_v47 }
 0x3fd   : > { %v2487_v33 = vmax.f32 %v2382_v51, 0.0  ;;  %v2473_v19 = vadd.f32 %v2472_v16, %v2283_v43  ;;  %v1007_v53 = vsel %vm5662_vm2, %v970_v45, %v981_v10  ;;  %v1494_v61 = vrot.slane %v5663_v56, %v3797_v38 }
 0x3fe   : > { %v2489_v24 = vmax.f32 %v2471_v60, 0.0  ;;  %v2488_v27 = vmax.f32 %v2384_v22, 0.0  ;;  %v1498_v26 = vrot.slane %v5663_v56, %v3776_v29  ;;  %v1008_v15 = vsel %vm5665_vm4, %v1006_v52, %v988_v48 }
 0x3ff   : > { %v3312_v44 = vpack.c.bf16 %v2487_v33, %v2483_v8  ;;  %v2490_v40 = vmax.f32 %v2473_v19, 0.0  ;;  %v1009_v2 = vsel %vm5666_vm10, %v1007_v53, %v992_v49  ;;  %v1505_v59 = vrot.slane %v5667_v57, %v3797_v38 }
 0x400   : > { %v3320_v11 = vpack.c.bf16 %v2489_v24, %v2485_v0  ;;  %v3310_v17 = vpack.c.bf16 %v2488_v27, %v2484_v62  ;;  %v1509_v3 = vrot.slane %v5667_v57, %v3776_v29  ;;  %v1010_v13 = vsel %vm5668_vm1, %v1008_v15, %v999_v23 }
 0x401   : > { %v3318_v20 = vpack.c.bf16 %v2490_v40, %v2486_v9  ;;  %v1011_v4 = vsel %vm5669_vm8, %v1009_v2, %v1003_v31  ;;  %v1523_v7 = vsel %vm5670_vm9, %v1483_v54, %v1494_v61  ;;  %v1524_v25 = vsel %vm5671_vm11, %v1487_v55, %v1498_v26 }
 0x402   : > { %3311 = vmatprep.subr.bf16.mxu0 %v3310_v17  ;;  %v1014_v32 = vcombine.low %v1010_v13, %v1011_v4  ;;  %v1525_v43 = vsel %vm5672_vm7, %v1523_v7, %v1505_v59  ;;  %v1526_v36 = vsel %vm5674_vm5, %v1524_v25, %v1509_v3 }
 0x403   : > { %3319 = vmatprep.subr.bf16.mxu1 %v3318_v20  ;;  %3313 = vmatpush1.bf16.msra.mxu0 %v3312_v44  ;;  %v1527_v38 = vsel %vm5675_vm6, %v1525_v43, %v1516_v34  ;;  %v1528_v29 = vsel %vm5676_vm15, %v1526_v36, %v1520_v35 }
 0x404   : > { %3321 = vmatpush1.bf16.msra.mxu1 %v3320_v11  ;;  %1016 = vst [vmem:[%s486_s1] sm:$0xff] %v1014_v32  ;;  %v1531_v50 = vcombine.low %v1527_v38, %v1528_v29 }
 0x406   : > { %3011 = vmatmul.mubr.msk.f32.vlgmr.msra.gmra.mrb[26].mxu0 %vm5653_vm14, %v2491_v41  ;;  %2938 = vst [vmem:[%s486_s1 + $0x8] sm:$0xff] %v1531_v50 }
 0x407   : > { %3012 = vmatmul.mubr.msk.f32.vlgmr.msra.gmra.mrb[26].mxu1 %vm5654_vm0, %v2491_v41 }
 0x408   : > { %3440 = shalt.err (!%p3437_p2)
}
 0x409   : > { %s3441_s16 = scalar_lea.hbm %s5197_s24, 256  ;;  %s3445_s28 = scalar_lea.hbm %s5677_s18, 512 }
 0x40a   : > { %p3442_p3 = scmp.ne.s32.totalorder %s5197_s24, %s3441_s16  ;;  %p3446_p8 = scmp.lt.u32.totalorder %s5197_s24, %s5677_s18 }
 0x40b   : > { %p3447_p11 = scmp.lt.u32.totalorder %s3445_s28, %s3441_s16  ;;  %p3449_p10 = scmp.lt.u32.totalorder %s3441_s16, %s5197_s24 }
 0x40c   : > { %p3443_p4 = pnand %p3442_p3, %p3645_p5 }
 0x40d   : > { %p3448_p9 = por %p3447_p11, %p3446_p8 }
 0x40e   : > { %p3444_p7 = pneg %p3443_p4 }
 0x40f   : > { %p3450_p12 = por %p3449_p10, %p3448_p9 }
 0x411   : > { %p3451_p13 = pnand %p3450_p12, %p3444_p7 }
 0x413   : > { %3454 = shalt.err (!%p3451_p13)
}
 0x414   : > { %s3532_s27 = smov 128   ;;  %s3533_s21 = smov 8   ;;  %v2496_v21 = vpop.permute.xlu0 %2495  ;;  %v2647_v51 = vrot.slane %v5085_v63, 5  ;;  %v2649_v22 = vrot.slane %v5087_v18, 5  ;;  %v2648_v16 = vrot.slane %v5089_v28, 5  ;;  %v2650_v0 = vrot.slane %v5095_v5, 5  ;;  %vm5678_vm14 = vmmov %vm5668_vm1 }
 0x415   : > { %3337 = dma.vmem_to_hbm [thread:$0]  (%p3645_p5), %s5199_s23, 256, %s5197_s24, %s2689_s30, %s3532_s27, %s3532_s27, %s3533_s21   ;;  %vm5679_vm0 = vcmask 1045504   ;;  %vm5680_vm12 = vmmov %vm5668_vm1 }
 0x416   : > { %s3331_s17 = smul.u32 2560, %s5664_s19  ;;  %s2702_s14 = sshll.u32 %s5091_s13, 4  ;;  %vm5681_vm13 = vmmov %vm5668_vm1  ;;  %s5235_s14 = int_to_ptr.vmem [resolvable:$true] %s2702_s14 }
 0x417   : > { %vm5682_vm3 = vmmov %vm5679_vm0  ;;  %s5685_s23 = sld [smem:[#allocation29_spill]]  ;;  %s2684_s20 = scalar_lea.sflag [#allocation5], %s5081_s29 }
 0x418   : > { %vm5683_vm2 = vmmov %vm5679_vm0  ;;  %s3455_s22 = scalar_lea.vmem %s5235_s14, 2560  ;;  %s3534_s16 = smov [#allocation7]  }
 0x419   : > { %vm5684_vm4 = vmmov %vm5668_vm1  ;;  %p3456_p0 = scmp.ne.s32.totalorder %s5235_s14, %s3455_s22  ;;  %s3459_s15 = sshll.u32 %s3534_s16, 4  ;;  %s3460_s15 = int_to_ptr.vmem [resolvable:$false] %s3459_s15 }
 0x41a   : > { %vm5686_vm10 = vmmov %vm5679_vm0  ;;  %s3461_s12 = scalar_lea.vmem %s3460_s15, 5120  ;;  %p3462_p3 = scmp.lt.s32.totalorder %s5235_s14, %s3460_s15 }
 0x41b   : > { %p3457_p1 = pnand %p3456_p0, %p3645_p5  ;;  %p3463_p4 = scmp.lt.s32.totalorder %s3461_s12, %s3455_s22 }
 0x41d   : > { %s5244_s30 = scalar_lea.hbm %s5685_s23, %s3331_s17  ;;  %p3458_p2 = pneg %p3457_p1 }
 0x41e   : > { %p3464_p7 = por %p3463_p4, %p3462_p3 }
 0x420   : > { %p3465_p8 = pnand %p3464_p7, %p3458_p2 }
 0x4d9   : > { %v2567_v46 = vpop.f32.mrb[26].mxu0 }
 0x4da   : > { %v2568_v1 = vadd.f32 %v2567_v46, %v2496_v21  ;;  %v2638_v14 = vpop.f32.mrb[26].mxu1  ;;  %v2569_v60 = vpop.f32.mrb[27].mxu0 }
 0x4db   : > { %v2639_v8 = vadd.f32 %v2638_v14, %v2496_v21  ;;  %v2570_v33 = vadd.f32 %v2569_v60, %v2496_v21  ;;  %v2640_v19 = vpop.f32.mrb[27].mxu1 }
 0x4dc   : > { %v2655_v63 = vsel %vm5678_vm14, %v2568_v1, %v2647_v51  ;;  %v2641_v62 = vadd.f32 %v2640_v19, %v2496_v21 }
 0x4dd   : > { %v2659_v24 = vsel %vm5679_vm0, %v2655_v63, 0.0  ;;  %v2657_v27 = vsel %vm5680_vm12, %v2639_v8, %v2649_v22  ;;  %v2656_v18 = vsel %vm5681_vm13, %v2570_v33, %v2648_v16 }
 0x4de   : > { %2663 = vst [vmem:[%s5091_s13] sm:$0xff] %v2659_v24  ;;  %v2661_v28 = vsel %vm5682_vm3, %v2657_v27, 0.0  ;;  %v2660_v5 = vsel %vm5683_vm2, %v2656_v18, 0.0  ;;  %v2658_v9 = vsel %vm5684_vm4, %v2641_v62, %v2650_v0 }
 0x4df   : > { %2665 = vst [vmem:[%s5091_s13 + $0x10] sm:$0xff] %v2661_v28  ;;  %2664 = vst [vmem:[%s5091_s13 + $0x8] sm:$0xff] %v2660_v5  ;;  %v2662_v44 = vsel %vm5686_vm10, %v2658_v9, 0.0 }
 0x4e0   : > { %2666 = vst [vmem:[%s5091_s13 + $0x18] sm:$0xff] %v2662_v44 }
 0x4e1   : > { %3468 = shalt.err (!%p3465_p8)
}
 0x4e2   : > { %s3469_s13 = scalar_lea.hbm %s5244_s30, 2560  ;;  %s3473_s1 = scalar_lea.hbm %s5685_s23, 5120 }
 0x4e3   : > { %p3470_p11 = scmp.ne.s32.totalorder %s5244_s30, %s3469_s13  ;;  %p3474_p12 = scmp.lt.u32.totalorder %s5244_s30, %s5685_s23 }
 0x4e4   : > { %p3475_p13 = scmp.lt.u32.totalorder %s3473_s1, %s3469_s13  ;;  %p3477_p1 = scmp.lt.u32.totalorder %s3469_s13, %s5244_s30 }
 0x4e5   : > { %p3471_p9 = pnand %p3470_p11, %p3645_p5 }
 0x4e6   : > { %p3476_p0 = por %p3475_p13, %p3474_p12 }
 0x4e7   : > { %p3472_p10 = pneg %p3471_p9 }
 0x4e8   : > { %p3478_p2 = por %p3477_p1, %p3476_p0 }
 0x4ea   : > { %p3479_p3 = pnand %p3478_p2, %p3472_p10 }
 0x4ec   : > { %3482 = shalt.err (!%p3479_p3)
}
 0x4ed   : > { %s3535_s17 = smov 512   ;;  %s3536_s19 = smov 32  }
 0x4ee   : > { %3336 = dma.vmem_to_hbm [thread:$0]  (%p3645_p5), %s5235_s14, 2560, %s5244_s30, %s2684_s20, %s3535_s17, %s3535_s17, %s3536_s19  }
 0x4ef PF: > { %s5687_s24 = sld [smem:[#allocation15_spill]]  ;;  %s5688_s22 = sld [smem:[#allocation13_spill]] }
 0x4f5   : > { %p3353_p4 = scmp.ge.s32.totalorder %s5687_s24, 2  ;;  %s2733_s15 = sand.u32 1, %s5688_s22  }
 0x4f6   : > { %s2734_s12 = scalar_lea.sflag [#allocation5], %s2733_s15 }
 0x4f7   : > { %p3345_p7 = pnand %p3353_p4, %p3649_p6 }
 0x4f9   : > { %3504 = dma.done.wait (!%p3345_p7), %s2734_s12, 2560  }
 0x4fa   : > { %3506 = vsyncadd (!%p3345_p7), %s2734_s12, 4294964736  ;;  %s2743_s13 = scalar_lea.sflag [#allocation9], %s2733_s15 }
 0x4fb   : > { %3508 = dma.done.wait (!%p3345_p7), %s2743_s13, 256  }
 0x4fc   : > { %3510 = vsyncadd (!%p3345_p7), %s2743_s13, 4294967040  ;;  %s5690_s28 = sld [smem:[#allocation17_spill]]  ;;  %s5691_s0 = sld [smem:[#allocation14_spill]] }
 0x4fd   : > { %s5692_s27 = sld [smem:[#allocation18_spill]]  ;;  %s5693_s25 = smov %s3517_s26 }
 0x502   : > { %p28_p5 = scmp.ge.s32.totalorder %s5690_s28, 4   ;;  %s5694_s26 = smov %s5691_s0 }
 0x504   :  { %30 = sbr.rel (!%p28_p5) target bundleno = 11 (0xb), region = 133 }
 0x50b   :  { %2748 = vsyncpa [#allocation5], 1 }
 0x50c   :  { %2750 = vsyncpa [#allocation5 + $0x1], 1 }
 0x50d   :  { %2751 = vsyncpa [#allocation9], 1 }
 0x50e   :  { %2753 = vsyncpa [#allocation9 + $0x1], 1 }
 0x50f   :  { %2754 = vsyncpa [#allocation6], 1 }
 0x510   :  { %2756 = vsyncpa [#allocation6 + $0x1], 1 }

</bundles_post_ra>
